<compile_context>
chip_gen: v7x
topology: tpu7x:2x2x1
jax: 0.10.0
libtpu: 0.0.40
codegen_flags: <defaults>
</compile_context>

<pallas_src>
import functools

import jax
import jax.numpy as jnp
from jax.experimental import pallas as pl
from jax.experimental.pallas import tpu as pltpu

IN_DIM = 28 * 28          # 784
H1, H2, H3 = 512, 256, 64
H3_PAD = 128              # lane-full padded width for layer 3
OUT_DIM = 10
OUT_PAD = 128             # lane-dense padded logits width


def _round_up(x, m):
    return ((x + m - 1) // m) * m


def _mlp_kernel(x_ref,
                w1_ref, b1_ref,
                w2_ref, b2_ref,
                w3_ref, b3_ref,
                w4_ref, b4_ref,
                o_ref):
    """Fused 4-layer MLP (BN folded into weights): (Linear -> ReLU) x3 -> Linear."""
    # x arrives f32 straight from HBM; cast to bf16 here (fused into the kernel,
    # no extra wrapper-side HBM read/write pass).
    x = x_ref[...].astype(jnp.bfloat16)                      # (TILE_M, 784)

    # Layer 1: Linear(784, 512) [BN folded] + ReLU
    h = jnp.dot(x, w1_ref[...], preferred_element_type=jnp.float32) + b1_ref[...]
    h = jnp.maximum(h, 0.0).astype(jnp.bfloat16)

    # Layer 2: Linear(512, 256) [BN folded] + ReLU
    h = jnp.dot(h, w2_ref[...], preferred_element_type=jnp.float32) + b2_ref[...]
    h = jnp.maximum(h, 0.0).astype(jnp.bfloat16)

    # Layer 3: Linear(256, 64 -> padded 128) [BN folded] + ReLU (pad cols are 0)
    h = jnp.dot(h, w3_ref[...], preferred_element_type=jnp.float32) + b3_ref[...]
    h = jnp.maximum(h, 0.0).astype(jnp.bfloat16)

    # Layer 4: Linear(64 -> 128, 10 -> padded 128) -> lane-dense bf16 logits block
    logits = jnp.dot(h, w4_ref[...], preferred_element_type=jnp.float32) + b4_ref[...]
    o_ref[...] = logits.astype(o_ref.dtype)


def init_params(key):
    """Deterministic parameter init matching the PyTorch module's shapes."""
    dims = [(IN_DIM, H1), (H1, H2), (H2, H3), (H3, OUT_DIM)]
    params = {}
    for i, (fan_in, fan_out) in enumerate(dims, start=1):
        key, kw, kb = jax.random.split(key, 3)
        bound = 1.0 / jnp.sqrt(fan_in)
        # stored as (in, out) so kernel does x @ W + b (== x @ W_pt.T + b)
        params[f"w{i}"] = jax.random.uniform(kw, (fan_in, fan_out), jnp.float32,
                                             -bound, bound)
        params[f"b{i}"] = jax.random.uniform(kb, (1, fan_out), jnp.float32,
                                             -bound, bound)
    # BatchNorm1d params for layers 1..3 (gamma, beta, running_mean, running_var)
    for i, d in enumerate([H1, H2, H3], start=1):
        key, kg, kbt, km, kv = jax.random.split(key, 5)
        params[f"gamma{i}"] = 1.0 + 0.1 * jax.random.normal(kg, (1, d), jnp.float32)
        params[f"beta{i}"] = 0.1 * jax.random.normal(kbt, (1, d), jnp.float32)
        params[f"rmean{i}"] = 0.1 * jax.random.normal(km, (1, d), jnp.float32)
        params[f"rvar{i}"] = jax.random.uniform(kv, (1, d), jnp.float32, 0.5, 1.5)
    return params


def _fold_bn(gamma, beta, rmean, rvar, eps=1e-5):
    scale = gamma / jnp.sqrt(rvar + eps)
    shift = beta - rmean * scale
    return scale, shift


def _prepare_operands(params):
    """Fold BN into Linear, pad to lane-dense widths, cast matmul weights to bf16."""
    s1, t1 = _fold_bn(params["gamma1"], params["beta1"], params["rmean1"], params["rvar1"])
    s2, t2 = _fold_bn(params["gamma2"], params["beta2"], params["rmean2"], params["rvar2"])
    s3, t3 = _fold_bn(params["gamma3"], params["beta3"], params["rmean3"], params["rvar3"])

    w1 = (params["w1"] * s1).astype(jnp.bfloat16)             # (784, 512)
    b1 = (params["b1"] * s1 + t1).astype(jnp.float32)         # (1, 512)

    w2 = (params["w2"] * s2).astype(jnp.bfloat16)             # (512, 256)
    b2 = (params["b2"] * s2 + t2).astype(jnp.float32)         # (1, 256)

    w3f = params["w3"] * s3                                    # (256, 64)
    b3f = params["b3"] * s3 + t3                                # (1, 64)
    w3 = jnp.pad(w3f, ((0, 0), (0, H3_PAD - H3))).astype(jnp.bfloat16)   # (256, 128)
    b3 = jnp.pad(b3f, ((0, 0), (0, H3_PAD - H3))).astype(jnp.float32)    # (1, 128)

    # Layer 4: pad rows 64->128 (matches padded activations; pad rows multiply
    # zero activations) and cols 10->128 (lane-dense output; padded logits = 0).
    w4 = jnp.pad(params["w4"],
                 ((0, H3_PAD - H3), (0, OUT_PAD - OUT_DIM))).astype(jnp.bfloat16)  # (128, 128)
    b4 = jnp.pad(params["b4"], ((0, 0), (0, OUT_PAD - OUT_DIM))).astype(jnp.float32)  # (1, 128)

    return w1, b1, w2, b2, w3, b3, w4, b4


def _choose_tiling(n):
    """Pick (tile_m, padded_batch). tile_m is always a multiple of 16 (bf16 sublanes)."""
    if n <= 256:
        tile = _round_up(n, 16)            # single tile; pads at most 15 rows
        return tile, tile
    if n <= 1024:
        # Two tiles so both v7x TensorCores get a step; >=128 rows per tile keeps
        # the MXU well fed, and the pad stays tiny (< 32 rows).
        tile = _round_up((n + 1) // 2, 16)
        return tile, 2 * tile
    # Big batches: large tiles amortize the ~0.35 us per-step overhead; prefer a
    # tile that divides n exactly so no padded HBM copy of x is materialized.
    for tile in (512, 256, 128):
        if n % tile == 0:
            return tile, n
    return 512, _round_up(n, 512)


@functools.partial(jax.jit, static_argnames=("single_buffer",))
def _forward_impl(x, params, *, single_buffer):
    n = x.shape[0]
    x2d = x.reshape(n, -1)                 # nn.Flatten(); stays f32 (cast in-kernel)
    tile_m, n_pad = _choose_tiling(n)
    if n_pad != n:
        x2d = jnp.pad(x2d, ((0, n_pad - n), (0, 0)))

    w1, b1, w2, b2, w3, b3, w4, b4 = _prepare_operands(params)

    const = lambda i: (0, 0)               # weights/biases: VMEM-resident across steps
    if single_buffer:
        # Constant-index operands never re-DMA; a second buffer is wasted VMEM.
        const_kw = dict(pipeline_mode=pl.Buffered(1))
    else:
        const_kw = {}

    in_specs = [
        pl.BlockSpec((tile_m, IN_DIM), lambda i: (i, 0)),     # x tile (pipelined)
        pl.BlockSpec((IN_DIM, H1), const, **const_kw),
        pl.BlockSpec((1, H1), const, **const_kw),
        pl.BlockSpec((H1, H2), const, **const_kw),
        pl.BlockSpec((1, H2), const, **const_kw),
        pl.BlockSpec((H2, H3_PAD), const, **const_kw),
        pl.BlockSpec((1, H3_PAD), const, **const_kw),
        pl.BlockSpec((H3_PAD, OUT_PAD), const, **const_kw),
        pl.BlockSpec((1, OUT_PAD), const, **const_kw),
    ]
    out_specs = pl.BlockSpec((tile_m, OUT_PAD), lambda i: (i, 0))

    logits_padded = pl.pallas_call(
        _mlp_kernel,
        out_shape=jax.ShapeDtypeStruct((n_pad, OUT_PAD), jnp.bfloat16),
        grid=(n_pad // tile_m,),
        in_specs=in_specs,
        out_specs=out_specs,
        compiler_params=pltpu.CompilerParams(
            dimension_semantics=("parallel",),
            vmem_limit_bytes=64 * 1024 * 1024,
        ),
    )(x2d, w1, b1, w2, b2, w3, b3, w4, b4)

    return logits_padded[:n, :OUT_DIM].astype(jnp.float32)


_SINGLE_BUFFER_OK = None   # lazily probed: does this JAX accept pl.Buffered(1)?


def neural_network_forward(x, params):
    """x: (N, 1, 28, 28) float32  ->  logits (N, 10) float32."""
    global _SINGLE_BUFFER_OK
    if _SINGLE_BUFFER_OK is None:
        try:
            out = _forward_impl(x, params, single_buffer=True)
            jax.block_until_ready(out)
            _SINGLE_BUFFER_OK = True
            return out
        except Exception:
            # pipeline_mode=pl.Buffered(1) not supported here -> default buffering.
            _SINGLE_BUFFER_OK = False
    return _forward_impl(x, params, single_buffer=_SINGLE_BUFFER_OK)


def _reference_forward(x, params):
    """Pure-JAX f32 reference for correctness check (eval-mode BN)."""
    n = x.shape[0]
    h = x.reshape(n, -1).astype(jnp.float32)
    for i in range(1, 4):
        h = h @ params[f"w{i}"] + params[f"b{i}"]
        s, t = _fold_bn(params[f"gamma{i}"], params[f"beta{i}"],
                        params[f"rmean{i}"], params[f"rvar{i}"])
        h = jnp.maximum(h * s + t, 0.0)
    return h @ params["w4"] + params["b4"]


if __name__ == "__main__":
    key = jax.random.PRNGKey(0)
    key, kparams, kx = jax.random.split(key, 3)
    params = init_params(kparams)

    # Small MNIST-shaped batch: NCHW (8, 1, 28, 28)
    x = jax.random.normal(kx, (8, 1, 28, 28), jnp.float32)

    logits = neural_network_forward(x, params)
    jax.block_until_ready(logits)

    ref = _reference_forward(x, params)
    assert logits.shape == (8, 10)
    # bf16 matmul operands / bf16 logits store (f32 accumulation) vs f32 reference.
    assert jnp.allclose(logits, ref, atol=5e-2, rtol=5e-2)

    print("KERNEL_OK")
</pallas_src>

<mosaic_0001>
module attributes {stable_mosaic.version = 11 : i64} {
  func.func @_mlp_kernel(%arg0: i32, %arg1: memref<16x784xf32, #tpu.memory_space<vmem>>, %arg2: memref<784x512xbf16, #tpu.memory_space<vmem>>, %arg3: memref<1x512xf32, #tpu.memory_space<vmem>>, %arg4: memref<512x256xbf16, #tpu.memory_space<vmem>>, %arg5: memref<1x256xf32, #tpu.memory_space<vmem>>, %arg6: memref<256x128xbf16, #tpu.memory_space<vmem>>, %arg7: memref<1x128xf32, #tpu.memory_space<vmem>>, %arg8: memref<128x128xbf16, #tpu.memory_space<vmem>>, %arg9: memref<1x128xf32, #tpu.memory_space<vmem>>, %arg10: memref<16x128xbf16, #tpu.memory_space<vmem>>) attributes {dimension_semantics = [#tpu.dimension_semantics<parallel>], iteration_bounds = array<i64: 1>, scalar_prefetch = 0 : i64, scratch_operands = 0 : i64, tpu.core_type = #tpu.core_type<tc>, window_params = [{transform_indices = @transform_0, window_bounds = array<i64: 16, 784>}, {pipeline_mode = #tpu.pipeline_mode<synchronous>, transform_indices = @transform_1, window_bounds = array<i64: 784, 512>}, {pipeline_mode = #tpu.pipeline_mode<synchronous>, transform_indices = @transform_2, window_bounds = array<i64: 1, 512>}, {pipeline_mode = #tpu.pipeline_mode<synchronous>, transform_indices = @transform_3, window_bounds = array<i64: 512, 256>}, {pipeline_mode = #tpu.pipeline_mode<synchronous>, transform_indices = @transform_4, window_bounds = array<i64: 1, 256>}, {pipeline_mode = #tpu.pipeline_mode<synchronous>, transform_indices = @transform_5, window_bounds = array<i64: 256, 128>}, {pipeline_mode = #tpu.pipeline_mode<synchronous>, transform_indices = @transform_6, window_bounds = array<i64: 1, 128>}, {pipeline_mode = #tpu.pipeline_mode<synchronous>, transform_indices = @transform_7, window_bounds = array<i64: 128, 128>}, {pipeline_mode = #tpu.pipeline_mode<synchronous>, transform_indices = @transform_8, window_bounds = array<i64: 1, 128>}, {transform_indices = @transform_9, window_bounds = array<i64: 16, 128>}]} {
    %c0 = arith.constant 0 : index
    %c0_0 = arith.constant 0 : index
    %0 = vector.load %arg1[%c0, %c0_0] : memref<16x784xf32, #tpu.memory_space<vmem>>, vector<16x784xf32>
    %1 = arith.truncf %0 : vector<16x784xf32> to vector<16x784xbf16>
    %c0_1 = arith.constant 0 : index
    %c0_2 = arith.constant 0 : index
    %2 = vector.load %arg2[%c0_1, %c0_2] : memref<784x512xbf16, #tpu.memory_space<vmem>>, vector<784x512xbf16>
    %cst = arith.constant dense<0.000000e+00> : vector<16x512xf32>
    %3 = tpu.matmul %1, %2, %cst {dimension_numbers = #tpu.dot_dimension_numbers<[1], [0], [0], [1], [0, 0, 1, 1], [], []>} : vector<16x784xbf16>, vector<784x512xbf16>, vector<16x512xf32> -> vector<16x512xf32>
    %c0_3 = arith.constant 0 : index
    %c0_4 = arith.constant 0 : index
    %4 = vector.load %arg3[%c0_3, %c0_4] : memref<1x512xf32, #tpu.memory_space<vmem>>, vector<1x512xf32>
    %5 = vector.broadcast %4 : vector<1x512xf32> to vector<16x512xf32>
    %6 = arith.addf %3, %5 : vector<16x512xf32>
    %cst_5 = arith.constant 0.000000e+00 : f32
    %7 = vector.broadcast %cst_5 : f32 to vector<16x512xf32>
    %8 = arith.maximumf %6, %7 : vector<16x512xf32>
    %9 = arith.truncf %8 : vector<16x512xf32> to vector<16x512xbf16>
    %c0_6 = arith.constant 0 : index
    %c0_7 = arith.constant 0 : index
    %10 = vector.load %arg4[%c0_6, %c0_7] : memref<512x256xbf16, #tpu.memory_space<vmem>>, vector<512x256xbf16>
    %cst_8 = arith.constant dense<0.000000e+00> : vector<16x256xf32>
    %11 = tpu.matmul %9, %10, %cst_8 {dimension_numbers = #tpu.dot_dimension_numbers<[1], [0], [0], [1], [0, 0, 1, 1], [], []>} : vector<16x512xbf16>, vector<512x256xbf16>, vector<16x256xf32> -> vector<16x256xf32>
    %c0_9 = arith.constant 0 : index
    %c0_10 = arith.constant 0 : index
    %12 = vector.load %arg5[%c0_9, %c0_10] : memref<1x256xf32, #tpu.memory_space<vmem>>, vector<1x256xf32>
    %13 = vector.broadcast %12 : vector<1x256xf32> to vector<16x256xf32>
    %14 = arith.addf %11, %13 : vector<16x256xf32>
    %cst_11 = arith.constant 0.000000e+00 : f32
    %15 = vector.broadcast %cst_11 : f32 to vector<16x256xf32>
    %16 = arith.maximumf %14, %15 : vector<16x256xf32>
    %17 = arith.truncf %16 : vector<16x256xf32> to vector<16x256xbf16>
    %c0_12 = arith.constant 0 : index
    %c0_13 = arith.constant 0 : index
    %18 = vector.load %arg6[%c0_12, %c0_13] : memref<256x128xbf16, #tpu.memory_space<vmem>>, vector<256x128xbf16>
    %cst_14 = arith.constant dense<0.000000e+00> : vector<16x128xf32>
    %19 = tpu.matmul %17, %18, %cst_14 {dimension_numbers = #tpu.dot_dimension_numbers<[1], [0], [0], [1], [0, 0, 1, 1], [], []>} : vector<16x256xbf16>, vector<256x128xbf16>, vector<16x128xf32> -> vector<16x128xf32>
    %c0_15 = arith.constant 0 : index
    %c0_16 = arith.constant 0 : index
    %20 = vector.load %arg7[%c0_15, %c0_16] : memref<1x128xf32, #tpu.memory_space<vmem>>, vector<1x128xf32>
    %21 = vector.broadcast %20 : vector<1x128xf32> to vector<16x128xf32>
    %22 = arith.addf %19, %21 : vector<16x128xf32>
    %cst_17 = arith.constant 0.000000e+00 : f32
    %23 = vector.broadcast %cst_17 : f32 to vector<16x128xf32>
    %24 = arith.maximumf %22, %23 : vector<16x128xf32>
    %25 = arith.truncf %24 : vector<16x128xf32> to vector<16x128xbf16>
    %c0_18 = arith.constant 0 : index
    %c0_19 = arith.constant 0 : index
    %26 = vector.load %arg8[%c0_18, %c0_19] : memref<128x128xbf16, #tpu.memory_space<vmem>>, vector<128x128xbf16>
    %cst_20 = arith.constant dense<0.000000e+00> : vector<16x128xf32>
    %27 = tpu.matmul %25, %26, %cst_20 {dimension_numbers = #tpu.dot_dimension_numbers<[1], [0], [0], [1], [0, 0, 1, 1], [], []>} : vector<16x128xbf16>, vector<128x128xbf16>, vector<16x128xf32> -> vector<16x128xf32>
    %c0_21 = arith.constant 0 : index
    %c0_22 = arith.constant 0 : index
    %28 = vector.load %arg9[%c0_21, %c0_22] : memref<1x128xf32, #tpu.memory_space<vmem>>, vector<1x128xf32>
    %29 = vector.broadcast %28 : vector<1x128xf32> to vector<16x128xf32>
    %30 = arith.addf %27, %29 : vector<16x128xf32>
    %31 = arith.truncf %30 : vector<16x128xf32> to vector<16x128xbf16>
    %c0_23 = arith.constant 0 : index
    %c0_24 = arith.constant 0 : index
    %32 = vector.load %arg10[%c0_23, %c0_24] : memref<16x128xbf16, #tpu.memory_space<vmem>>, vector<16x128xbf16>
    tpu.vector_store %arg10[%c0_23, %c0_24], %31 {strides = array<i32>} : memref<16x128xbf16, #tpu.memory_space<vmem>>, vector<16x128xbf16>,
    return
  }
  func.func @transform_0(%arg0: i32) -> (i32, i32) {
    %c0_i32 = arith.constant 0 : i32
    %c0_i32_0 = arith.constant 0 : i32
    return %arg0, %c0_i32 : i32, i32
  }
  func.func @transform_1(%arg0: i32) -> (i32, i32) {
    %c0_i32 = arith.constant 0 : i32
    %c0_i32_0 = arith.constant 0 : i32
    %c0_i32_1 = arith.constant 0 : i32
    return %c0_i32, %c0_i32_0 : i32, i32
  }
  func.func @transform_2(%arg0: i32) -> (i32, i32) {
    %c0_i32 = arith.constant 0 : i32
    %c0_i32_0 = arith.constant 0 : i32
    %c0_i32_1 = arith.constant 0 : i32
    return %c0_i32, %c0_i32_0 : i32, i32
  }
  func.func @transform_3(%arg0: i32) -> (i32, i32) {
    %c0_i32 = arith.constant 0 : i32
    %c0_i32_0 = arith.constant 0 : i32
    %c0_i32_1 = arith.constant 0 : i32
    return %c0_i32, %c0_i32_0 : i32, i32
  }
  func.func @transform_4(%arg0: i32) -> (i32, i32) {
    %c0_i32 = arith.constant 0 : i32
    %c0_i32_0 = arith.constant 0 : i32
    %c0_i32_1 = arith.constant 0 : i32
    return %c0_i32, %c0_i32_0 : i32, i32
  }
  func.func @transform_5(%arg0: i32) -> (i32, i32) {
    %c0_i32 = arith.constant 0 : i32
    %c0_i32_0 = arith.constant 0 : i32
    %c0_i32_1 = arith.constant 0 : i32
    return %c0_i32, %c0_i32_0 : i32, i32
  }
  func.func @transform_6(%arg0: i32) -> (i32, i32) {
    %c0_i32 = arith.constant 0 : i32
    %c0_i32_0 = arith.constant 0 : i32
    %c0_i32_1 = arith.constant 0 : i32
    return %c0_i32, %c0_i32_0 : i32, i32
  }
  func.func @transform_7(%arg0: i32) -> (i32, i32) {
    %c0_i32 = arith.constant 0 : i32
    %c0_i32_0 = arith.constant 0 : i32
    %c0_i32_1 = arith.constant 0 : i32
    return %c0_i32, %c0_i32_0 : i32, i32
  }
  func.func @transform_8(%arg0: i32) -> (i32, i32) {
    %c0_i32 = arith.constant 0 : i32
    %c0_i32_0 = arith.constant 0 : i32
    %c0_i32_1 = arith.constant 0 : i32
    return %c0_i32, %c0_i32_0 : i32, i32
  }
  func.func @transform_9(%arg0: i32) -> (i32, i32) {
    %c0_i32 = arith.constant 0 : i32
    %c0_i32_0 = arith.constant 0 : i32
    return %arg0, %c0_i32 : i32, i32
  }
}

module attributes {stable_mosaic.version = 11 : i64} {
  func.func @_mlp_kernel(%arg0: i32, %arg1: memref<16x784xf32, #tpu.memory_space<vmem>>, %arg2: memref<784x512xbf16, #tpu.memory_space<vmem>>, %arg3: memref<1x512xf32, #tpu.memory_space<vmem>>, %arg4: memref<512x256xbf16, #tpu.memory_space<vmem>>, %arg5: memref<1x256xf32, #tpu.memory_space<vmem>>, %arg6: memref<256x128xbf16, #tpu.memory_space<vmem>>, %arg7: memref<1x128xf32, #tpu.memory_space<vmem>>, %arg8: memref<128x128xbf16, #tpu.memory_space<vmem>>, %arg9: memref<1x128xf32, #tpu.memory_space<vmem>>, %arg10: memref<16x128xbf16, #tpu.memory_space<vmem>>) attributes {dimension_semantics = [#tpu.dimension_semantics<parallel>], iteration_bounds = array<i64: 1>, scalar_prefetch = 0 : i64, scratch_operands = 0 : i64, tpu.core_type = #tpu.core_type<tc>, window_params = [{transform_indices = @transform_0, window_bounds = array<i64: 16, 784>}, {pipeline_mode = #tpu.pipeline_mode<synchronous>, transform_indices = @transform_1, window_bounds = array<i64: 784, 512>}, {pipeline_mode = #tpu.pipeline_mode<synchronous>, transform_indices = @transform_2, window_bounds = array<i64: 1, 512>}, {pipeline_mode = #tpu.pipeline_mode<synchronous>, transform_indices = @transform_3, window_bounds = array<i64: 512, 256>}, {pipeline_mode = #tpu.pipeline_mode<synchronous>, transform_indices = @transform_4, window_bounds = array<i64: 1, 256>}, {pipeline_mode = #tpu.pipeline_mode<synchronous>, transform_indices = @transform_5, window_bounds = array<i64: 256, 128>}, {pipeline_mode = #tpu.pipeline_mode<synchronous>, transform_indices = @transform_6, window_bounds = array<i64: 1, 128>}, {pipeline_mode = #tpu.pipeline_mode<synchronous>, transform_indices = @transform_7, window_bounds = array<i64: 128, 128>}, {pipeline_mode = #tpu.pipeline_mode<synchronous>, transform_indices = @transform_8, window_bounds = array<i64: 1, 128>}, {transform_indices = @transform_9, window_bounds = array<i64: 16, 128>}]} {
    %c0 = arith.constant 0 : index
    %c0_0 = arith.constant 0 : index
    %0 = vector.load %arg1[%c0, %c0_0] : memref<16x784xf32, #tpu.memory_space<vmem>>, vector<16x784xf32>
    %1 = arith.truncf %0 : vector<16x784xf32> to vector<16x784xbf16>
    %c0_1 = arith.constant 0 : index
    %c0_2 = arith.constant 0 : index
    %2 = vector.load %arg2[%c0_1, %c0_2] : memref<784x512xbf16, #tpu.memory_space<vmem>>, vector<784x512xbf16>
    %cst = arith.constant dense<0.000000e+00> : vector<16x512xf32>
    %3 = tpu.matmul %1, %2, %cst {dimension_numbers = #tpu.dot_dimension_numbers<[1], [0], [0], [1], [0, 0, 1, 1], [], []>} : vector<16x784xbf16>, vector<784x512xbf16>, vector<16x512xf32> -> vector<16x512xf32>
    %c0_3 = arith.constant 0 : index
    %c0_4 = arith.constant 0 : index
    %4 = vector.load %arg3[%c0_3, %c0_4] : memref<1x512xf32, #tpu.memory_space<vmem>>, vector<1x512xf32>
    %5 = vector.broadcast %4 : vector<1x512xf32> to vector<16x512xf32>
    %6 = arith.addf %3, %5 : vector<16x512xf32>
    %cst_5 = arith.constant 0.000000e+00 : f32
    %7 = vector.broadcast %cst_5 : f32 to vector<16x512xf32>
    %8 = arith.maximumf %6, %7 : vector<16x512xf32>
    %9 = arith.truncf %8 : vector<16x512xf32> to vector<16x512xbf16>
    %c0_6 = arith.constant 0 : index
    %c0_7 = arith.constant 0 : index
    %10 = vector.load %arg4[%c0_6, %c0_7] : memref<512x256xbf16, #tpu.memory_space<vmem>>, vector<512x256xbf16>
    %cst_8 = arith.constant dense<0.000000e+00> : vector<16x256xf32>
    %11 = tpu.matmul %9, %10, %cst_8 {dimension_numbers = #tpu.dot_dimension_numbers<[1], [0], [0], [1], [0, 0, 1, 1], [], []>} : vector<16x512xbf16>, vector<512x256xbf16>, vector<16x256xf32> -> vector<16x256xf32>
    %c0_9 = arith.constant 0 : index
    %c0_10 = arith.constant 0 : index
    %12 = vector.load %arg5[%c0_9, %c0_10] : memref<1x256xf32, #tpu.memory_space<vmem>>, vector<1x256xf32>
    %13 = vector.broadcast %12 : vector<1x256xf32> to vector<16x256xf32>
    %14 = arith.addf %11, %13 : vector<16x256xf32>
    %cst_11 = arith.constant 0.000000e+00 : f32
    %15 = vector.broadcast %cst_11 : f32 to vector<16x256xf32>
    %16 = arith.maximumf %14, %15 : vector<16x256xf32>
    %17 = arith.truncf %16 : vector<16x256xf32> to vector<16x256xbf16>
    %c0_12 = arith.constant 0 : index
    %c0_13 = arith.constant 0 : index
    %18 = vector.load %arg6[%c0_12, %c0_13] : memref<256x128xbf16, #tpu.memory_space<vmem>>, vector<256x128xbf16>
    %cst_14 = arith.constant dense<0.000000e+00> : vector<16x128xf32>
    %19 = tpu.matmul %17, %18, %cst_14 {dimension_numbers = #tpu.dot_dimension_numbers<[1], [0], [0], [1], [0, 0, 1, 1], [], []>} : vector<16x256xbf16>, vector<256x128xbf16>, vector<16x128xf32> -> vector<16x128xf32>
    %c0_15 = arith.constant 0 : index
    %c0_16 = arith.constant 0 : index
    %20 = vector.load %arg7[%c0_15, %c0_16] : memref<1x128xf32, #tpu.memory_space<vmem>>, vector<1x128xf32>
    %21 = vector.broadcast %20 : vector<1x128xf32> to vector<16x128xf32>
    %22 = arith.addf %19, %21 : vector<16x128xf32>
    %cst_17 = arith.constant 0.000000e+00 : f32
    %23 = vector.broadcast %cst_17 : f32 to vector<16x128xf32>
    %24 = arith.maximumf %22, %23 : vector<16x128xf32>
    %25 = arith.truncf %24 : vector<16x128xf32> to vector<16x128xbf16>
    %c0_18 = arith.constant 0 : index
    %c0_19 = arith.constant 0 : index
    %26 = vector.load %arg8[%c0_18, %c0_19] : memref<128x128xbf16, #tpu.memory_space<vmem>>, vector<128x128xbf16>
    %cst_20 = arith.constant dense<0.000000e+00> : vector<16x128xf32>
    %27 = tpu.matmul %25, %26, %cst_20 {dimension_numbers = #tpu.dot_dimension_numbers<[1], [0], [0], [1], [0, 0, 1, 1], [], []>} : vector<16x128xbf16>, vector<128x128xbf16>, vector<16x128xf32> -> vector<16x128xf32>
    %c0_21 = arith.constant 0 : index
    %c0_22 = arith.constant 0 : index
    %28 = vector.load %arg9[%c0_21, %c0_22] : memref<1x128xf32, #tpu.memory_space<vmem>>, vector<1x128xf32>
    %29 = vector.broadcast %28 : vector<1x128xf32> to vector<16x128xf32>
    %30 = arith.addf %27, %29 : vector<16x128xf32>
    %31 = arith.truncf %30 : vector<16x128xf32> to vector<16x128xbf16>
    %c0_23 = arith.constant 0 : index
    %c0_24 = arith.constant 0 : index
    %32 = vector.load %arg10[%c0_23, %c0_24] : memref<16x128xbf16, #tpu.memory_space<vmem>>, vector<16x128xbf16>
    tpu.vector_store %arg10[%c0_23, %c0_24], %31 {strides = array<i32>} : memref<16x128xbf16, #tpu.memory_space<vmem>>, vector<16x128xbf16>,
    return
  }
  func.func @transform_0(%arg0: i32) -> (i32, i32) {
    %c0_i32 = arith.constant 0 : i32
    %c0_i32_0 = arith.constant 0 : i32
    return %arg0, %c0_i32 : i32, i32
  }
  func.func @transform_1(%arg0: i32) -> (i32, i32) {
    %c0_i32 = arith.constant 0 : i32
    %c0_i32_0 = arith.constant 0 : i32
    %c0_i32_1 = arith.constant 0 : i32
    return %c0_i32, %c0_i32_0 : i32, i32
  }
  func.func @transform_2(%arg0: i32) -> (i32, i32) {
    %c0_i32 = arith.constant 0 : i32
    %c0_i32_0 = arith.constant 0 : i32
    %c0_i32_1 = arith.constant 0 : i32
    return %c0_i32, %c0_i32_0 : i32, i32
  }
  func.func @transform_3(%arg0: i32) -> (i32, i32) {
    %c0_i32 = arith.constant 0 : i32
    %c0_i32_0 = arith.constant 0 : i32
    %c0_i32_1 = arith.constant 0 : i32
    return %c0_i32, %c0_i32_0 : i32, i32
  }
  func.func @transform_4(%arg0: i32) -> (i32, i32) {
    %c0_i32 = arith.constant 0 : i32
    %c0_i32_0 = arith.constant 0 : i32
    %c0_i32_1 = arith.constant 0 : i32
    return %c0_i32, %c0_i32_0 : i32, i32
  }
  func.func @transform_5(%arg0: i32) -> (i32, i32) {
    %c0_i32 = arith.constant 0 : i32
    %c0_i32_0 = arith.constant 0 : i32
    %c0_i32_1 = arith.constant 0 : i32
    return %c0_i32, %c0_i32_0 : i32, i32
  }
  func.func @transform_6(%arg0: i32) -> (i32, i32) {
    %c0_i32 = arith.constant 0 : i32
    %c0_i32_0 = arith.constant 0 : i32
    %c0_i32_1 = arith.constant 0 : i32
    return %c0_i32, %c0_i32_0 : i32, i32
  }
  func.func @transform_7(%arg0: i32) -> (i32, i32) {
    %c0_i32 = arith.constant 0 : i32
    %c0_i32_0 = arith.constant 0 : i32
    %c0_i32_1 = arith.constant 0 : i32
    return %c0_i32, %c0_i32_0 : i32, i32
  }
  func.func @transform_8(%arg0: i32) -> (i32, i32) {
    %c0_i32 = arith.constant 0 : i32
    %c0_i32_0 = arith.constant 0 : i32
    %c0_i32_1 = arith.constant 0 : i32
    return %c0_i32, %c0_i32_0 : i32, i32
  }
  func.func @transform_9(%arg0: i32) -> (i32, i32) {
    %c0_i32 = arith.constant 0 : i32
    %c0_i32_0 = arith.constant 0 : i32
    return %arg0, %c0_i32 : i32, i32
  }
}

</mosaic_0001>

<bundles_post_ra>
// kernel: _forward_impl.1
= control target key start
LH: loop header
LB: loop body
LE: loop exit
PB: predicated region body
PF: predicated region fallthrough
CT: control target
= control target key end

     0   :  { %14 = vsyncpa [#allocation3], 0  ;;  %s3826_s0 = inlined_call_operand.hbm [shape: f32[16,784], index: 0, kind: input, shape index: {}]   ;;  %s3827_s1 = inlined_call_operand.hbm [shape: bf16[784,512], index: 1, kind: input, shape index: {}]   ;;  %s3828_s2 = inlined_call_operand.hbm [shape: f32[1,512], index: 2, kind: input, shape index: {}]   ;;  %s3829_s3 = inlined_call_operand.hbm [shape: bf16[512,256], index: 3, kind: input, shape index: {}]   ;;  %s3830_s4 = inlined_call_operand.hbm [shape: f32[1,256], index: 4, kind: input, shape index: {}]   ;;  %s3831_s5 = inlined_call_operand.hbm [shape: bf16[256,128], index: 5, kind: input, shape index: {}]   ;;  %s3832_s6 = inlined_call_operand.hbm [shape: f32[1,128], index: 6, kind: input, shape index: {}]   ;;  %s3833_s7 = inlined_call_operand.hbm [shape: bf16[128,128], index: 7, kind: input, shape index: {}]   ;;  %s3834_s8 = inlined_call_operand.hbm [shape: f32[1,128], index: 8, kind: input, shape index: {}]   ;;  %s3835_s9 = inlined_call_operand.hbm [shape: bf16[16,128], index: 9, kind: output, shape index: {}]  }
   0x1   :  { %15 = vsyncpa [#allocation6], 0 }
   0x2   :  { %16 = vsyncpa [#allocation9], 0 }
   0x3   :  { %17 = vsyncpa [#allocation12], 0 }
   0x4   :  { %18 = vsyncpa [#allocation15], 0 }
   0x5   :  { %19 = vsyncpa [#allocation4], 0  ;;  %s3592_s30 = smov [#allocation5]   ;;  %s3360_s13 = scalar_lea.hbm %s3827_s1, 25088 }
   0x6   :  { %s37_s10 = sshll.u32 %s3592_s30, 4  ;;  %p3361_p0 = scmp.ne.s32.totalorder %s3827_s1, %s3360_s13  ;;  %s38_s10 = int_to_ptr.vmem [resolvable:$true] %s37_s10 }
   0x7   :  { %p3364_p1 = scmp.lt.u32.totalorder %s3360_s13, %s3827_s1 }
   0x9   :  { %p3366_p2 = pnand %p3364_p1, %p3361_p0 }
   0xb   :  { %3369 = shalt.err (!%p3366_p2)
}
   0xc   :  { %s3370_s18 = scalar_lea.vmem %s38_s10, 25088  ;;  %p3375_p4 = scmp.lt.s32.totalorder %s38_s10, %s38_s10 }
   0xd   :  { %p3371_p3 = scmp.ne.s32.totalorder %s38_s10, %s3370_s18  ;;  %p3376_p5 = scmp.lt.s32.totalorder %s3370_s18, %s3370_s18 }
   0xf   :  { %p3377_p6 = por %p3376_p5, %p3375_p4 }
  0x11   :  { %p3378_p7 = pnand %p3377_p6, %p3371_p3 }
  0x13   :  { %3381 = shalt.err (!%p3378_p7)
}
  0x14   :  { %s3593_s19 = smov 256   ;;  %s3594_s20 = smov 16  }
  0x15   :  { %43 = dma.hbm_to_vmem [thread:$0]  %s3827_s1, 25088, %s38_s10, [#allocation6], %s3593_s19, %s3593_s19, %s3594_s20  }
  0x16   :  { %s3595_s23 = smov [#allocation8]   ;;  %s3382_s27 = scalar_lea.hbm %s3829_s3, 8192 }
  0x17   :  { %s59_s24 = sshll.u32 %s3595_s23, 4  ;;  %p3383_p8 = scmp.ne.s32.totalorder %s3829_s3, %s3382_s27  ;;  %s60_s24 = int_to_ptr.vmem [resolvable:$true] %s59_s24 }
  0x18   :  { %p3386_p9 = scmp.lt.u32.totalorder %s3382_s27, %s3829_s3 }
  0x1a   :  { %p3388_p10 = pnand %p3386_p9, %p3383_p8 }
  0x1c   :  { %3391 = shalt.err (!%p3388_p10)
}
  0x1d   :  { %s3392_s12 = scalar_lea.vmem %s60_s24, 8192  ;;  %p3397_p12 = scmp.lt.s32.totalorder %s60_s24, %s60_s24 }
  0x1e   :  { %p3393_p11 = scmp.ne.s32.totalorder %s60_s24, %s3392_s12  ;;  %p3398_p13 = scmp.lt.s32.totalorder %s3392_s12, %s3392_s12 }
  0x20   :  { %p3399_p0 = por %p3398_p13, %p3397_p12 }
  0x22   :  { %p3400_p1 = pnand %p3399_p0, %p3393_p11 }
  0x24   :  { %3403 = shalt.err (!%p3400_p1)
}
  0x25   :  { %s3596_s1 = smov 128   ;;  %s3597_s10 = smov 8  }
  0x26   :  { %65 = dma.hbm_to_vmem [thread:$0]  %s3829_s3, 8192, %s60_s24, [#allocation9], %s3596_s1, %s3596_s1, %s3597_s10  }
  0x27   :  { %s3598_s15 = smov [#allocation11]   ;;  %s3404_s19 = scalar_lea.hbm %s3831_s5, 2048 }
  0x28   :  { %s81_s16 = sshll.u32 %s3598_s15, 4  ;;  %p3405_p2 = scmp.ne.s32.totalorder %s3831_s5, %s3404_s19  ;;  %s82_s16 = int_to_ptr.vmem [resolvable:$true] %s81_s16 }
  0x29   :  { %p3408_p3 = scmp.lt.u32.totalorder %s3404_s19, %s3831_s5 }
  0x2b   :  { %p3410_p4 = pnand %p3408_p3, %p3405_p2 }
  0x2d   :  { %3413 = shalt.err (!%p3410_p4)
}
  0x2e   :  { %s3414_s25 = scalar_lea.vmem %s82_s16, 2048  ;;  %p3419_p6 = scmp.lt.s32.totalorder %s82_s16, %s82_s16 }
  0x2f   :  { %p3415_p5 = scmp.ne.s32.totalorder %s82_s16, %s3414_s25  ;;  %p3420_p7 = scmp.lt.s32.totalorder %s3414_s25, %s3414_s25 }
  0x31   :  { %p3421_p8 = por %p3420_p7, %p3419_p6 }
  0x33   :  { %p3422_p9 = pnand %p3421_p8, %p3415_p5 }
  0x35   :  { %3425 = shalt.err (!%p3422_p9)
}
  0x36   :  { %s3599_s3 = smov 64   ;;  %s3600_s24 = smov 4  }
  0x37   :  { %87 = dma.hbm_to_vmem [thread:$0]  %s3831_s5, 2048, %s82_s16, [#allocation12], %s3599_s3, %s3599_s3, %s3600_s24  }
  0x38   :  { %s3601_s28 = smov [#allocation14]   ;;  %s3602_s30 = smov [#allocation2]  }
  0x39   :  { %s103_s29 = sshll.u32 %s3601_s28, 4  ;;  %s25_s11 = sshll.u32 %s3602_s30, 4  ;;  %s104_s29 = int_to_ptr.vmem [resolvable:$true] %s103_s29  ;;  %s26_s11 = int_to_ptr.vmem [resolvable:$true] %s25_s11 }
  0x3a   :  { %s3426_s10 = scalar_lea.hbm %s3833_s7, 1024 }
  0x3b   :  { %p3427_p10 = scmp.ne.s32.totalorder %s3833_s7, %s3426_s10  ;;  %p3430_p11 = scmp.lt.u32.totalorder %s3426_s10, %s3833_s7 }
  0x3d   :  { %p3432_p12 = pnand %p3430_p11, %p3427_p10 }
  0x3f   :  { %3435 = shalt.err (!%p3432_p12)
}
  0x40   :  { %s3436_s5 = scalar_lea.vmem %s104_s29, 1024  ;;  %p3441_p0 = scmp.lt.s32.totalorder %s104_s29, %s104_s29 }
  0x41   :  { %p3437_p13 = scmp.ne.s32.totalorder %s104_s29, %s3436_s5  ;;  %p3442_p1 = scmp.lt.s32.totalorder %s3436_s5, %s3436_s5 }
  0x43   :  { %p3443_p2 = por %p3442_p1, %p3441_p0 }
  0x45   :  { %p3444_p3 = pnand %p3443_p2, %p3437_p13 }
  0x47   :  { %3447 = shalt.err (!%p3444_p3)
}
  0x48   :  { %109 = dma.hbm_to_vmem [thread:$0]  %s3833_s7, 1024, %s104_s29, [#allocation15], %s3599_s3, %s3599_s3, %s3600_s24  }
  0x49   :  { %s3448_s21 = scalar_lea.hbm %s3826_s0, 1792 }
  0x4a   :  { %p3449_p4 = scmp.ne.s32.totalorder %s3826_s0, %s3448_s21  ;;  %p3452_p5 = scmp.lt.u32.totalorder %s3448_s21, %s3826_s0 }
  0x4c   :  { %p3454_p6 = pnand %p3452_p5, %p3449_p4 }
  0x4e   :  { %3457 = shalt.err (!%p3454_p6)
}
  0x4f   :  { %s3458_s27 = scalar_lea.vmem %s26_s11, 1792  ;;  %p3463_p8 = scmp.lt.s32.totalorder %s26_s11, %s26_s11 }
  0x50   :  { %p3459_p7 = scmp.ne.s32.totalorder %s26_s11, %s3458_s27  ;;  %p3464_p9 = scmp.lt.s32.totalorder %s3458_s27, %s3458_s27 }
  0x52   :  { %p3465_p10 = por %p3464_p9, %p3463_p8 }
  0x54   :  { %p3466_p11 = pnand %p3465_p10, %p3459_p7 }
  0x56   :  { %3469 = shalt.err (!%p3466_p11)
}
  0x57   :  { %s3603_s7 = smov 896   ;;  %s3604_s28 = smov 56  }
  0x58   :  { %31 = dma.hbm_to_vmem [thread:$0]  %s3826_s0, 1792, %s26_s11, [#allocation3], %s3603_s7, %s3603_s7, %s3604_s28  }
  0x59   :  { %s3605_s12 = smov [#allocation7]   ;;  %s3606_s10 = smov [#allocation10]  }
  0x5a   :  { %s50_s1 = sshll.u32 %s3605_s12, 4  ;;  %s72_s13 = sshll.u32 %s3606_s10, 4  ;;  %s51_s1 = int_to_ptr.vmem [resolvable:$true] %s50_s1  ;;  %s73_s13 = int_to_ptr.vmem [resolvable:$true] %s72_s13 }
  0x5b   :  { %s3470_s17 = scalar_lea.hbm %s3828_s2, 64 }
  0x5c   :  { %p3471_p12 = scmp.ne.s32.totalorder %s3828_s2, %s3470_s17  ;;  %p3474_p13 = scmp.lt.u32.totalorder %s3470_s17, %s3828_s2 }
  0x5e   :  { %p3476_p0 = pnand %p3474_p13, %p3471_p12 }
  0x60   :  { %3479 = shalt.err (!%p3476_p0)
}
  0x61   :  { %s3480_s0 = scalar_lea.vmem %s51_s1, 64  ;;  %p3485_p2 = scmp.lt.s32.totalorder %s51_s1, %s51_s1 }
  0x62   :  { %p3481_p1 = scmp.ne.s32.totalorder %s51_s1, %s3480_s0  ;;  %p3486_p3 = scmp.lt.s32.totalorder %s3480_s0, %s3480_s0 }
  0x64   :  { %p3487_p4 = por %p3486_p3, %p3485_p2 }
  0x66   :  { %p3488_p5 = pnand %p3487_p4, %p3481_p1 }
  0x68   :  { %3491 = shalt.err (!%p3488_p5)
}
  0x69   :  { %53 = dma.hbm_to_vmem [thread:$0]  %s3828_s2, 64, %s51_s1, [#allocation6]  }
  0x6a   :  { %s3492_s23 = scalar_lea.hbm %s3830_s4, 32 }
  0x6b   :  { %p3493_p6 = scmp.ne.s32.totalorder %s3830_s4, %s3492_s23  ;;  %p3496_p7 = scmp.lt.u32.totalorder %s3492_s23, %s3830_s4 }
  0x6d   :  { %p3498_p8 = pnand %p3496_p7, %p3493_p6 }
  0x6f   :  { %3501 = shalt.err (!%p3498_p8)
}
  0x70   :  { %s3502_s28 = scalar_lea.vmem %s73_s13, 32  ;;  %p3507_p10 = scmp.lt.s32.totalorder %s73_s13, %s73_s13 }
  0x71   :  { %p3503_p9 = scmp.ne.s32.totalorder %s73_s13, %s3502_s28  ;;  %p3508_p11 = scmp.lt.s32.totalorder %s3502_s28, %s3502_s28 }
  0x73   :  { %p3509_p12 = por %p3508_p11, %p3507_p10 }
  0x75   :  { %p3510_p13 = pnand %p3509_p12, %p3503_p9 }
  0x77   :  { %3513 = shalt.err (!%p3510_p13)
}
  0x78   :  { %75 = dma.hbm_to_vmem [thread:$0]  %s3830_s4, 32, %s73_s13, [#allocation9]  }
  0x79   :  { %s3607_s30 = smov [#allocation13]   ;;  %s3608_s1 = smov [#allocation16]  }
  0x7a   :  { %s94_s12 = sshll.u32 %s3607_s30, 4  ;;  %s116_s10 = sshll.u32 %s3608_s1, 4  ;;  %s95_s12 = int_to_ptr.vmem [resolvable:$true] %s94_s12  ;;  %s117_s10 = int_to_ptr.vmem [resolvable:$true] %s116_s10 }
  0x7b   :  { %s3514_s17 = scalar_lea.hbm %s3832_s6, 16 }
  0x7c   :  { %p3515_p0 = scmp.ne.s32.totalorder %s3832_s6, %s3514_s17  ;;  %p3518_p1 = scmp.lt.u32.totalorder %s3514_s17, %s3832_s6 }
  0x7e   :  { %p3520_p2 = pnand %p3518_p1, %p3515_p0 }
  0x80   :  { %3523 = shalt.err (!%p3520_p2)
}
  0x81   :  { %s3524_s4 = scalar_lea.vmem %s95_s12, 16  ;;  %s3528_s13 = scalar_lea.vmem %s95_s12, 32 }
  0x82   :  { %p3525_p3 = scmp.ne.s32.totalorder %s95_s12, %s3524_s4  ;;  %p3529_p4 = scmp.lt.s32.totalorder %s95_s12, %s95_s12 }
  0x83   :  { %p3530_p5 = scmp.lt.s32.totalorder %s3528_s13, %s3524_s4 }
  0x85   :  { %p3531_p6 = por %p3530_p5, %p3529_p4 }
  0x87   :  { %p3532_p7 = pnand %p3531_p6, %p3525_p3 }
  0x89   :  { %3535 = shalt.err (!%p3532_p7)
}
  0x8a   :  { %97 = dma.hbm_to_vmem [thread:$0]  %s3832_s6, 16, %s95_s12, [#allocation12]  }
  0x8b   :  { %s3536_s22 = scalar_lea.hbm %s3834_s8, 16 }
  0x8c   :  { %p3537_p8 = scmp.ne.s32.totalorder %s3834_s8, %s3536_s22  ;;  %p3540_p9 = scmp.lt.u32.totalorder %s3536_s22, %s3834_s8 }
  0x8e   :  { %p3542_p10 = pnand %p3540_p9, %p3537_p8 }
  0x90   :  { %3545 = shalt.err (!%p3542_p10)
}
  0x91   :  { %s3546_s7 = scalar_lea.vmem %s117_s10, 16  ;;  %s3550_s28 = scalar_lea.vmem %s117_s10, 32 }
  0x92   :  { %p3547_p11 = scmp.ne.s32.totalorder %s117_s10, %s3546_s7  ;;  %p3551_p12 = scmp.lt.s32.totalorder %s117_s10, %s117_s10 }
  0x93   :  { %p3552_p13 = scmp.lt.s32.totalorder %s3550_s28, %s3546_s7 }
  0x95   :  { %p3553_p0 = por %p3552_p13, %p3551_p12 }
  0x97   :  { %p3554_p1 = pnand %p3553_p0, %p3547_p11 }
  0x99   :  { %3557 = shalt.err (!%p3554_p1)
}
  0x9a   :  { %119 = dma.hbm_to_vmem [thread:$0]  %s3834_s8, 16, %s117_s10, [#allocation15]  }
  0x9b   :  { %3580 = dma.done.wait [#allocation3], 1792  }
  0x9c   :  { %3581 = vsyncadd [#allocation3], 4294965504 }
  0x9d   :  { %3582 = dma.done.wait [#allocation6], 25152  }
  0x9e   :  { %3583 = vsyncadd [#allocation6], 4294942144 }
  0x9f   :  { %3584 = dma.done.wait [#allocation9], 8224  }
  0xa0   :  { %3585 = vsyncadd [#allocation9], 4294959072 }
  0xa1   :  { %3586 = dma.done.wait [#allocation12], 2064  }
  0xa2   :  { %3587 = vsyncadd [#allocation12], 4294965232 }
  0xa3   :  { %3588 = dma.done.wait [#allocation15], 1040  }
  0xa4   :  { %3589 = vsyncadd [#allocation15], 4294966256  ;;  %v3609_v0 = vmov 0   ;;  %v2946_v1 = vld [vmem:[#allocation5 + $0x4] ss:$16 sps:$4 sm:$0xff]   ;;  %v161_v10 = vld [vmem:[#allocation2 + $0x68] sm:$0xff] }
  0xa5   :  { %1532 = vmatprep.mubr.bf16.mxu1 %v3609_v0  ;;  %v2948_v2 = vld [vmem:[#allocation5 + $0x604] ss:$16 sps:$4 sm:$0xff]   ;;  %1371 = vmatprep.subr.bf16.mxu0 %v2946_v1  ;;  %v2950_v3 = vld [vmem:[#allocation5] ss:$16 sps:$4 sm:$0xff]   ;;  %v2954_v6 = vld [vmem:[#allocation5 + $0x8] ss:$16 sps:$4 sm:$0xff]  }
  0xa6   :  { %v2951_v4 = vld [vmem:[#allocation5 + $0x600] ss:$16 sps:$4 sm:$0xff]   ;;  %1500 = vmatprep.subr.bf16.mxu1 %v2948_v2  ;;  %v2952_v5 = vld [vmem:[#allocation5 + $0x24] ss:$16 sps:$4 sm:$0xff]   ;;  %1372 = vmatpush1.bf16.msra.mxu0 %v2950_v3  ;;  %v2956_v7 = vld [vmem:[#allocation5 + $0xc] ss:$16 sps:$4 sm:$0xff]  }
  0xa7   :  { %1501 = vmatpush1.bf16.msra.mxu1 %v2951_v4  ;;  %1373 = vmatprep.subr.bf16.mxu0 %v2952_v5  ;;  %v2957_v8 = vld [vmem:[#allocation5 + $0x20] ss:$16 sps:$4 sm:$0xff]   ;;  %vm1367_vm0 = vcmask 130048   ;;  %v2958_v12 = vld [vmem:[#allocation5 + $0x44] ss:$16 sps:$4 sm:$0xff]   ;;  %v149_v51 = vld [vmem:[#allocation2 + $0x8] sm:$0xff] }
  0xa8   :  { %v154_v9 = vld [vmem:[#allocation2 + $0x30] sm:$0xff]  ;;  %1543 = vmatprep.subr.bf16.mxu1 %v2956_v7  ;;  %v2960_v13 = vld [vmem:[#allocation5 + $0x28] ss:$16 sps:$4 sm:$0xff]   ;;  %v2962_v14 = vld [vmem:[#allocation5 + $0x2c] ss:$16 sps:$4 sm:$0xff]   ;;  %vm3611_vm1 = vmmov 0  }
  0xa9   :  { %v3778_v11 = vpack.c.bf16 %v161_v10, %v154_v9  ;;  %v2963_v15 = vld [vmem:[#allocation5 + $0x40] ss:$16 sps:$4 sm:$0xff]   ;;  %v2964_v16 = vld [vmem:[#allocation5 + $0x64] ss:$16 sps:$4 sm:$0xff]   ;;  %v2968_v17 = vld [vmem:[#allocation5 + $0x4c] ss:$16 sps:$4 sm:$0xff]  }
  0xaa   :  { %1374 = vmatpush1.bf16.msra.mxu0 %v2957_v8  ;;  %v2969_v18 = vld [vmem:[#allocation5 + $0x60] ss:$16 sps:$4 sm:$0xff]   ;;  %v2966_v19 = vld [vmem:[#allocation5 + $0x48] ss:$16 sps:$4 sm:$0xff]   ;;  %v2970_v20 = vld [vmem:[#allocation5 + $0x84] ss:$16 sps:$4 sm:$0xff]  }
  0xab   :  { %2733 = vmatmul.mubr.msk.bf16.vlgmr.msra.gmra.mrb[0].mxu1 %vm1367_vm0, %v3778_v11  ;;  %1375 = vmatprep.subr.bf16.mxu0 %v2958_v12  ;;  %v2974_v21 = vld [vmem:[#allocation5 + $0x6c] ss:$16 sps:$4 sm:$0xff]   ;;  %v2972_v22 = vld [vmem:[#allocation5 + $0x68] ss:$16 sps:$4 sm:$0xff]   ;;  %v2975_v23 = vld [vmem:[#allocation5 + $0x80] ss:$16 sps:$4 sm:$0xff]  }
  0xac   :  { %1544 = vmatpush1.bf16.msra.mxu1 %v2954_v6  ;;  %v2976_v24 = vld [vmem:[#allocation5 + $0xa4] ss:$16 sps:$4 sm:$0xff]   ;;  %v2980_v25 = vld [vmem:[#allocation5 + $0x8c] ss:$16 sps:$4 sm:$0xff]   ;;  %v2981_v26 = vld [vmem:[#allocation5 + $0xa0] ss:$16 sps:$4 sm:$0xff]  }
  0xad   :  { %1545 = vmatprep.subr.bf16.mxu1 %v2962_v14  ;;  %v2978_v27 = vld [vmem:[#allocation5 + $0x88] ss:$16 sps:$4 sm:$0xff]   ;;  %v2982_v28 = vld [vmem:[#allocation5 + $0xc4] ss:$16 sps:$4 sm:$0xff]   ;;  %v2986_v29 = vld [vmem:[#allocation5 + $0xac] ss:$16 sps:$4 sm:$0xff]  }
  0xae   :  { %1376 = vmatpush1.bf16.msra.mxu0 %v2963_v15  ;;  %v2984_v30 = vld [vmem:[#allocation5 + $0xa8] ss:$16 sps:$4 sm:$0xff]   ;;  %v2987_v31 = vld [vmem:[#allocation5 + $0xc0] ss:$16 sps:$4 sm:$0xff]   ;;  %v2988_v32 = vld [vmem:[#allocation5 + $0xe4] ss:$16 sps:$4 sm:$0xff]  }
  0xaf   :  { %1377 = vmatprep.subr.bf16.mxu0 %v2964_v16  ;;  %v2992_v33 = vld [vmem:[#allocation5 + $0xcc] ss:$16 sps:$4 sm:$0xff]   ;;  %v2993_v34 = vld [vmem:[#allocation5 + $0xe0] ss:$16 sps:$4 sm:$0xff]   ;;  %v2990_v35 = vld [vmem:[#allocation5 + $0xc8] ss:$16 sps:$4 sm:$0xff]  }
  0xb0   :  { %1546 = vmatpush1.bf16.msra.mxu1 %v2960_v13  ;;  %v2994_v36 = vld [vmem:[#allocation5 + $0x104] ss:$16 sps:$4 sm:$0xff]   ;;  %v2998_v37 = vld [vmem:[#allocation5 + $0xec] ss:$16 sps:$4 sm:$0xff]   ;;  %v2996_v38 = vld [vmem:[#allocation5 + $0xe8] ss:$16 sps:$4 sm:$0xff]  }
  0xb1   :  { %1547 = vmatprep.subr.bf16.mxu1 %v2968_v17  ;;  %v2999_v39 = vld [vmem:[#allocation5 + $0x100] ss:$16 sps:$4 sm:$0xff]   ;;  %v3000_v40 = vld [vmem:[#allocation5 + $0x124] ss:$16 sps:$4 sm:$0xff]   ;;  %v3004_v41 = vld [vmem:[#allocation5 + $0x10c] ss:$16 sps:$4 sm:$0xff]  }
  0xb2   :  { %1378 = vmatpush1.bf16.msra.mxu0 %v2969_v18  ;;  %v3005_v42 = vld [vmem:[#allocation5 + $0x120] ss:$16 sps:$4 sm:$0xff]   ;;  %v3002_v43 = vld [vmem:[#allocation5 + $0x108] ss:$16 sps:$4 sm:$0xff]   ;;  %v3006_v44 = vld [vmem:[#allocation5 + $0x144] ss:$16 sps:$4 sm:$0xff]  }
  0xb3   :  { %1379 = vmatprep.subr.bf16.mxu0 %v2970_v20  ;;  %v3010_v45 = vld [vmem:[#allocation5 + $0x12c] ss:$16 sps:$4 sm:$0xff]   ;;  %v3008_v46 = vld [vmem:[#allocation5 + $0x128] ss:$16 sps:$4 sm:$0xff]   ;;  %v3011_v47 = vld [vmem:[#allocation5 + $0x140] ss:$16 sps:$4 sm:$0xff]  }
  0xb4   :  { %1548 = vmatpush1.bf16.msra.mxu1 %v2966_v19  ;;  %v3012_v48 = vld [vmem:[#allocation5 + $0x164] ss:$16 sps:$4 sm:$0xff]   ;;  %v3016_v49 = vld [vmem:[#allocation5 + $0x14c] ss:$16 sps:$4 sm:$0xff]   ;;  %v3014_v50 = vld [vmem:[#allocation5 + $0x148] ss:$16 sps:$4 sm:$0xff]  }
  0xb5   :  { %1549 = vmatprep.subr.bf16.mxu1 %v2974_v21  ;;  %v156_v52 = vld [vmem:[#allocation2 + $0x40] sm:$0xff]  ;;  %v3022_v56 = vld [vmem:[#allocation5 + $0x16c] ss:$16 sps:$4 sm:$0xff]   ;;  %v3020_v58 = vld [vmem:[#allocation5 + $0x168] ss:$16 sps:$4 sm:$0xff]   ;;  %s3612_s8 = smov [#allocation17]  }
  0xb6   :  { %1380 = vmatpush1.bf16.msra.mxu0 %v2975_v23  ;;  %v3017_v53 = vld [vmem:[#allocation5 + $0x160] ss:$16 sps:$4 sm:$0xff]   ;;  %v163_v54 = vpack.c.bf16 %v156_v52, %v149_v51  ;;  %v3018_v55 = vld [vmem:[#allocation5 + $0x184] ss:$16 sps:$4 sm:$0xff]   ;;  %v3028_v60 = vld [vmem:[#allocation5 + $0x18c] ss:$16 sps:$4 sm:$0xff]  }
  0xb7   :  { %1381 = vmatprep.subr.bf16.mxu0 %v2976_v24  ;;  %v3023_v57 = vld [vmem:[#allocation5 + $0x180] ss:$16 sps:$4 sm:$0xff]   ;;  %v3024_v59 = vld [vmem:[#allocation5 + $0x1a4] ss:$16 sps:$4 sm:$0xff]   ;;  %v3026_v62 = vld [vmem:[#allocation5 + $0x188] ss:$16 sps:$4 sm:$0xff]  }
  0xb8   :  { %1550 = vmatpush1.bf16.msra.mxu1 %v2972_v22  ;;  %1403 = vmatprep.mubr.bf16.mxu0 %v163_v54  ;;  %v3029_v61 = vld [vmem:[#allocation5 + $0x1a0] ss:$16 sps:$4 sm:$0xff]   ;;  %v3030_v63 = vld [vmem:[#allocation5 + $0x1c4] ss:$16 sps:$4 sm:$0xff]   ;;  %v3034_v1 = vld [vmem:[#allocation5 + $0x1ac] ss:$16 sps:$4 sm:$0xff]  }
  0xb9   :  { %1551 = vmatprep.subr.bf16.mxu1 %v2980_v25  ;;  %1575 = vmatprep.mubr.bf16.mxu1 %v163_v54  ;;  %v3035_v2 = vld [vmem:[#allocation5 + $0x1c0] ss:$16 sps:$4 sm:$0xff]   ;;  %v3032_v3 = vld [vmem:[#allocation5 + $0x1a8] ss:$16 sps:$4 sm:$0xff]   ;;  %v3036_v4 = vld [vmem:[#allocation5 + $0x1e4] ss:$16 sps:$4 sm:$0xff]  }
  0xba   :  { %1382 = vmatpush1.bf16.msra.mxu0 %v2981_v26  ;;  %v3040_v5 = vld [vmem:[#allocation5 + $0x1cc] ss:$16 sps:$4 sm:$0xff]   ;;  %v3041_v6 = vld [vmem:[#allocation5 + $0x1e0] ss:$16 sps:$4 sm:$0xff]   ;;  %v3038_v9 = vld [vmem:[#allocation5 + $0x1c8] ss:$16 sps:$4 sm:$0xff]  }
  0xbb   :  { %1383 = vmatprep.subr.bf16.mxu0 %v2982_v28  ;;  %v148_v7 = vld [vmem:[#allocation2] sm:$0xff]  ;;  %v155_v8 = vld [vmem:[#allocation2 + $0x38] sm:$0xff]  ;;  %s2521_s29 = sshll.u32 %s3612_s8, 4  ;;  %s2522_s29 = int_to_ptr.vmem [resolvable:$true] %s2521_s29 }
  0xbc   :  { %1552 = vmatpush1.bf16.msra.mxu1 %v2978_v27  ;;  %v3044_v10 = vld [vmem:[#allocation5 + $0x204] ss:$16 sps:$4 sm:$0xff]   ;;  %v3047_v12 = vld [vmem:[#allocation5 + $0x1ec] ss:$16 sps:$4 sm:$0xff]   ;;  %v162_v13 = vpack.c.bf16 %v155_v8, %v148_v7  ;;  %v3042_v14 = vld [vmem:[#allocation5 + $0x200] ss:$16 sps:$4 sm:$0xff]   ;;  %p3563_p3 = scmp.lt.s32.totalorder %s2522_s29, %s2522_s29 }
  0xbd   :  { %1553 = vmatprep.subr.bf16.mxu1 %v2986_v29  ;;  %v3045_v15 = vld [vmem:[#allocation5 + $0x1e8] ss:$16 sps:$4 sm:$0xff]   ;;  %v3050_v16 = vld [vmem:[#allocation5 + $0x224] ss:$16 sps:$4 sm:$0xff]   ;;  %v3053_v17 = vld [vmem:[#allocation5 + $0x20c] ss:$16 sps:$4 sm:$0xff]  }
  0xbe   :  { %1384 = vmatpush1.bf16.msra.mxu0 %v2987_v31  ;;  %v3048_v18 = vld [vmem:[#allocation5 + $0x220] ss:$16 sps:$4 sm:$0xff]   ;;  %v3051_v19 = vld [vmem:[#allocation5 + $0x208] ss:$16 sps:$4 sm:$0xff]   ;;  %v3056_v20 = vld [vmem:[#allocation5 + $0x244] ss:$16 sps:$4 sm:$0xff]  }
  0xbf   :  { %1385 = vmatprep.subr.bf16.mxu0 %v2988_v32  ;;  %v3059_v21 = vld [vmem:[#allocation5 + $0x22c] ss:$16 sps:$4 sm:$0xff]   ;;  %v3054_v22 = vld [vmem:[#allocation5 + $0x240] ss:$16 sps:$4 sm:$0xff]   ;;  %v3057_v23 = vld [vmem:[#allocation5 + $0x228] ss:$16 sps:$4 sm:$0xff]  }
  0xc0   :  { %1554 = vmatpush1.bf16.msra.mxu1 %v2984_v30  ;;  %v3062_v24 = vld [vmem:[#allocation5 + $0x264] ss:$16 sps:$4 sm:$0xff]   ;;  %v3065_v25 = vld [vmem:[#allocation5 + $0x24c] ss:$16 sps:$4 sm:$0xff]   ;;  %v3060_v26 = vld [vmem:[#allocation5 + $0x260] ss:$16 sps:$4 sm:$0xff]  }
  0xc1   :  { %1555 = vmatprep.subr.bf16.mxu1 %v2992_v33  ;;  %v3063_v27 = vld [vmem:[#allocation5 + $0x248] ss:$16 sps:$4 sm:$0xff]   ;;  %v3068_v28 = vld [vmem:[#allocation5 + $0x284] ss:$16 sps:$4 sm:$0xff]   ;;  %v3071_v29 = vld [vmem:[#allocation5 + $0x26c] ss:$16 sps:$4 sm:$0xff]  }
  0xc2   :  { %1386 = vmatpush1.bf16.msra.mxu0 %v2993_v34  ;;  %v3066_v30 = vld [vmem:[#allocation5 + $0x280] ss:$16 sps:$4 sm:$0xff]   ;;  %v3069_v31 = vld [vmem:[#allocation5 + $0x268] ss:$16 sps:$4 sm:$0xff]   ;;  %v3074_v32 = vld [vmem:[#allocation5 + $0x2a4] ss:$16 sps:$4 sm:$0xff]  }
  0xc3   :  { %1387 = vmatprep.subr.bf16.mxu0 %v2994_v36  ;;  %v3077_v33 = vld [vmem:[#allocation5 + $0x28c] ss:$16 sps:$4 sm:$0xff]   ;;  %v3072_v34 = vld [vmem:[#allocation5 + $0x2a0] ss:$16 sps:$4 sm:$0xff]   ;;  %v3080_v36 = vld [vmem:[#allocation5 + $0x2c4] ss:$16 sps:$4 sm:$0xff]  }
  0xc4   :  { %1556 = vmatpush1.bf16.msra.mxu1 %v2990_v35  ;;  %v3075_v35 = vld [vmem:[#allocation5 + $0x288] ss:$16 sps:$4 sm:$0xff]   ;;  %v3098_v51 = vld [vmem:[#allocation5 + $0x324] ss:$16 sps:$4 sm:$0xff]   ;;  %v3101_v52 = vld [vmem:[#allocation5 + $0x30c] ss:$16 sps:$4 sm:$0xff]  }
  0xc5   :  { %1557 = vmatprep.subr.bf16.mxu1 %v2998_v37  ;;  %v3083_v37 = vld [vmem:[#allocation5 + $0x2ac] ss:$16 sps:$4 sm:$0xff]   ;;  %v3099_v54 = vld [vmem:[#allocation5 + $0x308] ss:$16 sps:$4 sm:$0xff]   ;;  %v3128_v8 = vld [vmem:[#allocation5 + $0x3c4] ss:$16 sps:$4 sm:$0xff]  }
  0xc6   :  { %1388 = vmatpush1.bf16.msra.mxu0 %v2999_v39  ;;  %v151_v39 = vld [vmem:[#allocation2 + $0x18] sm:$0xff]  ;;  %s3558_s30 = scalar_lea.vmem %s2522_s29, 128 }
  0xc7   :  { %1389 = vmatprep.subr.bf16.mxu0 %v3000_v40  ;;  %v158_v40 = vld [vmem:[#allocation2 + $0x50] sm:$0xff]  ;;  %v3123_v7 = vld [vmem:[#allocation5 + $0x388] ss:$16 sps:$4 sm:$0xff]   ;;  %p3559_p2 = scmp.ne.s32.totalorder %s2522_s29, %s3558_s30  ;;  %p3564_p4 = scmp.lt.s32.totalorder %s3558_s30, %s3558_s30 }
  0xc8   :  { %1558 = vmatpush1.bf16.msra.mxu1 %v2996_v38  ;;  %v3078_v38 = vld [vmem:[#allocation5 + $0x2c0] ss:$16 sps:$4 sm:$0xff]  }
  0xc9   :  { %1559 = vmatprep.subr.bf16.mxu1 %v3004_v41  ;;  %v3081_v41 = vld [vmem:[#allocation5 + $0x2a8] ss:$16 sps:$4 sm:$0xff]   ;;  %p3565_p5 = por %p3564_p4, %p3563_p3 }
  0xca   :  { %1390 = vmatpush1.bf16.msra.mxu0 %v3005_v42  ;;  %v165_v42 = vpack.c.bf16 %v158_v40, %v151_v39  ;;  %v3164_v39 = vld [vmem:[#allocation5 + $0x484] ss:$16 sps:$4 sm:$0xff]   ;;  %v3167_v40 = vld [vmem:[#allocation5 + $0x46c] ss:$16 sps:$4 sm:$0xff]  }
  0xcb   :  { %1391 = vmatprep.subr.bf16.mxu0 %v3006_v44  ;;  %v3089_v44 = vld [vmem:[#allocation5 + $0x2cc] ss:$16 sps:$4 sm:$0xff]   ;;  %p3566_p6 = pnand %p3565_p5, %p3559_p2 }
  0xcc   :  { %1560 = vmatpush1.bf16.msra.mxu1 %v3002_v43  ;;  %v3086_v43 = vld [vmem:[#allocation5 + $0x2e4] ss:$16 sps:$4 sm:$0xff]  }
  0xcd   :  { %1561 = vmatprep.subr.bf16.mxu1 %v3010_v45  ;;  %v3084_v45 = vld [vmem:[#allocation5 + $0x2e0] ss:$16 sps:$4 sm:$0xff]  }
  0xce   :  { %1392 = vmatpush1.bf16.msra.mxu0 %v3011_v47  ;;  %v3092_v47 = vld [vmem:[#allocation5 + $0x304] ss:$16 sps:$4 sm:$0xff]  }
  0xcf   :  { %1393 = vmatprep.subr.bf16.mxu0 %v3012_v48  ;;  %v3095_v48 = vld [vmem:[#allocation5 + $0x2ec] ss:$16 sps:$4 sm:$0xff]  }
  0xd0   :  { %1562 = vmatpush1.bf16.msra.mxu1 %v3008_v46  ;;  %v3087_v46 = vld [vmem:[#allocation5 + $0x2c8] ss:$16 sps:$4 sm:$0xff]  }
  0xd1   :  { %1563 = vmatprep.subr.bf16.mxu1 %v3016_v49  ;;  %v3090_v49 = vld [vmem:[#allocation5 + $0x300] ss:$16 sps:$4 sm:$0xff]  }
  0xd2   :  { %1394 = vmatpush1.bf16.msra.mxu0 %v3017_v53  ;;  %v3096_v53 = vld [vmem:[#allocation5 + $0x320] ss:$16 sps:$4 sm:$0xff]  }
  0xd3   :  { %1395 = vmatprep.subr.bf16.mxu0 %v3018_v55  ;;  %v3104_v55 = vld [vmem:[#allocation5 + $0x344] ss:$16 sps:$4 sm:$0xff]  }
  0xd4   :  { %1564 = vmatpush1.bf16.msra.mxu1 %v3014_v50  ;;  %v3093_v50 = vld [vmem:[#allocation5 + $0x2e8] ss:$16 sps:$4 sm:$0xff]  }
  0xd5   :  { %1565 = vmatprep.subr.bf16.mxu1 %v3022_v56  ;;  %v3107_v56 = vld [vmem:[#allocation5 + $0x32c] ss:$16 sps:$4 sm:$0xff]  }
  0xd6   :  { %1396 = vmatpush1.bf16.msra.mxu0 %v3023_v57  ;;  %v3102_v57 = vld [vmem:[#allocation5 + $0x340] ss:$16 sps:$4 sm:$0xff]  }
  0xd7   :  { %1397 = vmatprep.subr.bf16.mxu0 %v3024_v59  ;;  %v3110_v59 = vld [vmem:[#allocation5 + $0x364] ss:$16 sps:$4 sm:$0xff]  }
  0xd8   :  { %1566 = vmatpush1.bf16.msra.mxu1 %v3020_v58  ;;  %v3105_v58 = vld [vmem:[#allocation5 + $0x328] ss:$16 sps:$4 sm:$0xff]  }
  0xd9   :  { %1567 = vmatprep.subr.bf16.mxu1 %v3028_v60  ;;  %v3113_v60 = vld [vmem:[#allocation5 + $0x34c] ss:$16 sps:$4 sm:$0xff]  }
  0xda   :  { %1398 = vmatpush1.bf16.msra.mxu0 %v3029_v61  ;;  %v3108_v61 = vld [vmem:[#allocation5 + $0x360] ss:$16 sps:$4 sm:$0xff]  }
  0xdb   :  { %1399 = vmatprep.subr.bf16.mxu0 %v3030_v63  ;;  %v3116_v63 = vld [vmem:[#allocation5 + $0x384] ss:$16 sps:$4 sm:$0xff]  }
  0xdc   :  { %1568 = vmatpush1.bf16.msra.mxu1 %v3026_v62  ;;  %v3111_v62 = vld [vmem:[#allocation5 + $0x348] ss:$16 sps:$4 sm:$0xff]  }
  0xdd   :  { %1569 = vmatprep.subr.bf16.mxu1 %v3034_v1  ;;  %v3119_v1 = vld [vmem:[#allocation5 + $0x36c] ss:$16 sps:$4 sm:$0xff]  }
  0xde   :  { %1400 = vmatpush1.bf16.msra.mxu0 %v3035_v2  ;;  %v3114_v2 = vld [vmem:[#allocation5 + $0x380] ss:$16 sps:$4 sm:$0xff]  }
  0xdf   :  { %1401 = vmatprep.subr.bf16.mxu0 %v3036_v4  ;;  %v3122_v4 = vld [vmem:[#allocation5 + $0x3a4] ss:$16 sps:$4 sm:$0xff]  }
  0xe0   :  { %1570 = vmatpush1.bf16.msra.mxu1 %v3032_v3  ;;  %v3117_v3 = vld [vmem:[#allocation5 + $0x368] ss:$16 sps:$4 sm:$0xff]  }
  0xe1   :  { %1571 = vmatprep.subr.bf16.mxu1 %v3040_v5  ;;  %v3125_v5 = vld [vmem:[#allocation5 + $0x38c] ss:$16 sps:$4 sm:$0xff]  }
  0xe2   :  { %1402 = vmatpush1.bf16.msra.mxu0 %v3041_v6  ;;  %v3120_v6 = vld [vmem:[#allocation5 + $0x3a0] ss:$16 sps:$4 sm:$0xff]  }
  0xe3   :  { %1414 = vmatprep.subr.bf16.mxu0 %v3044_v10  ;;  %v3126_v10 = vld [vmem:[#allocation5 + $0x3c0] ss:$16 sps:$4 sm:$0xff]  }
  0xe4   :  { %1572 = vmatpush1.bf16.msra.mxu1 %v3038_v9  ;;  %v3131_v9 = vld [vmem:[#allocation5 + $0x3ac] ss:$16 sps:$4 sm:$0xff]  }
  0xe5   :  { %1573 = vmatprep.subr.bf16.mxu1 %v3047_v12  ;;  %1404 = vmatmul.mubr.bf16.vlgmr.msra.gmra.mrb[0].mxu0 %v162_v13  ;;  %v3129_v12 = vld [vmem:[#allocation5 + $0x3a8] ss:$16 sps:$4 sm:$0xff]  }
  0xe6   :  { %1415 = vmatpush1.bf16.msra.mxu0 %v3042_v14  ;;  %1446 = vmatprep.mubr.bf16.mxu0 %v165_v42  ;;  %v3137_v14 = vld [vmem:[#allocation5 + $0x3cc] ss:$16 sps:$4 sm:$0xff]  }
  0xe7   :  { %1416 = vmatprep.subr.bf16.mxu0 %v3050_v16  ;;  %v150_v16 = vld [vmem:[#allocation2 + $0x10] sm:$0xff] }
  0xe8   :  { %1574 = vmatpush1.bf16.msra.mxu1 %v3045_v15  ;;  %v3132_v15 = vld [vmem:[#allocation5 + $0x3e0] ss:$16 sps:$4 sm:$0xff]  }
  0xe9   :  { %1586 = vmatprep.subr.bf16.mxu1 %v3053_v17  ;;  %v157_v17 = vld [vmem:[#allocation2 + $0x48] sm:$0xff] }
  0xea   :  { %1417 = vmatpush1.bf16.msra.mxu0 %v3048_v18  ;;  %v3135_v18 = vld [vmem:[#allocation5 + $0x3c8] ss:$16 sps:$4 sm:$0xff]  }
  0xeb   :  { %1576 = vmatmul.mubr.bf16.vlgmr.msra.gmra.mrb[4].mxu1 %v162_v13  ;;  %1418 = vmatprep.subr.bf16.mxu0 %v3056_v20  ;;  %v3134_v13 = vld [vmem:[#allocation5 + $0x3e4] ss:$16 sps:$4 sm:$0xff]   ;;  %v3143_v20 = vld [vmem:[#allocation5 + $0x3ec] ss:$16 sps:$4 sm:$0xff]  }
  0xec   :  { %1587 = vmatpush1.bf16.msra.mxu1 %v3051_v19  ;;  %1618 = vmatprep.mubr.bf16.mxu1 %v165_v42  ;;  %v3140_v19 = vld [vmem:[#allocation5 + $0x404] ss:$16 sps:$4 sm:$0xff]   ;;  %v3165_v42 = vld [vmem:[#allocation5 + $0x468] ss:$16 sps:$4 sm:$0xff]  }
  0xed   :  { %1588 = vmatprep.subr.bf16.mxu1 %v3059_v21  ;;  %v164_v21 = vpack.c.bf16 %v157_v17, %v150_v16  ;;  %v3219_v16 = vld [vmem:[#allocation5 + $0x588] ss:$16 sps:$4 sm:$0xff]   ;;  %v3224_v17 = vld [vmem:[#allocation5 + $0x5c4] ss:$16 sps:$4 sm:$0xff]  }
  0xee   :  { %1419 = vmatpush1.bf16.msra.mxu0 %v3054_v22  ;;  %v3138_v22 = vld [vmem:[#allocation5 + $0x400] ss:$16 sps:$4 sm:$0xff]  }
  0xef   :  { %1420 = vmatprep.subr.bf16.mxu0 %v3062_v24  ;;  %v3146_v24 = vld [vmem:[#allocation5 + $0x424] ss:$16 sps:$4 sm:$0xff]  }
  0xf0   :  { %1589 = vmatpush1.bf16.msra.mxu1 %v3057_v23  ;;  %v3141_v23 = vld [vmem:[#allocation5 + $0x3e8] ss:$16 sps:$4 sm:$0xff]  }
  0xf1   :  { %1590 = vmatprep.subr.bf16.mxu1 %v3065_v25  ;;  %v3149_v25 = vld [vmem:[#allocation5 + $0x40c] ss:$16 sps:$4 sm:$0xff]  }
  0xf2   :  { %1421 = vmatpush1.bf16.msra.mxu0 %v3060_v26  ;;  %v153_v26 = vld [vmem:[#allocation2 + $0x28] sm:$0xff] }
  0xf3   :  { %1422 = vmatprep.subr.bf16.mxu0 %v3068_v28  ;;  %v3144_v28 = vld [vmem:[#allocation5 + $0x420] ss:$16 sps:$4 sm:$0xff]  }
  0xf4   :  { %1591 = vmatpush1.bf16.msra.mxu1 %v3063_v27  ;;  %v160_v27 = vld [vmem:[#allocation2 + $0x60] sm:$0xff] }
  0xf5   :  { %1592 = vmatprep.subr.bf16.mxu1 %v3071_v29  ;;  %v167_v29 = vpack.c.bf16 %v160_v27, %v153_v26  ;;  %v3231_v26 = vld [vmem:[#allocation5 + $0x5c8] ss:$16 sps:$4 sm:$0xff]  }
  0xf6   :  { %1423 = vmatpush1.bf16.msra.mxu0 %v3066_v30  ;;  %v3147_v30 = vld [vmem:[#allocation5 + $0x408] ss:$16 sps:$4 sm:$0xff]  }
  0xf7   :  { %1424 = vmatprep.subr.bf16.mxu0 %v3074_v32  ;;  %v3155_v32 = vld [vmem:[#allocation5 + $0x42c] ss:$16 sps:$4 sm:$0xff]   ;;  %v3242_v27 = vld [vmem:[#allocation8 + $0x4] ss:$8 sps:$4 sm:$0xff]  }
  0xf8   :  { %1593 = vmatpush1.bf16.msra.mxu1 %v3069_v31  ;;  %v3152_v31 = vld [vmem:[#allocation5 + $0x444] ss:$16 sps:$4 sm:$0xff]  }
  0xf9   :  { %1594 = vmatprep.subr.bf16.mxu1 %v3077_v33  ;;  %v3150_v33 = vld [vmem:[#allocation5 + $0x440] ss:$16 sps:$4 sm:$0xff]  }
  0xfa   :  { %1425 = vmatpush1.bf16.msra.mxu0 %v3072_v34  ;;  %v3153_v34 = vld [vmem:[#allocation5 + $0x428] ss:$16 sps:$4 sm:$0xff]  }
  0xfb   :  { %1426 = vmatprep.subr.bf16.mxu0 %v3080_v36  ;;  %v3161_v36 = vld [vmem:[#allocation5 + $0x44c] ss:$16 sps:$4 sm:$0xff]  }
  0xfc   :  { %1595 = vmatpush1.bf16.msra.mxu1 %v3075_v35  ;;  %v3158_v35 = vld [vmem:[#allocation5 + $0x464] ss:$16 sps:$4 sm:$0xff]  }
  0xfd   :  { %1596 = vmatprep.subr.bf16.mxu1 %v3083_v37  ;;  %v3156_v37 = vld [vmem:[#allocation5 + $0x460] ss:$16 sps:$4 sm:$0xff]  }
  0xfe   :  { %1427 = vmatpush1.bf16.msra.mxu0 %v3078_v38  ;;  %v3159_v38 = vld [vmem:[#allocation5 + $0x448] ss:$16 sps:$4 sm:$0xff]  }
  0xff   :  { %1428 = vmatprep.subr.bf16.mxu0 %v3086_v43  ;;  %v3170_v43 = vld [vmem:[#allocation5 + $0x4a4] ss:$16 sps:$4 sm:$0xff]  }
 0x100   :  { %1597 = vmatpush1.bf16.msra.mxu1 %v3081_v41  ;;  %v3162_v41 = vld [vmem:[#allocation5 + $0x480] ss:$16 sps:$4 sm:$0xff]  }
 0x101   :  { %1598 = vmatprep.subr.bf16.mxu1 %v3089_v44  ;;  %v3173_v44 = vld [vmem:[#allocation5 + $0x48c] ss:$16 sps:$4 sm:$0xff]  }
 0x102   :  { %1429 = vmatpush1.bf16.msra.mxu0 %v3084_v45  ;;  %v3168_v45 = vld [vmem:[#allocation5 + $0x4a0] ss:$16 sps:$4 sm:$0xff]  }
 0x103   :  { %1430 = vmatprep.subr.bf16.mxu0 %v3092_v47  ;;  %v3176_v47 = vld [vmem:[#allocation5 + $0x4c4] ss:$16 sps:$4 sm:$0xff]  }
 0x104   :  { %1599 = vmatpush1.bf16.msra.mxu1 %v3087_v46  ;;  %v3171_v46 = vld [vmem:[#allocation5 + $0x488] ss:$16 sps:$4 sm:$0xff]  }
 0x105   :  { %1600 = vmatprep.subr.bf16.mxu1 %v3095_v48  ;;  %v3179_v48 = vld [vmem:[#allocation5 + $0x4ac] ss:$16 sps:$4 sm:$0xff]  }
 0x106   :  { %1431 = vmatpush1.bf16.msra.mxu0 %v3090_v49  ;;  %v3174_v49 = vld [vmem:[#allocation5 + $0x4c0] ss:$16 sps:$4 sm:$0xff]  }
 0x107   :  { %1432 = vmatprep.subr.bf16.mxu0 %v3098_v51  ;;  %v3182_v51 = vld [vmem:[#allocation5 + $0x4e4] ss:$16 sps:$4 sm:$0xff]  }
 0x108   :  { %1601 = vmatpush1.bf16.msra.mxu1 %v3093_v50  ;;  %v3177_v50 = vld [vmem:[#allocation5 + $0x4a8] ss:$16 sps:$4 sm:$0xff]  }
 0x109   :  { %1602 = vmatprep.subr.bf16.mxu1 %v3101_v52  ;;  %v3185_v52 = vld [vmem:[#allocation5 + $0x4cc] ss:$16 sps:$4 sm:$0xff]  }
 0x10a   :  { %1433 = vmatpush1.bf16.msra.mxu0 %v3096_v53  ;;  %v3180_v53 = vld [vmem:[#allocation5 + $0x4e0] ss:$16 sps:$4 sm:$0xff]  }
 0x10b   :  { %1434 = vmatprep.subr.bf16.mxu0 %v3104_v55  ;;  %v3188_v55 = vld [vmem:[#allocation5 + $0x504] ss:$16 sps:$4 sm:$0xff]  }
 0x10c   :  { %1603 = vmatpush1.bf16.msra.mxu1 %v3099_v54  ;;  %v3183_v54 = vld [vmem:[#allocation5 + $0x4c8] ss:$16 sps:$4 sm:$0xff]  }
 0x10d   :  { %1604 = vmatprep.subr.bf16.mxu1 %v3107_v56  ;;  %v3191_v56 = vld [vmem:[#allocation5 + $0x4ec] ss:$16 sps:$4 sm:$0xff]  }
 0x10e   :  { %1435 = vmatpush1.bf16.msra.mxu0 %v3102_v57  ;;  %v3186_v57 = vld [vmem:[#allocation5 + $0x500] ss:$16 sps:$4 sm:$0xff]  }
 0x10f   :  { %1436 = vmatprep.subr.bf16.mxu0 %v3110_v59  ;;  %v3194_v59 = vld [vmem:[#allocation5 + $0x524] ss:$16 sps:$4 sm:$0xff]  }
 0x110   :  { %1605 = vmatpush1.bf16.msra.mxu1 %v3105_v58  ;;  %v3189_v58 = vld [vmem:[#allocation5 + $0x4e8] ss:$16 sps:$4 sm:$0xff]  }
 0x111   :  { %1606 = vmatprep.subr.bf16.mxu1 %v3113_v60  ;;  %v3197_v60 = vld [vmem:[#allocation5 + $0x50c] ss:$16 sps:$4 sm:$0xff]  }
 0x112   :  { %1437 = vmatpush1.bf16.msra.mxu0 %v3108_v61  ;;  %v3192_v61 = vld [vmem:[#allocation5 + $0x520] ss:$16 sps:$4 sm:$0xff]  }
 0x113   :  { %1438 = vmatprep.subr.bf16.mxu0 %v3116_v63  ;;  %v3200_v63 = vld [vmem:[#allocation5 + $0x544] ss:$16 sps:$4 sm:$0xff]  }
 0x114   :  { %1607 = vmatpush1.bf16.msra.mxu1 %v3111_v62  ;;  %v3195_v62 = vld [vmem:[#allocation5 + $0x508] ss:$16 sps:$4 sm:$0xff]  }
 0x115   :  { %1608 = vmatprep.subr.bf16.mxu1 %v3119_v1  ;;  %v3203_v1 = vld [vmem:[#allocation5 + $0x52c] ss:$16 sps:$4 sm:$0xff]  }
 0x116   :  { %1439 = vmatpush1.bf16.msra.mxu0 %v3114_v2  ;;  %v3198_v2 = vld [vmem:[#allocation5 + $0x540] ss:$16 sps:$4 sm:$0xff]  }
 0x117   :  { %1440 = vmatprep.subr.bf16.mxu0 %v3122_v4  ;;  %v3206_v4 = vld [vmem:[#allocation5 + $0x564] ss:$16 sps:$4 sm:$0xff]  }
 0x118   :  { %1609 = vmatpush1.bf16.msra.mxu1 %v3117_v3  ;;  %v3201_v3 = vld [vmem:[#allocation5 + $0x528] ss:$16 sps:$4 sm:$0xff]  }
 0x119   :  { %1610 = vmatprep.subr.bf16.mxu1 %v3125_v5  ;;  %v3209_v5 = vld [vmem:[#allocation5 + $0x54c] ss:$16 sps:$4 sm:$0xff]  }
 0x11a   :  { %1441 = vmatpush1.bf16.msra.mxu0 %v3120_v6  ;;  %v3204_v6 = vld [vmem:[#allocation5 + $0x560] ss:$16 sps:$4 sm:$0xff]  }
 0x11b   :  { %1442 = vmatprep.subr.bf16.mxu0 %v3128_v8  ;;  %v3212_v8 = vld [vmem:[#allocation5 + $0x584] ss:$16 sps:$4 sm:$0xff]  }
 0x11c   :  { %1611 = vmatpush1.bf16.msra.mxu1 %v3123_v7  ;;  %v3207_v7 = vld [vmem:[#allocation5 + $0x548] ss:$16 sps:$4 sm:$0xff]  }
 0x11d   :  { %1612 = vmatprep.subr.bf16.mxu1 %v3131_v9  ;;  %v3215_v9 = vld [vmem:[#allocation5 + $0x56c] ss:$16 sps:$4 sm:$0xff]  }
 0x11e   :  { %1443 = vmatpush1.bf16.msra.mxu0 %v3126_v10  ;;  %v3210_v10 = vld [vmem:[#allocation5 + $0x580] ss:$16 sps:$4 sm:$0xff]  }
 0x11f   :  { %1444 = vmatprep.subr.bf16.mxu0 %v3134_v13  ;;  %v3218_v13 = vld [vmem:[#allocation5 + $0x5a4] ss:$16 sps:$4 sm:$0xff]  }
 0x120   :  { %1613 = vmatpush1.bf16.msra.mxu1 %v3129_v12  ;;  %v3213_v12 = vld [vmem:[#allocation5 + $0x568] ss:$16 sps:$4 sm:$0xff]  }
 0x121   :  { %1614 = vmatprep.subr.bf16.mxu1 %v3137_v14  ;;  %v3221_v14 = vld [vmem:[#allocation5 + $0x58c] ss:$16 sps:$4 sm:$0xff]  }
 0x122   :  { %1445 = vmatpush1.bf16.msra.mxu0 %v3132_v15  ;;  %v3216_v15 = vld [vmem:[#allocation5 + $0x5a0] ss:$16 sps:$4 sm:$0xff]  }
 0x123   :  { %1457 = vmatprep.subr.bf16.mxu0 %v3140_v19  ;;  %v3222_v19 = vld [vmem:[#allocation5 + $0x5c0] ss:$16 sps:$4 sm:$0xff]  }
 0x124   :  { %1615 = vmatpush1.bf16.msra.mxu1 %v3135_v18  ;;  %v3227_v18 = vld [vmem:[#allocation5 + $0x5ac] ss:$16 sps:$4 sm:$0xff]  }
 0x125   :  { %1616 = vmatprep.subr.bf16.mxu1 %v3143_v20  ;;  %1447 = vmatmul.mubr.bf16.vlgmr.msra.gmra.mrb[0].mxu0 %v164_v21  ;;  %v3225_v20 = vld [vmem:[#allocation5 + $0x5a8] ss:$16 sps:$4 sm:$0xff]  }
 0x126   :  { %1458 = vmatpush1.bf16.msra.mxu0 %v3138_v22  ;;  %1489 = vmatprep.mubr.bf16.mxu0 %v167_v29  ;;  %v3233_v22 = vld [vmem:[#allocation5 + $0x5cc] ss:$16 sps:$4 sm:$0xff]  }
 0x127   :  { %1459 = vmatprep.subr.bf16.mxu0 %v3146_v24  ;;  %v152_v24 = vld [vmem:[#allocation2 + $0x20] sm:$0xff] }
 0x128   :  { %1617 = vmatpush1.bf16.msra.mxu1 %v3141_v23  ;;  %v3228_v23 = vld [vmem:[#allocation5 + $0x5e0] ss:$16 sps:$4 sm:$0xff]  }
 0x129   :  { %1629 = vmatprep.subr.bf16.mxu1 %v3149_v25  ;;  %v159_v25 = vld [vmem:[#allocation2 + $0x58] sm:$0xff] }
 0x12a   :  { %1460 = vmatpush1.bf16.msra.mxu0 %v3144_v28  ;;  %v3236_v28 = vld [vmem:[#allocation5 + $0x5ec] ss:$16 sps:$4 sm:$0xff]  }
 0x12b   :  { %1619 = vmatmul.mubr.bf16.vlgmr.msra.gmra.mrb[4].mxu1 %v164_v21  ;;  %1461 = vmatprep.subr.bf16.mxu0 %v3152_v31  ;;  %v3230_v21 = vld [vmem:[#allocation5 + $0x5e4] ss:$16 sps:$4 sm:$0xff]   ;;  %v3234_v31 = vld [vmem:[#allocation5 + $0x5e8] ss:$16 sps:$4 sm:$0xff]  }
 0x12c   :  { %1630 = vmatpush1.bf16.msra.mxu1 %v3147_v30  ;;  %1661 = vmatprep.mubr.bf16.mxu1 %v167_v29  ;;  %v166_v29 = vpack.c.bf16 %v159_v25, %v152_v24  ;;  %v3240_v30 = vld [vmem:[#allocation8] ss:$8 sps:$4 sm:$0xff]  }
 0x12d   :  { %1631 = vmatprep.subr.bf16.mxu1 %v3155_v32  ;;  %v3245_v32 = vld [vmem:[#allocation8 + $0x14] ss:$8 sps:$4 sm:$0xff]  }
 0x12e   :  { %1462 = vmatpush1.bf16.msra.mxu0 %v3150_v33  ;;  %v3239_v33 = vld [vmem:[#allocation5 + $0x60c] ss:$16 sps:$4 sm:$0xff]  }
 0x12f   :  { %1463 = vmatprep.subr.bf16.mxu0 %v3158_v35  ;;  %v3237_v35 = vld [vmem:[#allocation5 + $0x608] ss:$16 sps:$4 sm:$0xff]  }
 0x130   :  { %1632 = vmatpush1.bf16.msra.mxu1 %v3153_v34  ;;  %v3243_v34 = vld [vmem:[#allocation8 + $0x10] ss:$8 sps:$4 sm:$0xff]  }
 0x131   :  { %1633 = vmatprep.subr.bf16.mxu1 %v3161_v36  ;;  %v3248_v36 = vld [vmem:[#allocation8 + $0x24] ss:$8 sps:$4 sm:$0xff]  }
 0x132   :  { %1464 = vmatpush1.bf16.msra.mxu0 %v3156_v37  ;;  %v3246_v37 = vld [vmem:[#allocation8 + $0x20] ss:$8 sps:$4 sm:$0xff]  }
 0x133   :  { %1465 = vmatprep.subr.bf16.mxu0 %v3164_v39  ;;  %v3249_v39 = vld [vmem:[#allocation8 + $0x30] ss:$8 sps:$4 sm:$0xff]  }
 0x134   :  { %1634 = vmatpush1.bf16.msra.mxu1 %v3159_v38  ;;  %v3251_v38 = vld [vmem:[#allocation8 + $0x34] ss:$8 sps:$4 sm:$0xff]  }
 0x135   :  { %1635 = vmatprep.subr.bf16.mxu1 %v3167_v40  ;;  %v3254_v40 = vld [vmem:[#allocation8 + $0x44] ss:$8 sps:$4 sm:$0xff]  }
 0x136   :  { %1466 = vmatpush1.bf16.msra.mxu0 %v3162_v41  ;;  %v3252_v41 = vld [vmem:[#allocation8 + $0x40] ss:$8 sps:$4 sm:$0xff]  }
 0x137   :  { %1467 = vmatprep.subr.bf16.mxu0 %v3170_v43  ;;  %v3255_v43 = vld [vmem:[#allocation8 + $0x50] ss:$8 sps:$4 sm:$0xff]  }
 0x138   :  { %1636 = vmatpush1.bf16.msra.mxu1 %v3165_v42  ;;  %v3257_v42 = vld [vmem:[#allocation8 + $0x54] ss:$8 sps:$4 sm:$0xff]  }
 0x139   :  { %1637 = vmatprep.subr.bf16.mxu1 %v3173_v44  ;;  %v3260_v44 = vld [vmem:[#allocation8 + $0x64] ss:$8 sps:$4 sm:$0xff]  }
 0x13a   :  { %1468 = vmatpush1.bf16.msra.mxu0 %v3168_v45  ;;  %v3258_v45 = vld [vmem:[#allocation8 + $0x60] ss:$8 sps:$4 sm:$0xff]  }
 0x13b   :  { %1469 = vmatprep.subr.bf16.mxu0 %v3176_v47 }
 0x13c   :  { %1638 = vmatpush1.bf16.msra.mxu1 %v3171_v46 }
 0x13d   :  { %1639 = vmatprep.subr.bf16.mxu1 %v3179_v48  ;;  %v3261_v48 = vld [vmem:[#allocation8 + $0x70] ss:$8 sps:$4 sm:$0xff]  }
 0x13e   :  { %1470 = vmatpush1.bf16.msra.mxu0 %v3174_v49 }
 0x13f   :  { %1471 = vmatprep.subr.bf16.mxu0 %v3182_v51 }
 0x140   :  { %1640 = vmatpush1.bf16.msra.mxu1 %v3177_v50  ;;  %v3266_v50 = vld [vmem:[#allocation8 + $0x84] ss:$8 sps:$4 sm:$0xff]  }
 0x141   :  { %1641 = vmatprep.subr.bf16.mxu1 %v3185_v52  ;;  %v3269_v52 = vld [vmem:[#allocation8 + $0x94] ss:$8 sps:$4 sm:$0xff]  }
 0x142   :  { %1472 = vmatpush1.bf16.msra.mxu0 %v3180_v53  ;;  %v3267_v53 = vld [vmem:[#allocation8 + $0x90] ss:$8 sps:$4 sm:$0xff]  }
 0x143   :  { %1473 = vmatprep.subr.bf16.mxu0 %v3188_v55  ;;  %v3270_v55 = vld [vmem:[#allocation8 + $0xa0] ss:$8 sps:$4 sm:$0xff]  }
 0x144   :  { %1642 = vmatpush1.bf16.msra.mxu1 %v3183_v54  ;;  %v3272_v54 = vld [vmem:[#allocation8 + $0xa4] ss:$8 sps:$4 sm:$0xff]  }
 0x145   :  { %1643 = vmatprep.subr.bf16.mxu1 %v3191_v56  ;;  %v3275_v56 = vld [vmem:[#allocation8 + $0xb4] ss:$8 sps:$4 sm:$0xff]  }
 0x146   :  { %1474 = vmatpush1.bf16.msra.mxu0 %v3186_v57  ;;  %v3273_v57 = vld [vmem:[#allocation8 + $0xb0] ss:$8 sps:$4 sm:$0xff]  }
 0x147   :  { %1475 = vmatprep.subr.bf16.mxu0 %v3194_v59  ;;  %v3276_v59 = vld [vmem:[#allocation8 + $0xc0] ss:$8 sps:$4 sm:$0xff]  }
 0x148   :  { %1644 = vmatpush1.bf16.msra.mxu1 %v3189_v58  ;;  %v3278_v58 = vld [vmem:[#allocation8 + $0xc4] ss:$8 sps:$4 sm:$0xff]  }
 0x149   :  { %1645 = vmatprep.subr.bf16.mxu1 %v3197_v60  ;;  %v3281_v60 = vld [vmem:[#allocation8 + $0xd4] ss:$8 sps:$4 sm:$0xff]  }
 0x14a   :  { %1476 = vmatpush1.bf16.msra.mxu0 %v3192_v61  ;;  %v3279_v61 = vld [vmem:[#allocation8 + $0xd0] ss:$8 sps:$4 sm:$0xff]  }
 0x14b   :  { %1477 = vmatprep.subr.bf16.mxu0 %v3200_v63  ;;  %v3282_v63 = vld [vmem:[#allocation8 + $0xe0] ss:$8 sps:$4 sm:$0xff]  }
 0x14c   :  { %1646 = vmatpush1.bf16.msra.mxu1 %v3195_v62  ;;  %v3284_v62 = vld [vmem:[#allocation8 + $0xe4] ss:$8 sps:$4 sm:$0xff]  }
 0x14d   :  { %1647 = vmatprep.subr.bf16.mxu1 %v3203_v1  ;;  %v3287_v1 = vld [vmem:[#allocation8 + $0xf4] ss:$8 sps:$4 sm:$0xff]  }
 0x14e   :  { %1478 = vmatpush1.bf16.msra.mxu0 %v3198_v2  ;;  %v3285_v2 = vld [vmem:[#allocation8 + $0xf0] ss:$8 sps:$4 sm:$0xff]  }
 0x14f   :  { %1479 = vmatprep.subr.bf16.mxu0 %v3206_v4  ;;  %v3336_v4 = vld [vmem:[#allocation11 + $0x40] sm:$0xff]  }
 0x150   :  { %1648 = vmatpush1.bf16.msra.mxu1 %v3201_v3  ;;  %v3290_v3 = vld [vmem:[#allocation8 + $0x104] ss:$8 sps:$4 sm:$0xff]  }
 0x151   :  { %1649 = vmatprep.subr.bf16.mxu1 %v3209_v5  ;;  %v3337_v5 = vld [vmem:[#allocation11] sm:$0xff]  }
 0x152   :  { %1480 = vmatpush1.bf16.msra.mxu0 %v3204_v6  ;;  %v3338_v6 = vld [vmem:[#allocation11 + $0x48] sm:$0xff]  }
 0x153   :  { %1481 = vmatprep.subr.bf16.mxu0 %v3212_v8  ;;  %v3340_v8 = vld [vmem:[#allocation11 + $0x50] sm:$0xff]  }
 0x154   :  { %1650 = vmatpush1.bf16.msra.mxu1 %v3207_v7  ;;  %v3339_v7 = vld [vmem:[#allocation11 + $0x8] sm:$0xff]  }
 0x155   :  { %1651 = vmatprep.subr.bf16.mxu1 %v3215_v9  ;;  %v3341_v9 = vld [vmem:[#allocation11 + $0x10] sm:$0xff]  }
 0x156   :  { %1482 = vmatpush1.bf16.msra.mxu0 %v3210_v10  ;;  %v3342_v10 = vld [vmem:[#allocation11 + $0x58] sm:$0xff]  }
 0x157   :  { %1483 = vmatprep.subr.bf16.mxu0 %v3218_v13  ;;  %v3344_v13 = vld [vmem:[#allocation11 + $0x60] sm:$0xff]  }
 0x158   :  { %1652 = vmatpush1.bf16.msra.mxu1 %v3213_v12  ;;  %v3343_v12 = vld [vmem:[#allocation11 + $0x18] sm:$0xff]  }
 0x159   :  { %1653 = vmatprep.subr.bf16.mxu1 %v3221_v14  ;;  %v3345_v14 = vld [vmem:[#allocation11 + $0x20] sm:$0xff]  }
 0x15a   :  { %1484 = vmatpush1.bf16.msra.mxu0 %v3216_v15  ;;  %v3346_v15 = vld [vmem:[#allocation11 + $0x68] sm:$0xff]  }
 0x15b   :  { %1485 = vmatprep.subr.bf16.mxu0 %v3224_v17 }
 0x15c   :  { %1654 = vmatpush1.bf16.msra.mxu1 %v3219_v16  ;;  %v367_v16 = vlaneseq }
 0x15d   :  { %1655 = vmatprep.subr.bf16.mxu1 %v3227_v18 }
 0x15e   :  { %1486 = vmatpush1.bf16.msra.mxu0 %v3222_v19  ;;  %v3793_v17 = vshrl.u32 %v367_v16, 7  ;;  %v365_v19 = vld [vmem:[#allocation7] sm:$0xf] }
 0x15f   :  { %1487 = vmatprep.subr.bf16.mxu0 %v3230_v21  ;;  %v3323_v16 = vld [vmem:[#allocation8 + $0x1b4] ss:$8 sps:$4 sm:$0xff]  }
 0x160   :  { %1656 = vmatpush1.bf16.msra.mxu1 %v3225_v20  ;;  %v369_v18 = vsub.s32 0, %v3793_v17  ;;  %v373_v20 = vsub.s32 1, %v3793_v17 }
 0x161   :  { %1657 = vmatprep.subr.bf16.mxu1 %v3233_v22 }
 0x162   :  { %1488 = vmatpush1.bf16.msra.mxu0 %v3228_v23  ;;  %v370_v21 = vrot.slane %v365_v19, %v369_v18  ;;  %v374_v22 = vrot.slane %v365_v19, %v373_v20 }
 0x163   :  { %2123 = vmatprep.subr.bf16.mxu0 %v3242_v27 }
 0x164   :  { %1658 = vmatpush1.bf16.msra.mxu1 %v3231_v26 }
 0x165   :  { %1659 = vmatprep.subr.bf16.mxu1 %v3236_v28  ;;  %1490 = vmatmul.mubr.bf16.vlgmr.msra.gmra.mrb[0].mxu0 %v166_v29 }
 0x166   :  { %2124 = vmatpush1.bf16.msra.mxu0 %v3240_v30 }
 0x167   :  { %2125 = vmatprep.subr.bf16.mxu0 %v3245_v32 }
 0x168   :  { %1660 = vmatpush1.bf16.msra.mxu1 %v3234_v31 }
 0x169   :  { %1672 = vmatprep.subr.bf16.mxu1 %v3239_v33 }
 0x16a   :  { %2126 = vmatpush1.bf16.msra.mxu0 %v3243_v34 }
 0x16b   :  { %1662 = vmatmul.mubr.bf16.vlgmr.msra.gmra.mrb[4].mxu1 %v166_v29  ;;  %2127 = vmatprep.subr.bf16.mxu0 %v3248_v36 }
 0x16c   :  { %1673 = vmatpush1.bf16.msra.mxu1 %v3237_v35  ;;  %1704 = vmatprep.mubr.bf16.mxu1 %v3609_v0  ;;  %v3263_v0 = vld [vmem:[#allocation8 + $0x74] ss:$8 sps:$4 sm:$0xff]  }
 0x16d   :  { %2834 = vmatprep.subr.bf16.mxu1 %v3336_v4  ;;  %v3303_v4 = vld [vmem:[#allocation8 + $0x150] ss:$8 sps:$4 sm:$0xff]  }
 0x16e   :  { %2128 = vmatpush1.bf16.msra.mxu0 %v3246_v37 }
 0x16f   :  { %2129 = vmatprep.subr.bf16.mxu0 %v3251_v38 }
 0x172   :  { %2130 = vmatpush1.bf16.msra.mxu0 %v3249_v39 }
 0x173   :  { %2131 = vmatprep.subr.bf16.mxu0 %v3254_v40 }
 0x176   :  { %2132 = vmatpush1.bf16.msra.mxu0 %v3252_v41  ;;  %v3288_v41 = vld [vmem:[#allocation8 + $0x100] ss:$8 sps:$4 sm:$0xff]  }
 0x177   :  { %2734 = vmatmul.mubr.msk.bf16.vlgmr.msra.gmra.mrb[4].mxu1 %vm1367_vm0, %v3778_v11  ;;  %2133 = vmatprep.subr.bf16.mxu0 %v3257_v42  ;;  %v3264_v11 = vld [vmem:[#allocation8 + $0x80] ss:$8 sps:$4 sm:$0xff]   ;;  %v377_v42 = vsub.s32 2, %v3793_v17 }
 0x178   :  { %2835 = vmatpush3.bf16.msra.mxu1 %v3337_v5  ;;  %v3308_v5 = vld [vmem:[#allocation8 + $0x164] ss:$8 sps:$4 sm:$0xff]  }
 0x179   :  { %2836 = vmatprep.subr.bf16.mxu1 %v3338_v6  ;;  %v3306_v6 = vld [vmem:[#allocation8 + $0x160] ss:$8 sps:$4 sm:$0xff]  }
 0x17a   :  { %2134 = vmatpush1.bf16.msra.mxu0 %v3255_v43  ;;  %v3293_v43 = vld [vmem:[#allocation8 + $0x114] ss:$8 sps:$4 sm:$0xff]  }
 0x17b   :  { %2135 = vmatprep.subr.bf16.mxu0 %v3260_v44  ;;  %v381_v44 = vsub.s32 3, %v3793_v17  ;;  %v3353_v17 = vld [vmem:[#allocation14 + $0x8] sm:$0xff]  }
 0x17c   :  { %2837 = vmatpush3.bf16.msra.mxu1 %v3339_v7  ;;  %v3311_v7 = vld [vmem:[#allocation8 + $0x174] ss:$8 sps:$4 sm:$0xff]  }
 0x17d   :  { %2838 = vmatprep.subr.bf16.mxu1 %v3340_v8  ;;  %v3309_v8 = vld [vmem:[#allocation8 + $0x170] ss:$8 sps:$4 sm:$0xff]  }
 0x17e   :  { %v3785_v46 = vpop.f32.mrb[0].mxu1  ;;  %2136 = vmatpush1.bf16.msra.mxu0 %v3258_v45  ;;  %v378_v45 = vrot.slane %v365_v19, %v377_v42 }
 0x17f   :  { %v3787_v47 = vpop.f32.mrb[1].mxu1  ;;  %2137 = vmatprep.subr.bf16.mxu0 %v3263_v0  ;;  %v3291_v0 = vld [vmem:[#allocation8 + $0x110] ss:$8 sps:$4 sm:$0xff]  }
 0x180   :  { %v3789_v49 = vpop.f32.mrb[2].mxu1  ;;  %2839 = vmatpush3.bf16.msra.mxu1 %v3341_v9  ;;  %v3314_v9 = vld [vmem:[#allocation8 + $0x184] ss:$8 sps:$4 sm:$0xff]  }
 0x181   :  { %v3791_v51 = vpop.f32.mrb[3].mxu1  ;;  %2840 = vmatprep.subr.bf16.mxu1 %v3342_v10  ;;  %v3312_v10 = vld [vmem:[#allocation8 + $0x180] ss:$8 sps:$4 sm:$0xff]  }
 0x182   :  { %2138 = vmatpush1.bf16.msra.mxu0 %v3261_v48 }
 0x183   :  { %2139 = vmatprep.subr.bf16.mxu0 %v3266_v50 }
 0x184   :  { %2841 = vmatpush3.bf16.msra.mxu1 %v3343_v12  ;;  %v3317_v12 = vld [vmem:[#allocation8 + $0x194] ss:$8 sps:$4 sm:$0xff]  }
 0x185   :  { %2842 = vmatprep.subr.bf16.mxu1 %v3344_v13  ;;  %v3315_v13 = vld [vmem:[#allocation8 + $0x190] ss:$8 sps:$4 sm:$0xff]  }
 0x186   :  { %2140 = vmatpush1.bf16.msra.mxu0 %v3264_v11 }
 0x187   :  { %2141 = vmatprep.subr.bf16.mxu0 %v3269_v52 }
 0x188   :  { %2843 = vmatpush3.bf16.msra.mxu1 %v3345_v14  ;;  %v3320_v14 = vld [vmem:[#allocation8 + $0x1a4] ss:$8 sps:$4 sm:$0xff]  }
 0x189   :  { %2844 = vmatprep.subr.bf16.mxu1 %v3346_v15  ;;  %v3318_v15 = vld [vmem:[#allocation8 + $0x1a0] ss:$8 sps:$4 sm:$0xff]  }
 0x18a   :  { %2142 = vmatpush1.bf16.msra.mxu0 %v3267_v53  ;;  %v3299_v53 = vld [vmem:[#allocation8 + $0x134] ss:$8 sps:$4 sm:$0xff]  }
 0x18b   :  { %2143 = vmatprep.subr.bf16.mxu0 %v3272_v54 }
 0x18e   :  { %2144 = vmatpush1.bf16.msra.mxu0 %v3270_v55 }
 0x18f   :  { %2145 = vmatprep.subr.bf16.mxu0 %v3275_v56 }
 0x192   :  { %2146 = vmatpush1.bf16.msra.mxu0 %v3273_v57 }
 0x193   :  { %2147 = vmatprep.subr.bf16.mxu0 %v3278_v58 }
 0x196   :  { %2148 = vmatpush1.bf16.msra.mxu0 %v3276_v59  ;;  %v3297_v59 = vld [vmem:[#allocation8 + $0x130] ss:$8 sps:$4 sm:$0xff]  }
 0x197   :  { %2149 = vmatprep.subr.bf16.mxu0 %v3281_v60 }
 0x19a   :  { %2150 = vmatpush1.bf16.msra.mxu0 %v3279_v61 }
 0x19b   :  { %2151 = vmatprep.subr.bf16.mxu0 %v3284_v62  ;;  %v3302_v62 = vld [vmem:[#allocation8 + $0x144] ss:$8 sps:$4 sm:$0xff]  }
 0x19e   :  { %2152 = vmatpush1.bf16.msra.mxu0 %v3282_v63 }
 0x19f   :  { %2153 = vmatprep.subr.bf16.mxu0 %v3287_v1 }
 0x1a2   :  { %2154 = vmatpush1.bf16.msra.mxu0 %v3285_v2  ;;  %v3300_v2 = vld [vmem:[#allocation8 + $0x140] ss:$8 sps:$4 sm:$0xff]  }
 0x1a3   :  { %2166 = vmatprep.subr.bf16.mxu0 %v3290_v3  ;;  %v3305_v3 = vld [vmem:[#allocation8 + $0x154] ss:$8 sps:$4 sm:$0xff]  }
 0x238   :  { %v1491_v23 = vpop.f32.mrb[0].mxu0 }
 0x239   :  { %v2885_v24 = vadd.f32 %v1491_v23, %v370_v21  ;;  %v1493_v25 = vpop.f32.mrb[1].mxu0  ;;  %v3329_v23 = vld [vmem:[#allocation8 + $0x1d4] ss:$8 sps:$4 sm:$0xff]  }
 0x23a   :  { %v2887_v26 = vadd.f32 %v1493_v25, %v374_v22  ;;  %v1495_v27 = vpop.f32.mrb[2].mxu0  ;;  %v3332_v25 = vld [vmem:[#allocation8 + $0x1e4] ss:$8 sps:$4 sm:$0xff]  }
 0x23b   :  { %v2886_v28 = vadd.f32 %v2885_v24, %v3785_v46  ;;  %v2889_v29 = vadd.f32 %v1495_v27, %v370_v21  ;;  %v1497_v30 = vpop.f32.mrb[3].mxu0  ;;  %v382_v46 = vrot.slane %v365_v19, %v381_v44  ;;  %v3321_v19 = vld [vmem:[#allocation8 + $0x1b0] ss:$8 sps:$4 sm:$0xff]   ;;  %v3326_v21 = vld [vmem:[#allocation8 + $0x1c4] ss:$8 sps:$4 sm:$0xff]  }
 0x23c   :  { %v2888_v31 = vadd.f32 %v2887_v26, %v3787_v47  ;;  %v2891_v32 = vadd.f32 %v1497_v30, %v374_v22  ;;  %v3296_v47 = vld [vmem:[#allocation8 + $0x124] ss:$8 sps:$4 sm:$0xff]   ;;  %v3324_v22 = vld [vmem:[#allocation8 + $0x1c0] ss:$8 sps:$4 sm:$0xff]   ;;  %v3327_v24 = vld [vmem:[#allocation8 + $0x1d0] ss:$8 sps:$4 sm:$0xff]  }
 0x23d   :  { %v2890_v33 = vadd.f32 %v2889_v29, %v3789_v49  ;;  %v1715_v35 = vmax.f32 %v2886_v28, 0.0  ;;  %v3330_v26 = vld [vmem:[#allocation8 + $0x1e0] ss:$8 sps:$4 sm:$0xff]   ;;  %v3335_v27 = vld [vmem:[#allocation8 + $0x1f4] ss:$8 sps:$4 sm:$0xff]  }
 0x23e   :  { %v2892_v34 = vadd.f32 %v2891_v32, %v3791_v51  ;;  %v1716_v37 = vmax.f32 %v2888_v31, 0.0  ;;  %v3294_v51 = vld [vmem:[#allocation8 + $0x120] ss:$8 sps:$4 sm:$0xff]   ;;  %v3333_v28 = vld [vmem:[#allocation8 + $0x1f0] ss:$8 sps:$4 sm:$0xff]  }
 0x23f   :  { %v1719_v36 = vmax.f32 %v2890_v33, 0.0  ;;  %v3347_v29 = vld [vmem:[#allocation11 + $0x28] sm:$0xff]   ;;  %v3348_v30 = vld [vmem:[#allocation11 + $0x70] sm:$0xff]   ;;  %v3350_v32 = vld [vmem:[#allocation11 + $0x78] sm:$0xff]  }
 0x240   :  { %v1720_v38 = vmax.f32 %v2892_v34, 0.0  ;;  %2845 = vmatpush3.bf16.msra.mxu1 %v3347_v29  ;;  %v3349_v31 = vld [vmem:[#allocation11 + $0x30] sm:$0xff]   ;;  %v3351_v33 = vld [vmem:[#allocation11 + $0x38] sm:$0xff]   ;;  %v3610_v34 = vmov 0.0  }
 0x241   :  { %v1723_v39 = vpack.c.bf16 %v1719_v36, %v1715_v35  ;;  %2846 = vmatprep.subr.bf16.mxu1 %v3348_v30  ;;  %v1791_v35 = vld [vmem:[#allocation10] sm:$0x3] }
 0x242   :  { %v1724_v40 = vpack.c.bf16 %v1720_v38, %v1716_v37  ;;  %v1796_v36 = vrot.slane %v1791_v35, %v369_v18  ;;  %v1800_v37 = vrot.slane %v1791_v35, %v373_v20  ;;  %v3354_v18 = vld [vmem:[#allocation14 + $0x10] sm:$0xff]   ;;  %v3355_v20 = vld [vmem:[#allocation14 + $0x18] sm:$0xff]  }
 0x244   :  { %2155 = vmatprep.mubr.bf16.mxu0 %v1724_v40  ;;  %2847 = vmatpush3.bf16.msra.mxu1 %v3349_v31 }
 0x245   :  { %2156 = vmatmul.mubr.bf16.vlgmr.msra.gmra.mrb[4].mxu0 %v1723_v39  ;;  %2848 = vmatprep.subr.bf16.mxu1 %v3350_v32 }
 0x246   :  { %2167 = vmatpush1.bf16.msra.mxu0 %v3288_v41 }
 0x247   :  { %2168 = vmatprep.subr.bf16.mxu0 %v3293_v43 }
 0x248   :  { %2849 = vmatpush3.bf16.msra.mxu1 %v3351_v33 }
 0x249   :  { %2865 = vmatprep.subr.bf16.mxu1 %v3610_v34 }
 0x24a   :  { %v1706_v48 = vpop.f32.mrb[4].mxu1  ;;  %2169 = vmatpush1.bf16.msra.mxu0 %v3291_v0 }
 0x24b   :  { %v2893_v49 = vadd.f32 %v1706_v48, %v378_v45  ;;  %v1708_v50 = vpop.f32.mrb[5].mxu1  ;;  %2170 = vmatprep.subr.bf16.mxu0 %v3296_v47 }
 0x24c   :  { %v2894_v11 = vadd.f32 %v1708_v50, %v382_v46  ;;  %v1710_v52 = vpop.f32.mrb[6].mxu1 }
 0x24d   :  { %v2895_v54 = vadd.f32 %v1710_v52, %v378_v45  ;;  %v1712_v55 = vpop.f32.mrb[7].mxu1  ;;  %v1717_v57 = vmax.f32 %v2893_v49, 0.0  ;;  %v3357_v52 = vld [vmem:[#allocation14 + $0x28] sm:$0xff]  }
 0x24e   :  { %v2896_v56 = vadd.f32 %v1712_v55, %v382_v46  ;;  %2171 = vmatpush1.bf16.msra.mxu0 %v3294_v51  ;;  %v1718_v60 = vmax.f32 %v2894_v11, 0.0  ;;  %v3352_v51 = vld [vmem:[#allocation14] sm:$0xff]  }
 0x24f   :  { %v1721_v58 = vmax.f32 %v2895_v54, 0.0  ;;  %2172 = vmatprep.subr.bf16.mxu0 %v3299_v53  ;;  %v3356_v11 = vld [vmem:[#allocation14 + $0x20] sm:$0xff]   ;;  %v3358_v53 = vld [vmem:[#allocation14 + $0x30] sm:$0xff]   ;;  %v3359_v54 = vld [vmem:[#allocation14 + $0x38] sm:$0xff]  }
 0x250   :  { %v1722_v61 = vmax.f32 %v2896_v56, 0.0  ;;  %v2799_v56 = vld [vmem:[#allocation13] ss:$0 sm:$0xff] }
 0x251   :  { %v1725_v63 = vpack.c.bf16 %v1721_v58, %v1717_v57 }
 0x252   :  { %v1726_v1 = vpack.c.bf16 %v1722_v61, %v1718_v60  ;;  %2173 = vmatpush1.bf16.msra.mxu0 %v3297_v59 }
 0x253   :  { %2174 = vmatprep.subr.bf16.mxu0 %v3302_v62 }
 0x254   :  { %2198 = vmatprep.mubr.bf16.mxu0 %v1726_v1 }
 0x256   :  { %2175 = vmatpush1.bf16.msra.mxu0 %v3300_v2 }
 0x257   :  { %2176 = vmatprep.subr.bf16.mxu0 %v3305_v3 }
 0x25a   :  { %2177 = vmatpush1.bf16.msra.mxu0 %v3303_v4  ;;  %v2816_v4 = vld [vmem:[#allocation16] ss:$0 sm:$0xff] }
 0x25b   :  { %2178 = vmatprep.subr.bf16.mxu0 %v3308_v5 }
 0x25e   :  { %2179 = vmatpush1.bf16.msra.mxu0 %v3306_v6 }
 0x25f   :  { %2180 = vmatprep.subr.bf16.mxu0 %v3311_v7 }
 0x262   :  { %2181 = vmatpush1.bf16.msra.mxu0 %v3309_v8 }
 0x263   :  { %2182 = vmatprep.subr.bf16.mxu0 %v3314_v9 }
 0x266   :  { %2183 = vmatpush1.bf16.msra.mxu0 %v3312_v10 }
 0x267   :  { %2184 = vmatprep.subr.bf16.mxu0 %v3317_v12 }
 0x26a   :  { %2185 = vmatpush1.bf16.msra.mxu0 %v3315_v13 }
 0x26b   :  { %2186 = vmatprep.subr.bf16.mxu0 %v3320_v14 }
 0x26e   :  { %2187 = vmatpush1.bf16.msra.mxu0 %v3318_v15 }
 0x26f   :  { %2188 = vmatprep.subr.bf16.mxu0 %v3323_v16 }
 0x272   :  { %2189 = vmatpush1.bf16.msra.mxu0 %v3321_v19 }
 0x273   :  { %2190 = vmatprep.subr.bf16.mxu0 %v3326_v21 }
 0x276   :  { %2191 = vmatpush1.bf16.msra.mxu0 %v3324_v22 }
 0x277   :  { %2192 = vmatprep.subr.bf16.mxu0 %v3329_v23 }
 0x27a   :  { %2193 = vmatpush1.bf16.msra.mxu0 %v3327_v24 }
 0x27b   :  { %2194 = vmatprep.subr.bf16.mxu0 %v3332_v25 }
 0x27e   :  { %2195 = vmatpush1.bf16.msra.mxu0 %v3330_v26 }
 0x27f   :  { %2196 = vmatprep.subr.bf16.mxu0 %v3335_v27 }
 0x282   :  { %2197 = vmatpush1.bf16.msra.mxu0 %v3333_v28 }
 0x285   :  { %2199 = vmatmul.mubr.bf16.vlgmr.msra.gmra.mrb[4].mxu0 %v1725_v63 }
 0x358   :  { %v2200_v38 = vpop.f32.mrb[4].mxu0 }
 0x359   :  { %v2897_v39 = vadd.f32 %v2200_v38, %v1796_v36  ;;  %v2202_v40 = vpop.f32.mrb[5].mxu0 }
 0x35a   :  { %v2898_v41 = vadd.f32 %v2202_v40, %v1800_v37  ;;  %v2204_v42 = vpop.f32.mrb[6].mxu0 }
 0x35b   :  { %v2899_v43 = vadd.f32 %v2204_v42, %v1796_v36  ;;  %v2206_v44 = vpop.f32.mrb[7].mxu0  ;;  %v2209_v0 = vmax.f32 %v2897_v39, 0.0 }
 0x35c   :  { %v2900_v45 = vadd.f32 %v2206_v44, %v1800_v37  ;;  %v2210_v47 = vmax.f32 %v2898_v41, 0.0 }
 0x35d   :  { %v2211_v46 = vmax.f32 %v2899_v43, 0.0 }
 0x35e   :  { %v2212_v48 = vmax.f32 %v2900_v45, 0.0 }
 0x35f   :  { %v2213_v49 = vpack.c.bf16 %v2211_v46, %v2209_v0 }
 0x360   :  { %v2214_v50 = vpack.c.bf16 %v2212_v48, %v2210_v47 }
 0x362   :  { %2382 = vmatprep.mubr.bf16.mxu1 %v2214_v50 }
 0x363   :  { %2383 = vmatmul.mubr.bf16.vlgmr.msra.gmra.mrb[8].mxu1 %v2213_v49 }
 0x364   :  { %2866 = vmatpush3.bf16.msra.mxu1 %v3352_v51  ;;  %2881 = vmatprep.mubr.msk.bf16.mxu1 %vm3611_vm1, %v3610_v34 }
 0x365   :  { %2867 = vmatprep.subr.bf16.mxu1 %v3610_v34 }
 0x368   :  { %2868 = vmatpush3.bf16.msra.mxu1 %v3353_v17 }
 0x369   :  { %2869 = vmatprep.subr.bf16.mxu1 %v3610_v34 }
 0x36c   :  { %2870 = vmatpush3.bf16.msra.mxu1 %v3354_v18 }
 0x36d   :  { %2871 = vmatprep.subr.bf16.mxu1 %v3610_v34 }
 0x370   :  { %2872 = vmatpush3.bf16.msra.mxu1 %v3355_v20 }
 0x371   :  { %2873 = vmatprep.subr.bf16.mxu1 %v3610_v34 }
 0x374   :  { %2874 = vmatpush3.bf16.msra.mxu1 %v3356_v11 }
 0x375   :  { %2875 = vmatprep.subr.bf16.mxu1 %v3610_v34 }
 0x378   :  { %2876 = vmatpush3.bf16.msra.mxu1 %v3357_v52 }
 0x379   :  { %2877 = vmatprep.subr.bf16.mxu1 %v3610_v34 }
 0x37c   :  { %2878 = vmatpush3.bf16.msra.mxu1 %v3358_v53 }
 0x37d   :  { %2879 = vmatprep.subr.bf16.mxu1 %v3610_v34 }
 0x380   :  { %2880 = vmatpush3.bf16.msra.mxu1 %v3359_v54 }
 0x436   :  { %v2850_v55 = vpop.f32.mrb[8].mxu1 }
 0x437   :  { %v2851_v57 = vpop.f32.mrb[9].mxu1 }
 0x438   :  { %v2852_v58 = vadd.f32 %v2851_v57, %v2850_v55  ;;  %v2853_v59 = vpop.f32.mrb[10].mxu1 }
 0x439   :  { %v2854_v60 = vpop.f32.mrb[11].mxu1 }
 0x43a   :  { %v2385_v61 = vadd.f32 %v2852_v58, %v2799_v56  ;;  %v2855_v62 = vadd.f32 %v2854_v60, %v2853_v59 }
 0x43c   :  { %v2388_v63 = vadd.f32 %v2855_v62, %v2799_v56  ;;  %v2391_v1 = vmax.f32 %v2385_v61, 0.0 }
 0x43e   :  { %v2392_v2 = vmax.f32 %v2388_v63, 0.0 }
 0x440   :  { %v2393_v3 = vpack.c.bf16 %v2392_v2, %v2391_v1 }
 0x442   :  { %2882 = vmatmul.mubr.bf16.vlgmr.msra.gmra.mrb[12].mxu1 %v2393_v3 }
 0x515   :  { %v2499_v5 = vpop.f32.mrb[12].mxu1 }
 0x516   :  { %v2883_v6 = vpop.f32.mrb[13].mxu1  ;;  %v2500_v8 = vadd.f32 %v2816_v4, %v2499_v5 }
 0x517   :  { %v2502_v7 = vpop.f32.mrb[14].mxu1 }
 0x518   :  { %v2503_v9 = vadd.f32 %v2816_v4, %v2502_v7  ;;  %v2884_v10 = vpop.f32.mrb[15].mxu1 }
 0x51a   :  { %v2832_v12 = vpack.c.bf16 %v2503_v9, %v2500_v8 }
 0x51c   :  { %2833 = vst [vmem:[#allocation17] sm:$0xff] %v2832_v12  }
 0x51d   :  { %3569 = shalt.err (!%p3566_p6)
}
 0x51e   :  { %s3570_s10 = scalar_lea.hbm %s3835_s9, 128 }
 0x51f   :  { %p3571_p7 = scmp.ne.s32.totalorder %s3835_s9, %s3570_s10  ;;  %p3574_p8 = scmp.lt.u32.totalorder %s3570_s10, %s3835_s9 }
 0x521   :  { %p3576_p9 = pnand %p3574_p8, %p3571_p7 }
 0x523   :  { %3579 = shalt.err (!%p3576_p9)
}
 0x524   :  { %2527 = dma.vmem_to_hbm [thread:$0]  %s2522_s29, 128, %s3835_s9, [#allocation4], %s3599_s3, %s3599_s3, %s3600_s24  }
 0x525   :  { %3590 = dma.done.wait [#allocation4], 128  }
 0x526   :  { %3591 = vsyncadd [#allocation4], 4294967168 }
 0x527   :  { %2531 = vsyncpa [#allocation3], 1 }
 0x528   :  { %2532 = vsyncpa [#allocation6], 1 }
 0x529   :  { %2533 = vsyncpa [#allocation9], 1 }
 0x52a   :  { %2534 = vsyncpa [#allocation12], 1 }
 0x52b   :  { %2535 = vsyncpa [#allocation15], 1 }
 0x52c   :  { %2536 = vsyncpa [#allocation4], 1 }

// kernel: _forward_impl.1
= control target key start
LH: loop header
LB: loop body
LE: loop exit
PB: predicated region body
PF: predicated region fallthrough
CT: control target
= control target key end

     0   :  { %14 = vsyncpa [#allocation3], 0  ;;  %s3826_s0 = inlined_call_operand.hbm [shape: f32[16,784], index: 0, kind: input, shape index: {}]   ;;  %s3827_s1 = inlined_call_operand.hbm [shape: bf16[784,512], index: 1, kind: input, shape index: {}]   ;;  %s3828_s2 = inlined_call_operand.hbm [shape: f32[1,512], index: 2, kind: input, shape index: {}]   ;;  %s3829_s3 = inlined_call_operand.hbm [shape: bf16[512,256], index: 3, kind: input, shape index: {}]   ;;  %s3830_s4 = inlined_call_operand.hbm [shape: f32[1,256], index: 4, kind: input, shape index: {}]   ;;  %s3831_s5 = inlined_call_operand.hbm [shape: bf16[256,128], index: 5, kind: input, shape index: {}]   ;;  %s3832_s6 = inlined_call_operand.hbm [shape: f32[1,128], index: 6, kind: input, shape index: {}]   ;;  %s3833_s7 = inlined_call_operand.hbm [shape: bf16[128,128], index: 7, kind: input, shape index: {}]   ;;  %s3834_s8 = inlined_call_operand.hbm [shape: f32[1,128], index: 8, kind: input, shape index: {}]   ;;  %s3835_s9 = inlined_call_operand.hbm [shape: bf16[16,128], index: 9, kind: output, shape index: {}]  }
   0x1   :  { %15 = vsyncpa [#allocation6], 0 }
   0x2   :  { %16 = vsyncpa [#allocation9], 0 }
   0x3   :  { %17 = vsyncpa [#allocation12], 0 }
   0x4   :  { %18 = vsyncpa [#allocation15], 0 }
   0x5   :  { %19 = vsyncpa [#allocation4], 0  ;;  %s3592_s30 = smov [#allocation5]   ;;  %s3360_s13 = scalar_lea.hbm %s3827_s1, 25088 }
   0x6   :  { %s37_s10 = sshll.u32 %s3592_s30, 4  ;;  %p3361_p0 = scmp.ne.s32.totalorder %s3827_s1, %s3360_s13  ;;  %s38_s10 = int_to_ptr.vmem [resolvable:$true] %s37_s10 }
   0x7   :  { %p3364_p1 = scmp.lt.u32.totalorder %s3360_s13, %s3827_s1 }
   0x9   :  { %p3366_p2 = pnand %p3364_p1, %p3361_p0 }
   0xb   :  { %3369 = shalt.err (!%p3366_p2)
}
   0xc   :  { %s3370_s18 = scalar_lea.vmem %s38_s10, 25088  ;;  %p3375_p4 = scmp.lt.s32.totalorder %s38_s10, %s38_s10 }
   0xd   :  { %p3371_p3 = scmp.ne.s32.totalorder %s38_s10, %s3370_s18  ;;  %p3376_p5 = scmp.lt.s32.totalorder %s3370_s18, %s3370_s18 }
   0xf   :  { %p3377_p6 = por %p3376_p5, %p3375_p4 }
  0x11   :  { %p3378_p7 = pnand %p3377_p6, %p3371_p3 }
  0x13   :  { %3381 = shalt.err (!%p3378_p7)
}
  0x14   :  { %s3593_s19 = smov 256   ;;  %s3594_s20 = smov 16  }
  0x15   :  { %43 = dma.hbm_to_vmem [thread:$0]  %s3827_s1, 25088, %s38_s10, [#allocation6], %s3593_s19, %s3593_s19, %s3594_s20  }
  0x16   :  { %s3595_s23 = smov [#allocation8]   ;;  %s3382_s27 = scalar_lea.hbm %s3829_s3, 8192 }
  0x17   :  { %s59_s24 = sshll.u32 %s3595_s23, 4  ;;  %p3383_p8 = scmp.ne.s32.totalorder %s3829_s3, %s3382_s27  ;;  %s60_s24 = int_to_ptr.vmem [resolvable:$true] %s59_s24 }
  0x18   :  { %p3386_p9 = scmp.lt.u32.totalorder %s3382_s27, %s3829_s3 }
  0x1a   :  { %p3388_p10 = pnand %p3386_p9, %p3383_p8 }
  0x1c   :  { %3391 = shalt.err (!%p3388_p10)
}
  0x1d   :  { %s3392_s12 = scalar_lea.vmem %s60_s24, 8192  ;;  %p3397_p12 = scmp.lt.s32.totalorder %s60_s24, %s60_s24 }
  0x1e   :  { %p3393_p11 = scmp.ne.s32.totalorder %s60_s24, %s3392_s12  ;;  %p3398_p13 = scmp.lt.s32.totalorder %s3392_s12, %s3392_s12 }
  0x20   :  { %p3399_p0 = por %p3398_p13, %p3397_p12 }
  0x22   :  { %p3400_p1 = pnand %p3399_p0, %p3393_p11 }
  0x24   :  { %3403 = shalt.err (!%p3400_p1)
}
  0x25   :  { %s3596_s1 = smov 128   ;;  %s3597_s10 = smov 8  }
  0x26   :  { %65 = dma.hbm_to_vmem [thread:$0]  %s3829_s3, 8192, %s60_s24, [#allocation9], %s3596_s1, %s3596_s1, %s3597_s10  }
  0x27   :  { %s3598_s15 = smov [#allocation11]   ;;  %s3404_s19 = scalar_lea.hbm %s3831_s5, 2048 }
  0x28   :  { %s81_s16 = sshll.u32 %s3598_s15, 4  ;;  %p3405_p2 = scmp.ne.s32.totalorder %s3831_s5, %s3404_s19  ;;  %s82_s16 = int_to_ptr.vmem [resolvable:$true] %s81_s16 }
  0x29   :  { %p3408_p3 = scmp.lt.u32.totalorder %s3404_s19, %s3831_s5 }
  0x2b   :  { %p3410_p4 = pnand %p3408_p3, %p3405_p2 }
  0x2d   :  { %3413 = shalt.err (!%p3410_p4)
}
  0x2e   :  { %s3414_s25 = scalar_lea.vmem %s82_s16, 2048  ;;  %p3419_p6 = scmp.lt.s32.totalorder %s82_s16, %s82_s16 }
  0x2f   :  { %p3415_p5 = scmp.ne.s32.totalorder %s82_s16, %s3414_s25  ;;  %p3420_p7 = scmp.lt.s32.totalorder %s3414_s25, %s3414_s25 }
  0x31   :  { %p3421_p8 = por %p3420_p7, %p3419_p6 }
  0x33   :  { %p3422_p9 = pnand %p3421_p8, %p3415_p5 }
  0x35   :  { %3425 = shalt.err (!%p3422_p9)
}
  0x36   :  { %s3599_s3 = smov 64   ;;  %s3600_s24 = smov 4  }
  0x37   :  { %87 = dma.hbm_to_vmem [thread:$0]  %s3831_s5, 2048, %s82_s16, [#allocation12], %s3599_s3, %s3599_s3, %s3600_s24  }
  0x38   :  { %s3601_s28 = smov [#allocation14]   ;;  %s3602_s30 = smov [#allocation2]  }
  0x39   :  { %s103_s29 = sshll.u32 %s3601_s28, 4  ;;  %s25_s11 = sshll.u32 %s3602_s30, 4  ;;  %s104_s29 = int_to_ptr.vmem [resolvable:$true] %s103_s29  ;;  %s26_s11 = int_to_ptr.vmem [resolvable:$true] %s25_s11 }
  0x3a   :  { %s3426_s10 = scalar_lea.hbm %s3833_s7, 1024 }
  0x3b   :  { %p3427_p10 = scmp.ne.s32.totalorder %s3833_s7, %s3426_s10  ;;  %p3430_p11 = scmp.lt.u32.totalorder %s3426_s10, %s3833_s7 }
  0x3d   :  { %p3432_p12 = pnand %p3430_p11, %p3427_p10 }
  0x3f   :  { %3435 = shalt.err (!%p3432_p12)
}
  0x40   :  { %s3436_s5 = scalar_lea.vmem %s104_s29, 1024  ;;  %p3441_p0 = scmp.lt.s32.totalorder %s104_s29, %s104_s29 }
  0x41   :  { %p3437_p13 = scmp.ne.s32.totalorder %s104_s29, %s3436_s5  ;;  %p3442_p1 = scmp.lt.s32.totalorder %s3436_s5, %s3436_s5 }
  0x43   :  { %p3443_p2 = por %p3442_p1, %p3441_p0 }
  0x45   :  { %p3444_p3 = pnand %p3443_p2, %p3437_p13 }
  0x47   :  { %3447 = shalt.err (!%p3444_p3)
}
  0x48   :  { %109 = dma.hbm_to_vmem [thread:$0]  %s3833_s7, 1024, %s104_s29, [#allocation15], %s3599_s3, %s3599_s3, %s3600_s24  }
  0x49   :  { %s3448_s21 = scalar_lea.hbm %s3826_s0, 1792 }
  0x4a   :  { %p3449_p4 = scmp.ne.s32.totalorder %s3826_s0, %s3448_s21  ;;  %p3452_p5 = scmp.lt.u32.totalorder %s3448_s21, %s3826_s0 }
  0x4c   :  { %p3454_p6 = pnand %p3452_p5, %p3449_p4 }
  0x4e   :  { %3457 = shalt.err (!%p3454_p6)
}
  0x4f   :  { %s3458_s27 = scalar_lea.vmem %s26_s11, 1792  ;;  %p3463_p8 = scmp.lt.s32.totalorder %s26_s11, %s26_s11 }
  0x50   :  { %p3459_p7 = scmp.ne.s32.totalorder %s26_s11, %s3458_s27  ;;  %p3464_p9 = scmp.lt.s32.totalorder %s3458_s27, %s3458_s27 }
  0x52   :  { %p3465_p10 = por %p3464_p9, %p3463_p8 }
  0x54   :  { %p3466_p11 = pnand %p3465_p10, %p3459_p7 }
  0x56   :  { %3469 = shalt.err (!%p3466_p11)
}
  0x57   :  { %s3603_s7 = smov 896   ;;  %s3604_s28 = smov 56  }
  0x58   :  { %31 = dma.hbm_to_vmem [thread:$0]  %s3826_s0, 1792, %s26_s11, [#allocation3], %s3603_s7, %s3603_s7, %s3604_s28  }
  0x59   :  { %s3605_s12 = smov [#allocation7]   ;;  %s3606_s10 = smov [#allocation10]  }
  0x5a   :  { %s50_s1 = sshll.u32 %s3605_s12, 4  ;;  %s72_s13 = sshll.u32 %s3606_s10, 4  ;;  %s51_s1 = int_to_ptr.vmem [resolvable:$true] %s50_s1  ;;  %s73_s13 = int_to_ptr.vmem [resolvable:$true] %s72_s13 }
  0x5b   :  { %s3470_s17 = scalar_lea.hbm %s3828_s2, 64 }
  0x5c   :  { %p3471_p12 = scmp.ne.s32.totalorder %s3828_s2, %s3470_s17  ;;  %p3474_p13 = scmp.lt.u32.totalorder %s3470_s17, %s3828_s2 }
  0x5e   :  { %p3476_p0 = pnand %p3474_p13, %p3471_p12 }
  0x60   :  { %3479 = shalt.err (!%p3476_p0)
}
  0x61   :  { %s3480_s0 = scalar_lea.vmem %s51_s1, 64  ;;  %p3485_p2 = scmp.lt.s32.totalorder %s51_s1, %s51_s1 }
  0x62   :  { %p3481_p1 = scmp.ne.s32.totalorder %s51_s1, %s3480_s0  ;;  %p3486_p3 = scmp.lt.s32.totalorder %s3480_s0, %s3480_s0 }
  0x64   :  { %p3487_p4 = por %p3486_p3, %p3485_p2 }
  0x66   :  { %p3488_p5 = pnand %p3487_p4, %p3481_p1 }
  0x68   :  { %3491 = shalt.err (!%p3488_p5)
}
  0x69   :  { %53 = dma.hbm_to_vmem [thread:$0]  %s3828_s2, 64, %s51_s1, [#allocation6]  }
  0x6a   :  { %s3492_s23 = scalar_lea.hbm %s3830_s4, 32 }
  0x6b   :  { %p3493_p6 = scmp.ne.s32.totalorder %s3830_s4, %s3492_s23  ;;  %p3496_p7 = scmp.lt.u32.totalorder %s3492_s23, %s3830_s4 }
  0x6d   :  { %p3498_p8 = pnand %p3496_p7, %p3493_p6 }
  0x6f   :  { %3501 = shalt.err (!%p3498_p8)
}
  0x70   :  { %s3502_s28 = scalar_lea.vmem %s73_s13, 32  ;;  %p3507_p10 = scmp.lt.s32.totalorder %s73_s13, %s73_s13 }
  0x71   :  { %p3503_p9 = scmp.ne.s32.totalorder %s73_s13, %s3502_s28  ;;  %p3508_p11 = scmp.lt.s32.totalorder %s3502_s28, %s3502_s28 }
  0x73   :  { %p3509_p12 = por %p3508_p11, %p3507_p10 }
  0x75   :  { %p3510_p13 = pnand %p3509_p12, %p3503_p9 }
  0x77   :  { %3513 = shalt.err (!%p3510_p13)
}
  0x78   :  { %75 = dma.hbm_to_vmem [thread:$0]  %s3830_s4, 32, %s73_s13, [#allocation9]  }
  0x79   :  { %s3607_s30 = smov [#allocation13]   ;;  %s3608_s1 = smov [#allocation16]  }
  0x7a   :  { %s94_s12 = sshll.u32 %s3607_s30, 4  ;;  %s116_s10 = sshll.u32 %s3608_s1, 4  ;;  %s95_s12 = int_to_ptr.vmem [resolvable:$true] %s94_s12  ;;  %s117_s10 = int_to_ptr.vmem [resolvable:$true] %s116_s10 }
  0x7b   :  { %s3514_s17 = scalar_lea.hbm %s3832_s6, 16 }
  0x7c   :  { %p3515_p0 = scmp.ne.s32.totalorder %s3832_s6, %s3514_s17  ;;  %p3518_p1 = scmp.lt.u32.totalorder %s3514_s17, %s3832_s6 }
  0x7e   :  { %p3520_p2 = pnand %p3518_p1, %p3515_p0 }
  0x80   :  { %3523 = shalt.err (!%p3520_p2)
}
  0x81   :  { %s3524_s4 = scalar_lea.vmem %s95_s12, 16  ;;  %s3528_s13 = scalar_lea.vmem %s95_s12, 32 }
  0x82   :  { %p3525_p3 = scmp.ne.s32.totalorder %s95_s12, %s3524_s4  ;;  %p3529_p4 = scmp.lt.s32.totalorder %s95_s12, %s95_s12 }
  0x83   :  { %p3530_p5 = scmp.lt.s32.totalorder %s3528_s13, %s3524_s4 }
  0x85   :  { %p3531_p6 = por %p3530_p5, %p3529_p4 }
  0x87   :  { %p3532_p7 = pnand %p3531_p6, %p3525_p3 }
  0x89   :  { %3535 = shalt.err (!%p3532_p7)
}
  0x8a   :  { %97 = dma.hbm_to_vmem [thread:$0]  %s3832_s6, 16, %s95_s12, [#allocation12]  }
  0x8b   :  { %s3536_s22 = scalar_lea.hbm %s3834_s8, 16 }
  0x8c   :  { %p3537_p8 = scmp.ne.s32.totalorder %s3834_s8, %s3536_s22  ;;  %p3540_p9 = scmp.lt.u32.totalorder %s3536_s22, %s3834_s8 }
  0x8e   :  { %p3542_p10 = pnand %p3540_p9, %p3537_p8 }
  0x90   :  { %3545 = shalt.err (!%p3542_p10)
}
  0x91   :  { %s3546_s7 = scalar_lea.vmem %s117_s10, 16  ;;  %s3550_s28 = scalar_lea.vmem %s117_s10, 32 }
  0x92   :  { %p3547_p11 = scmp.ne.s32.totalorder %s117_s10, %s3546_s7  ;;  %p3551_p12 = scmp.lt.s32.totalorder %s117_s10, %s117_s10 }
  0x93   :  { %p3552_p13 = scmp.lt.s32.totalorder %s3550_s28, %s3546_s7 }
  0x95   :  { %p3553_p0 = por %p3552_p13, %p3551_p12 }
  0x97   :  { %p3554_p1 = pnand %p3553_p0, %p3547_p11 }
  0x99   :  { %3557 = shalt.err (!%p3554_p1)
}
  0x9a   :  { %119 = dma.hbm_to_vmem [thread:$0]  %s3834_s8, 16, %s117_s10, [#allocation15]  }
  0x9b   :  { %3580 = dma.done.wait [#allocation3], 1792  }
  0x9c   :  { %3581 = vsyncadd [#allocation3], 4294965504 }
  0x9d   :  { %3582 = dma.done.wait [#allocation6], 25152  }
  0x9e   :  { %3583 = vsyncadd [#allocation6], 4294942144 }
  0x9f   :  { %3584 = dma.done.wait [#allocation9], 8224  }
  0xa0   :  { %3585 = vsyncadd [#allocation9], 4294959072 }
  0xa1   :  { %3586 = dma.done.wait [#allocation12], 2064  }
  0xa2   :  { %3587 = vsyncadd [#allocation12], 4294965232 }
  0xa3   :  { %3588 = dma.done.wait [#allocation15], 1040  }
  0xa4   :  { %3589 = vsyncadd [#allocation15], 4294966256  ;;  %v3609_v0 = vmov 0   ;;  %v2946_v1 = vld [vmem:[#allocation5 + $0x4] ss:$16 sps:$4 sm:$0xff]   ;;  %v161_v10 = vld [vmem:[#allocation2 + $0x68] sm:$0xff] }
  0xa5   :  { %1532 = vmatprep.mubr.bf16.mxu1 %v3609_v0  ;;  %v2948_v2 = vld [vmem:[#allocation5 + $0x604] ss:$16 sps:$4 sm:$0xff]   ;;  %1371 = vmatprep.subr.bf16.mxu0 %v2946_v1  ;;  %v2950_v3 = vld [vmem:[#allocation5] ss:$16 sps:$4 sm:$0xff]   ;;  %v2954_v6 = vld [vmem:[#allocation5 + $0x8] ss:$16 sps:$4 sm:$0xff]  }
  0xa6   :  { %v2951_v4 = vld [vmem:[#allocation5 + $0x600] ss:$16 sps:$4 sm:$0xff]   ;;  %1500 = vmatprep.subr.bf16.mxu1 %v2948_v2  ;;  %v2952_v5 = vld [vmem:[#allocation5 + $0x24] ss:$16 sps:$4 sm:$0xff]   ;;  %1372 = vmatpush1.bf16.msra.mxu0 %v2950_v3  ;;  %v2956_v7 = vld [vmem:[#allocation5 + $0xc] ss:$16 sps:$4 sm:$0xff]  }
  0xa7   :  { %1501 = vmatpush1.bf16.msra.mxu1 %v2951_v4  ;;  %1373 = vmatprep.subr.bf16.mxu0 %v2952_v5  ;;  %v2957_v8 = vld [vmem:[#allocation5 + $0x20] ss:$16 sps:$4 sm:$0xff]   ;;  %vm1367_vm0 = vcmask 130048   ;;  %v2958_v12 = vld [vmem:[#allocation5 + $0x44] ss:$16 sps:$4 sm:$0xff]   ;;  %v149_v51 = vld [vmem:[#allocation2 + $0x8] sm:$0xff] }
  0xa8   :  { %v154_v9 = vld [vmem:[#allocation2 + $0x30] sm:$0xff]  ;;  %1543 = vmatprep.subr.bf16.mxu1 %v2956_v7  ;;  %v2960_v13 = vld [vmem:[#allocation5 + $0x28] ss:$16 sps:$4 sm:$0xff]   ;;  %v2962_v14 = vld [vmem:[#allocation5 + $0x2c] ss:$16 sps:$4 sm:$0xff]   ;;  %vm3611_vm1 = vmmov 0  }
  0xa9   :  { %v3778_v11 = vpack.c.bf16 %v161_v10, %v154_v9  ;;  %v2963_v15 = vld [vmem:[#allocation5 + $0x40] ss:$16 sps:$4 sm:$0xff]   ;;  %v2964_v16 = vld [vmem:[#allocation5 + $0x64] ss:$16 sps:$4 sm:$0xff]   ;;  %v2968_v17 = vld [vmem:[#allocation5 + $0x4c] ss:$16 sps:$4 sm:$0xff]  }
  0xaa   :  { %1374 = vmatpush1.bf16.msra.mxu0 %v2957_v8  ;;  %v2969_v18 = vld [vmem:[#allocation5 + $0x60] ss:$16 sps:$4 sm:$0xff]   ;;  %v2966_v19 = vld [vmem:[#allocation5 + $0x48] ss:$16 sps:$4 sm:$0xff]   ;;  %v2970_v20 = vld [vmem:[#allocation5 + $0x84] ss:$16 sps:$4 sm:$0xff]  }
  0xab   :  { %2733 = vmatmul.mubr.msk.bf16.vlgmr.msra.gmra.mrb[0].mxu1 %vm1367_vm0, %v3778_v11  ;;  %1375 = vmatprep.subr.bf16.mxu0 %v2958_v12  ;;  %v2974_v21 = vld [vmem:[#allocation5 + $0x6c] ss:$16 sps:$4 sm:$0xff]   ;;  %v2972_v22 = vld [vmem:[#allocation5 + $0x68] ss:$16 sps:$4 sm:$0xff]   ;;  %v2975_v23 = vld [vmem:[#allocation5 + $0x80] ss:$16 sps:$4 sm:$0xff]  }
  0xac   :  { %1544 = vmatpush1.bf16.msra.mxu1 %v2954_v6  ;;  %v2976_v24 = vld [vmem:[#allocation5 + $0xa4] ss:$16 sps:$4 sm:$0xff]   ;;  %v2980_v25 = vld [vmem:[#allocation5 + $0x8c] ss:$16 sps:$4 sm:$0xff]   ;;  %v2981_v26 = vld [vmem:[#allocation5 + $0xa0] ss:$16 sps:$4 sm:$0xff]  }
  0xad   :  { %1545 = vmatprep.subr.bf16.mxu1 %v2962_v14  ;;  %v2978_v27 = vld [vmem:[#allocation5 + $0x88] ss:$16 sps:$4 sm:$0xff]   ;;  %v2982_v28 = vld [vmem:[#allocation5 + $0xc4] ss:$16 sps:$4 sm:$0xff]   ;;  %v2986_v29 = vld [vmem:[#allocation5 + $0xac] ss:$16 sps:$4 sm:$0xff]  }
  0xae   :  { %1376 = vmatpush1.bf16.msra.mxu0 %v2963_v15  ;;  %v2984_v30 = vld [vmem:[#allocation5 + $0xa8] ss:$16 sps:$4 sm:$0xff]   ;;  %v2987_v31 = vld [vmem:[#allocation5 + $0xc0] ss:$16 sps:$4 sm:$0xff]   ;;  %v2988_v32 = vld [vmem:[#allocation5 + $0xe4] ss:$16 sps:$4 sm:$0xff]  }
  0xaf   :  { %1377 = vmatprep.subr.bf16.mxu0 %v2964_v16  ;;  %v2992_v33 = vld [vmem:[#allocation5 + $0xcc] ss:$16 sps:$4 sm:$0xff]   ;;  %v2993_v34 = vld [vmem:[#allocation5 + $0xe0] ss:$16 sps:$4 sm:$0xff]   ;;  %v2990_v35 = vld [vmem:[#allocation5 + $0xc8] ss:$16 sps:$4 sm:$0xff]  }
  0xb0   :  { %1546 = vmatpush1.bf16.msra.mxu1 %v2960_v13  ;;  %v2994_v36 = vld [vmem:[#allocation5 + $0x104] ss:$16 sps:$4 sm:$0xff]   ;;  %v2998_v37 = vld [vmem:[#allocation5 + $0xec] ss:$16 sps:$4 sm:$0xff]   ;;  %v2996_v38 = vld [vmem:[#allocation5 + $0xe8] ss:$16 sps:$4 sm:$0xff]  }
  0xb1   :  { %1547 = vmatprep.subr.bf16.mxu1 %v2968_v17  ;;  %v2999_v39 = vld [vmem:[#allocation5 + $0x100] ss:$16 sps:$4 sm:$0xff]   ;;  %v3000_v40 = vld [vmem:[#allocation5 + $0x124] ss:$16 sps:$4 sm:$0xff]   ;;  %v3004_v41 = vld [vmem:[#allocation5 + $0x10c] ss:$16 sps:$4 sm:$0xff]  }
  0xb2   :  { %1378 = vmatpush1.bf16.msra.mxu0 %v2969_v18  ;;  %v3005_v42 = vld [vmem:[#allocation5 + $0x120] ss:$16 sps:$4 sm:$0xff]   ;;  %v3002_v43 = vld [vmem:[#allocation5 + $0x108] ss:$16 sps:$4 sm:$0xff]   ;;  %v3006_v44 = vld [vmem:[#allocation5 + $0x144] ss:$16 sps:$4 sm:$0xff]  }
  0xb3   :  { %1379 = vmatprep.subr.bf16.mxu0 %v2970_v20  ;;  %v3010_v45 = vld [vmem:[#allocation5 + $0x12c] ss:$16 sps:$4 sm:$0xff]   ;;  %v3008_v46 = vld [vmem:[#allocation5 + $0x128] ss:$16 sps:$4 sm:$0xff]   ;;  %v3011_v47 = vld [vmem:[#allocation5 + $0x140] ss:$16 sps:$4 sm:$0xff]  }
  0xb4   :  { %1548 = vmatpush1.bf16.msra.mxu1 %v2966_v19  ;;  %v3012_v48 = vld [vmem:[#allocation5 + $0x164] ss:$16 sps:$4 sm:$0xff]   ;;  %v3016_v49 = vld [vmem:[#allocation5 + $0x14c] ss:$16 sps:$4 sm:$0xff]   ;;  %v3014_v50 = vld [vmem:[#allocation5 + $0x148] ss:$16 sps:$4 sm:$0xff]  }
  0xb5   :  { %1549 = vmatprep.subr.bf16.mxu1 %v2974_v21  ;;  %v156_v52 = vld [vmem:[#allocation2 + $0x40] sm:$0xff]  ;;  %v3022_v56 = vld [vmem:[#allocation5 + $0x16c] ss:$16 sps:$4 sm:$0xff]   ;;  %v3020_v58 = vld [vmem:[#allocation5 + $0x168] ss:$16 sps:$4 sm:$0xff]   ;;  %s3612_s8 = smov [#allocation17]  }
  0xb6   :  { %1380 = vmatpush1.bf16.msra.mxu0 %v2975_v23  ;;  %v3017_v53 = vld [vmem:[#allocation5 + $0x160] ss:$16 sps:$4 sm:$0xff]   ;;  %v163_v54 = vpack.c.bf16 %v156_v52, %v149_v51  ;;  %v3018_v55 = vld [vmem:[#allocation5 + $0x184] ss:$16 sps:$4 sm:$0xff]   ;;  %v3028_v60 = vld [vmem:[#allocation5 + $0x18c] ss:$16 sps:$4 sm:$0xff]  }
  0xb7   :  { %1381 = vmatprep.subr.bf16.mxu0 %v2976_v24  ;;  %v3023_v57 = vld [vmem:[#allocation5 + $0x180] ss:$16 sps:$4 sm:$0xff]   ;;  %v3024_v59 = vld [vmem:[#allocation5 + $0x1a4] ss:$16 sps:$4 sm:$0xff]   ;;  %v3026_v62 = vld [vmem:[#allocation5 + $0x188] ss:$16 sps:$4 sm:$0xff]  }
  0xb8   :  { %1550 = vmatpush1.bf16.msra.mxu1 %v2972_v22  ;;  %1403 = vmatprep.mubr.bf16.mxu0 %v163_v54  ;;  %v3029_v61 = vld [vmem:[#allocation5 + $0x1a0] ss:$16 sps:$4 sm:$0xff]   ;;  %v3030_v63 = vld [vmem:[#allocation5 + $0x1c4] ss:$16 sps:$4 sm:$0xff]   ;;  %v3034_v1 = vld [vmem:[#allocation5 + $0x1ac] ss:$16 sps:$4 sm:$0xff]  }
  0xb9   :  { %1551 = vmatprep.subr.bf16.mxu1 %v2980_v25  ;;  %1575 = vmatprep.mubr.bf16.mxu1 %v163_v54  ;;  %v3035_v2 = vld [vmem:[#allocation5 + $0x1c0] ss:$16 sps:$4 sm:$0xff]   ;;  %v3032_v3 = vld [vmem:[#allocation5 + $0x1a8] ss:$16 sps:$4 sm:$0xff]   ;;  %v3036_v4 = vld [vmem:[#allocation5 + $0x1e4] ss:$16 sps:$4 sm:$0xff]  }
  0xba   :  { %1382 = vmatpush1.bf16.msra.mxu0 %v2981_v26  ;;  %v3040_v5 = vld [vmem:[#allocation5 + $0x1cc] ss:$16 sps:$4 sm:$0xff]   ;;  %v3041_v6 = vld [vmem:[#allocation5 + $0x1e0] ss:$16 sps:$4 sm:$0xff]   ;;  %v3038_v9 = vld [vmem:[#allocation5 + $0x1c8] ss:$16 sps:$4 sm:$0xff]  }
  0xbb   :  { %1383 = vmatprep.subr.bf16.mxu0 %v2982_v28  ;;  %v148_v7 = vld [vmem:[#allocation2] sm:$0xff]  ;;  %v155_v8 = vld [vmem:[#allocation2 + $0x38] sm:$0xff]  ;;  %s2521_s29 = sshll.u32 %s3612_s8, 4  ;;  %s2522_s29 = int_to_ptr.vmem [resolvable:$true] %s2521_s29 }
  0xbc   :  { %1552 = vmatpush1.bf16.msra.mxu1 %v2978_v27  ;;  %v3044_v10 = vld [vmem:[#allocation5 + $0x204] ss:$16 sps:$4 sm:$0xff]   ;;  %v3047_v12 = vld [vmem:[#allocation5 + $0x1ec] ss:$16 sps:$4 sm:$0xff]   ;;  %v162_v13 = vpack.c.bf16 %v155_v8, %v148_v7  ;;  %v3042_v14 = vld [vmem:[#allocation5 + $0x200] ss:$16 sps:$4 sm:$0xff]   ;;  %p3563_p3 = scmp.lt.s32.totalorder %s2522_s29, %s2522_s29 }
  0xbd   :  { %1553 = vmatprep.subr.bf16.mxu1 %v2986_v29  ;;  %v3045_v15 = vld [vmem:[#allocation5 + $0x1e8] ss:$16 sps:$4 sm:$0xff]   ;;  %v3050_v16 = vld [vmem:[#allocation5 + $0x224] ss:$16 sps:$4 sm:$0xff]   ;;  %v3053_v17 = vld [vmem:[#allocation5 + $0x20c] ss:$16 sps:$4 sm:$0xff]  }
  0xbe   :  { %1384 = vmatpush1.bf16.msra.mxu0 %v2987_v31  ;;  %v3048_v18 = vld [vmem:[#allocation5 + $0x220] ss:$16 sps:$4 sm:$0xff]   ;;  %v3051_v19 = vld [vmem:[#allocation5 + $0x208] ss:$16 sps:$4 sm:$0xff]   ;;  %v3056_v20 = vld [vmem:[#allocation5 + $0x244] ss:$16 sps:$4 sm:$0xff]  }
  0xbf   :  { %1385 = vmatprep.subr.bf16.mxu0 %v2988_v32  ;;  %v3059_v21 = vld [vmem:[#allocation5 + $0x22c] ss:$16 sps:$4 sm:$0xff]   ;;  %v3054_v22 = vld [vmem:[#allocation5 + $0x240] ss:$16 sps:$4 sm:$0xff]   ;;  %v3057_v23 = vld [vmem:[#allocation5 + $0x228] ss:$16 sps:$4 sm:$0xff]  }
  0xc0   :  { %1554 = vmatpush1.bf16.msra.mxu1 %v2984_v30  ;;  %v3062_v24 = vld [vmem:[#allocation5 + $0x264] ss:$16 sps:$4 sm:$0xff]   ;;  %v3065_v25 = vld [vmem:[#allocation5 + $0x24c] ss:$16 sps:$4 sm:$0xff]   ;;  %v3060_v26 = vld [vmem:[#allocation5 + $0x260] ss:$16 sps:$4 sm:$0xff]  }
  0xc1   :  { %1555 = vmatprep.subr.bf16.mxu1 %v2992_v33  ;;  %v3063_v27 = vld [vmem:[#allocation5 + $0x248] ss:$16 sps:$4 sm:$0xff]   ;;  %v3068_v28 = vld [vmem:[#allocation5 + $0x284] ss:$16 sps:$4 sm:$0xff]   ;;  %v3071_v29 = vld [vmem:[#allocation5 + $0x26c] ss:$16 sps:$4 sm:$0xff]  }
  0xc2   :  { %1386 = vmatpush1.bf16.msra.mxu0 %v2993_v34  ;;  %v3066_v30 = vld [vmem:[#allocation5 + $0x280] ss:$16 sps:$4 sm:$0xff]   ;;  %v3069_v31 = vld [vmem:[#allocation5 + $0x268] ss:$16 sps:$4 sm:$0xff]   ;;  %v3074_v32 = vld [vmem:[#allocation5 + $0x2a4] ss:$16 sps:$4 sm:$0xff]  }
  0xc3   :  { %1387 = vmatprep.subr.bf16.mxu0 %v2994_v36  ;;  %v3077_v33 = vld [vmem:[#allocation5 + $0x28c] ss:$16 sps:$4 sm:$0xff]   ;;  %v3072_v34 = vld [vmem:[#allocation5 + $0x2a0] ss:$16 sps:$4 sm:$0xff]   ;;  %v3080_v36 = vld [vmem:[#allocation5 + $0x2c4] ss:$16 sps:$4 sm:$0xff]  }
  0xc4   :  { %1556 = vmatpush1.bf16.msra.mxu1 %v2990_v35  ;;  %v3075_v35 = vld [vmem:[#allocation5 + $0x288] ss:$16 sps:$4 sm:$0xff]   ;;  %v3098_v51 = vld [vmem:[#allocation5 + $0x324] ss:$16 sps:$4 sm:$0xff]   ;;  %v3101_v52 = vld [vmem:[#allocation5 + $0x30c] ss:$16 sps:$4 sm:$0xff]  }
  0xc5   :  { %1557 = vmatprep.subr.bf16.mxu1 %v2998_v37  ;;  %v3083_v37 = vld [vmem:[#allocation5 + $0x2ac] ss:$16 sps:$4 sm:$0xff]   ;;  %v3099_v54 = vld [vmem:[#allocation5 + $0x308] ss:$16 sps:$4 sm:$0xff]   ;;  %v3128_v8 = vld [vmem:[#allocation5 + $0x3c4] ss:$16 sps:$4 sm:$0xff]  }
  0xc6   :  { %1388 = vmatpush1.bf16.msra.mxu0 %v2999_v39  ;;  %v151_v39 = vld [vmem:[#allocation2 + $0x18] sm:$0xff]  ;;  %s3558_s30 = scalar_lea.vmem %s2522_s29, 128 }
  0xc7   :  { %1389 = vmatprep.subr.bf16.mxu0 %v3000_v40  ;;  %v158_v40 = vld [vmem:[#allocation2 + $0x50] sm:$0xff]  ;;  %v3123_v7 = vld [vmem:[#allocation5 + $0x388] ss:$16 sps:$4 sm:$0xff]   ;;  %p3559_p2 = scmp.ne.s32.totalorder %s2522_s29, %s3558_s30  ;;  %p3564_p4 = scmp.lt.s32.totalorder %s3558_s30, %s3558_s30 }
  0xc8   :  { %1558 = vmatpush1.bf16.msra.mxu1 %v2996_v38  ;;  %v3078_v38 = vld [vmem:[#allocation5 + $0x2c0] ss:$16 sps:$4 sm:$0xff]  }
  0xc9   :  { %1559 = vmatprep.subr.bf16.mxu1 %v3004_v41  ;;  %v3081_v41 = vld [vmem:[#allocation5 + $0x2a8] ss:$16 sps:$4 sm:$0xff]   ;;  %p3565_p5 = por %p3564_p4, %p3563_p3 }
  0xca   :  { %1390 = vmatpush1.bf16.msra.mxu0 %v3005_v42  ;;  %v165_v42 = vpack.c.bf16 %v158_v40, %v151_v39  ;;  %v3164_v39 = vld [vmem:[#allocation5 + $0x484] ss:$16 sps:$4 sm:$0xff]   ;;  %v3167_v40 = vld [vmem:[#allocation5 + $0x46c] ss:$16 sps:$4 sm:$0xff]  }
  0xcb   :  { %1391 = vmatprep.subr.bf16.mxu0 %v3006_v44  ;;  %v3089_v44 = vld [vmem:[#allocation5 + $0x2cc] ss:$16 sps:$4 sm:$0xff]   ;;  %p3566_p6 = pnand %p3565_p5, %p3559_p2 }
  0xcc   :  { %1560 = vmatpush1.bf16.msra.mxu1 %v3002_v43  ;;  %v3086_v43 = vld [vmem:[#allocation5 + $0x2e4] ss:$16 sps:$4 sm:$0xff]  }
  0xcd   :  { %1561 = vmatprep.subr.bf16.mxu1 %v3010_v45  ;;  %v3084_v45 = vld [vmem:[#allocation5 + $0x2e0] ss:$16 sps:$4 sm:$0xff]  }
  0xce   :  { %1392 = vmatpush1.bf16.msra.mxu0 %v3011_v47  ;;  %v3092_v47 = vld [vmem:[#allocation5 + $0x304] ss:$16 sps:$4 sm:$0xff]  }
  0xcf   :  { %1393 = vmatprep.subr.bf16.mxu0 %v3012_v48  ;;  %v3095_v48 = vld [vmem:[#allocation5 + $0x2ec] ss:$16 sps:$4 sm:$0xff]  }
  0xd0   :  { %1562 = vmatpush1.bf16.msra.mxu1 %v3008_v46  ;;  %v3087_v46 = vld [vmem:[#allocation5 + $0x2c8] ss:$16 sps:$4 sm:$0xff]  }
  0xd1   :  { %1563 = vmatprep.subr.bf16.mxu1 %v3016_v49  ;;  %v3090_v49 = vld [vmem:[#allocation5 + $0x300] ss:$16 sps:$4 sm:$0xff]  }
  0xd2   :  { %1394 = vmatpush1.bf16.msra.mxu0 %v3017_v53  ;;  %v3096_v53 = vld [vmem:[#allocation5 + $0x320] ss:$16 sps:$4 sm:$0xff]  }
  0xd3   :  { %1395 = vmatprep.subr.bf16.mxu0 %v3018_v55  ;;  %v3104_v55 = vld [vmem:[#allocation5 + $0x344] ss:$16 sps:$4 sm:$0xff]  }
  0xd4   :  { %1564 = vmatpush1.bf16.msra.mxu1 %v3014_v50  ;;  %v3093_v50 = vld [vmem:[#allocation5 + $0x2e8] ss:$16 sps:$4 sm:$0xff]  }
  0xd5   :  { %1565 = vmatprep.subr.bf16.mxu1 %v3022_v56  ;;  %v3107_v56 = vld [vmem:[#allocation5 + $0x32c] ss:$16 sps:$4 sm:$0xff]  }
  0xd6   :  { %1396 = vmatpush1.bf16.msra.mxu0 %v3023_v57  ;;  %v3102_v57 = vld [vmem:[#allocation5 + $0x340] ss:$16 sps:$4 sm:$0xff]  }
  0xd7   :  { %1397 = vmatprep.subr.bf16.mxu0 %v3024_v59  ;;  %v3110_v59 = vld [vmem:[#allocation5 + $0x364] ss:$16 sps:$4 sm:$0xff]  }
  0xd8   :  { %1566 = vmatpush1.bf16.msra.mxu1 %v3020_v58  ;;  %v3105_v58 = vld [vmem:[#allocation5 + $0x328] ss:$16 sps:$4 sm:$0xff]  }
  0xd9   :  { %1567 = vmatprep.subr.bf16.mxu1 %v3028_v60  ;;  %v3113_v60 = vld [vmem:[#allocation5 + $0x34c] ss:$16 sps:$4 sm:$0xff]  }
  0xda   :  { %1398 = vmatpush1.bf16.msra.mxu0 %v3029_v61  ;;  %v3108_v61 = vld [vmem:[#allocation5 + $0x360] ss:$16 sps:$4 sm:$0xff]  }
  0xdb   :  { %1399 = vmatprep.subr.bf16.mxu0 %v3030_v63  ;;  %v3116_v63 = vld [vmem:[#allocation5 + $0x384] ss:$16 sps:$4 sm:$0xff]  }
  0xdc   :  { %1568 = vmatpush1.bf16.msra.mxu1 %v3026_v62  ;;  %v3111_v62 = vld [vmem:[#allocation5 + $0x348] ss:$16 sps:$4 sm:$0xff]  }
  0xdd   :  { %1569 = vmatprep.subr.bf16.mxu1 %v3034_v1  ;;  %v3119_v1 = vld [vmem:[#allocation5 + $0x36c] ss:$16 sps:$4 sm:$0xff]  }
  0xde   :  { %1400 = vmatpush1.bf16.msra.mxu0 %v3035_v2  ;;  %v3114_v2 = vld [vmem:[#allocation5 + $0x380] ss:$16 sps:$4 sm:$0xff]  }
  0xdf   :  { %1401 = vmatprep.subr.bf16.mxu0 %v3036_v4  ;;  %v3122_v4 = vld [vmem:[#allocation5 + $0x3a4] ss:$16 sps:$4 sm:$0xff]  }
  0xe0   :  { %1570 = vmatpush1.bf16.msra.mxu1 %v3032_v3  ;;  %v3117_v3 = vld [vmem:[#allocation5 + $0x368] ss:$16 sps:$4 sm:$0xff]  }
  0xe1   :  { %1571 = vmatprep.subr.bf16.mxu1 %v3040_v5  ;;  %v3125_v5 = vld [vmem:[#allocation5 + $0x38c] ss:$16 sps:$4 sm:$0xff]  }
  0xe2   :  { %1402 = vmatpush1.bf16.msra.mxu0 %v3041_v6  ;;  %v3120_v6 = vld [vmem:[#allocation5 + $0x3a0] ss:$16 sps:$4 sm:$0xff]  }
  0xe3   :  { %1414 = vmatprep.subr.bf16.mxu0 %v3044_v10  ;;  %v3126_v10 = vld [vmem:[#allocation5 + $0x3c0] ss:$16 sps:$4 sm:$0xff]  }
  0xe4   :  { %1572 = vmatpush1.bf16.msra.mxu1 %v3038_v9  ;;  %v3131_v9 = vld [vmem:[#allocation5 + $0x3ac] ss:$16 sps:$4 sm:$0xff]  }
  0xe5   :  { %1573 = vmatprep.subr.bf16.mxu1 %v3047_v12  ;;  %1404 = vmatmul.mubr.bf16.vlgmr.msra.gmra.mrb[0].mxu0 %v162_v13  ;;  %v3129_v12 = vld [vmem:[#allocation5 + $0x3a8] ss:$16 sps:$4 sm:$0xff]  }
  0xe6   :  { %1415 = vmatpush1.bf16.msra.mxu0 %v3042_v14  ;;  %1446 = vmatprep.mubr.bf16.mxu0 %v165_v42  ;;  %v3137_v14 = vld [vmem:[#allocation5 + $0x3cc] ss:$16 sps:$4 sm:$0xff]  }
  0xe7   :  { %1416 = vmatprep.subr.bf16.mxu0 %v3050_v16  ;;  %v150_v16 = vld [vmem:[#allocation2 + $0x10] sm:$0xff] }
  0xe8   :  { %1574 = vmatpush1.bf16.msra.mxu1 %v3045_v15  ;;  %v3132_v15 = vld [vmem:[#allocation5 + $0x3e0] ss:$16 sps:$4 sm:$0xff]  }
  0xe9   :  { %1586 = vmatprep.subr.bf16.mxu1 %v3053_v17  ;;  %v157_v17 = vld [vmem:[#allocation2 + $0x48] sm:$0xff] }
  0xea   :  { %1417 = vmatpush1.bf16.msra.mxu0 %v3048_v18  ;;  %v3135_v18 = vld [vmem:[#allocation5 + $0x3c8] ss:$16 sps:$4 sm:$0xff]  }
  0xeb   :  { %1576 = vmatmul.mubr.bf16.vlgmr.msra.gmra.mrb[4].mxu1 %v162_v13  ;;  %1418 = vmatprep.subr.bf16.mxu0 %v3056_v20  ;;  %v3134_v13 = vld [vmem:[#allocation5 + $0x3e4] ss:$16 sps:$4 sm:$0xff]   ;;  %v3143_v20 = vld [vmem:[#allocation5 + $0x3ec] ss:$16 sps:$4 sm:$0xff]  }
  0xec   :  { %1587 = vmatpush1.bf16.msra.mxu1 %v3051_v19  ;;  %1618 = vmatprep.mubr.bf16.mxu1 %v165_v42  ;;  %v3140_v19 = vld [vmem:[#allocation5 + $0x404] ss:$16 sps:$4 sm:$0xff]   ;;  %v3165_v42 = vld [vmem:[#allocation5 + $0x468] ss:$16 sps:$4 sm:$0xff]  }
  0xed   :  { %1588 = vmatprep.subr.bf16.mxu1 %v3059_v21  ;;  %v164_v21 = vpack.c.bf16 %v157_v17, %v150_v16  ;;  %v3219_v16 = vld [vmem:[#allocation5 + $0x588] ss:$16 sps:$4 sm:$0xff]   ;;  %v3224_v17 = vld [vmem:[#allocation5 + $0x5c4] ss:$16 sps:$4 sm:$0xff]  }
  0xee   :  { %1419 = vmatpush1.bf16.msra.mxu0 %v3054_v22  ;;  %v3138_v22 = vld [vmem:[#allocation5 + $0x400] ss:$16 sps:$4 sm:$0xff]  }
  0xef   :  { %1420 = vmatprep.subr.bf16.mxu0 %v3062_v24  ;;  %v3146_v24 = vld [vmem:[#allocation5 + $0x424] ss:$16 sps:$4 sm:$0xff]  }
  0xf0   :  { %1589 = vmatpush1.bf16.msra.mxu1 %v3057_v23  ;;  %v3141_v23 = vld [vmem:[#allocation5 + $0x3e8] ss:$16 sps:$4 sm:$0xff]  }
  0xf1   :  { %1590 = vmatprep.subr.bf16.mxu1 %v3065_v25  ;;  %v3149_v25 = vld [vmem:[#allocation5 + $0x40c] ss:$16 sps:$4 sm:$0xff]  }
  0xf2   :  { %1421 = vmatpush1.bf16.msra.mxu0 %v3060_v26  ;;  %v153_v26 = vld [vmem:[#allocation2 + $0x28] sm:$0xff] }
  0xf3   :  { %1422 = vmatprep.subr.bf16.mxu0 %v3068_v28  ;;  %v3144_v28 = vld [vmem:[#allocation5 + $0x420] ss:$16 sps:$4 sm:$0xff]  }
  0xf4   :  { %1591 = vmatpush1.bf16.msra.mxu1 %v3063_v27  ;;  %v160_v27 = vld [vmem:[#allocation2 + $0x60] sm:$0xff] }
  0xf5   :  { %1592 = vmatprep.subr.bf16.mxu1 %v3071_v29  ;;  %v167_v29 = vpack.c.bf16 %v160_v27, %v153_v26  ;;  %v3231_v26 = vld [vmem:[#allocation5 + $0x5c8] ss:$16 sps:$4 sm:$0xff]  }
  0xf6   :  { %1423 = vmatpush1.bf16.msra.mxu0 %v3066_v30  ;;  %v3147_v30 = vld [vmem:[#allocation5 + $0x408] ss:$16 sps:$4 sm:$0xff]  }
  0xf7   :  { %1424 = vmatprep.subr.bf16.mxu0 %v3074_v32  ;;  %v3155_v32 = vld [vmem:[#allocation5 + $0x42c] ss:$16 sps:$4 sm:$0xff]   ;;  %v3242_v27 = vld [vmem:[#allocation8 + $0x4] ss:$8 sps:$4 sm:$0xff]  }
  0xf8   :  { %1593 = vmatpush1.bf16.msra.mxu1 %v3069_v31  ;;  %v3152_v31 = vld [vmem:[#allocation5 + $0x444] ss:$16 sps:$4 sm:$0xff]  }
  0xf9   :  { %1594 = vmatprep.subr.bf16.mxu1 %v3077_v33  ;;  %v3150_v33 = vld [vmem:[#allocation5 + $0x440] ss:$16 sps:$4 sm:$0xff]  }
  0xfa   :  { %1425 = vmatpush1.bf16.msra.mxu0 %v3072_v34  ;;  %v3153_v34 = vld [vmem:[#allocation5 + $0x428] ss:$16 sps:$4 sm:$0xff]  }
  0xfb   :  { %1426 = vmatprep.subr.bf16.mxu0 %v3080_v36  ;;  %v3161_v36 = vld [vmem:[#allocation5 + $0x44c] ss:$16 sps:$4 sm:$0xff]  }
  0xfc   :  { %1595 = vmatpush1.bf16.msra.mxu1 %v3075_v35  ;;  %v3158_v35 = vld [vmem:[#allocation5 + $0x464] ss:$16 sps:$4 sm:$0xff]  }
  0xfd   :  { %1596 = vmatprep.subr.bf16.mxu1 %v3083_v37  ;;  %v3156_v37 = vld [vmem:[#allocation5 + $0x460] ss:$16 sps:$4 sm:$0xff]  }
  0xfe   :  { %1427 = vmatpush1.bf16.msra.mxu0 %v3078_v38  ;;  %v3159_v38 = vld [vmem:[#allocation5 + $0x448] ss:$16 sps:$4 sm:$0xff]  }
  0xff   :  { %1428 = vmatprep.subr.bf16.mxu0 %v3086_v43  ;;  %v3170_v43 = vld [vmem:[#allocation5 + $0x4a4] ss:$16 sps:$4 sm:$0xff]  }
 0x100   :  { %1597 = vmatpush1.bf16.msra.mxu1 %v3081_v41  ;;  %v3162_v41 = vld [vmem:[#allocation5 + $0x480] ss:$16 sps:$4 sm:$0xff]  }
 0x101   :  { %1598 = vmatprep.subr.bf16.mxu1 %v3089_v44  ;;  %v3173_v44 = vld [vmem:[#allocation5 + $0x48c] ss:$16 sps:$4 sm:$0xff]  }
 0x102   :  { %1429 = vmatpush1.bf16.msra.mxu0 %v3084_v45  ;;  %v3168_v45 = vld [vmem:[#allocation5 + $0x4a0] ss:$16 sps:$4 sm:$0xff]  }
 0x103   :  { %1430 = vmatprep.subr.bf16.mxu0 %v3092_v47  ;;  %v3176_v47 = vld [vmem:[#allocation5 + $0x4c4] ss:$16 sps:$4 sm:$0xff]  }
 0x104   :  { %1599 = vmatpush1.bf16.msra.mxu1 %v3087_v46  ;;  %v3171_v46 = vld [vmem:[#allocation5 + $0x488] ss:$16 sps:$4 sm:$0xff]  }
 0x105   :  { %1600 = vmatprep.subr.bf16.mxu1 %v3095_v48  ;;  %v3179_v48 = vld [vmem:[#allocation5 + $0x4ac] ss:$16 sps:$4 sm:$0xff]  }
 0x106   :  { %1431 = vmatpush1.bf16.msra.mxu0 %v3090_v49  ;;  %v3174_v49 = vld [vmem:[#allocation5 + $0x4c0] ss:$16 sps:$4 sm:$0xff]  }
 0x107   :  { %1432 = vmatprep.subr.bf16.mxu0 %v3098_v51  ;;  %v3182_v51 = vld [vmem:[#allocation5 + $0x4e4] ss:$16 sps:$4 sm:$0xff]  }
 0x108   :  { %1601 = vmatpush1.bf16.msra.mxu1 %v3093_v50  ;;  %v3177_v50 = vld [vmem:[#allocation5 + $0x4a8] ss:$16 sps:$4 sm:$0xff]  }
 0x109   :  { %1602 = vmatprep.subr.bf16.mxu1 %v3101_v52  ;;  %v3185_v52 = vld [vmem:[#allocation5 + $0x4cc] ss:$16 sps:$4 sm:$0xff]  }
 0x10a   :  { %1433 = vmatpush1.bf16.msra.mxu0 %v3096_v53  ;;  %v3180_v53 = vld [vmem:[#allocation5 + $0x4e0] ss:$16 sps:$4 sm:$0xff]  }
 0x10b   :  { %1434 = vmatprep.subr.bf16.mxu0 %v3104_v55  ;;  %v3188_v55 = vld [vmem:[#allocation5 + $0x504] ss:$16 sps:$4 sm:$0xff]  }
 0x10c   :  { %1603 = vmatpush1.bf16.msra.mxu1 %v3099_v54  ;;  %v3183_v54 = vld [vmem:[#allocation5 + $0x4c8] ss:$16 sps:$4 sm:$0xff]  }
 0x10d   :  { %1604 = vmatprep.subr.bf16.mxu1 %v3107_v56  ;;  %v3191_v56 = vld [vmem:[#allocation5 + $0x4ec] ss:$16 sps:$4 sm:$0xff]  }
 0x10e   :  { %1435 = vmatpush1.bf16.msra.mxu0 %v3102_v57  ;;  %v3186_v57 = vld [vmem:[#allocation5 + $0x500] ss:$16 sps:$4 sm:$0xff]  }
 0x10f   :  { %1436 = vmatprep.subr.bf16.mxu0 %v3110_v59  ;;  %v3194_v59 = vld [vmem:[#allocation5 + $0x524] ss:$16 sps:$4 sm:$0xff]  }
 0x110   :  { %1605 = vmatpush1.bf16.msra.mxu1 %v3105_v58  ;;  %v3189_v58 = vld [vmem:[#allocation5 + $0x4e8] ss:$16 sps:$4 sm:$0xff]  }
 0x111   :  { %1606 = vmatprep.subr.bf16.mxu1 %v3113_v60  ;;  %v3197_v60 = vld [vmem:[#allocation5 + $0x50c] ss:$16 sps:$4 sm:$0xff]  }
 0x112   :  { %1437 = vmatpush1.bf16.msra.mxu0 %v3108_v61  ;;  %v3192_v61 = vld [vmem:[#allocation5 + $0x520] ss:$16 sps:$4 sm:$0xff]  }
 0x113   :  { %1438 = vmatprep.subr.bf16.mxu0 %v3116_v63  ;;  %v3200_v63 = vld [vmem:[#allocation5 + $0x544] ss:$16 sps:$4 sm:$0xff]  }
 0x114   :  { %1607 = vmatpush1.bf16.msra.mxu1 %v3111_v62  ;;  %v3195_v62 = vld [vmem:[#allocation5 + $0x508] ss:$16 sps:$4 sm:$0xff]  }
 0x115   :  { %1608 = vmatprep.subr.bf16.mxu1 %v3119_v1  ;;  %v3203_v1 = vld [vmem:[#allocation5 + $0x52c] ss:$16 sps:$4 sm:$0xff]  }
 0x116   :  { %1439 = vmatpush1.bf16.msra.mxu0 %v3114_v2  ;;  %v3198_v2 = vld [vmem:[#allocation5 + $0x540] ss:$16 sps:$4 sm:$0xff]  }
 0x117   :  { %1440 = vmatprep.subr.bf16.mxu0 %v3122_v4  ;;  %v3206_v4 = vld [vmem:[#allocation5 + $0x564] ss:$16 sps:$4 sm:$0xff]  }
 0x118   :  { %1609 = vmatpush1.bf16.msra.mxu1 %v3117_v3  ;;  %v3201_v3 = vld [vmem:[#allocation5 + $0x528] ss:$16 sps:$4 sm:$0xff]  }
 0x119   :  { %1610 = vmatprep.subr.bf16.mxu1 %v3125_v5  ;;  %v3209_v5 = vld [vmem:[#allocation5 + $0x54c] ss:$16 sps:$4 sm:$0xff]  }
 0x11a   :  { %1441 = vmatpush1.bf16.msra.mxu0 %v3120_v6  ;;  %v3204_v6 = vld [vmem:[#allocation5 + $0x560] ss:$16 sps:$4 sm:$0xff]  }
 0x11b   :  { %1442 = vmatprep.subr.bf16.mxu0 %v3128_v8  ;;  %v3212_v8 = vld [vmem:[#allocation5 + $0x584] ss:$16 sps:$4 sm:$0xff]  }
 0x11c   :  { %1611 = vmatpush1.bf16.msra.mxu1 %v3123_v7  ;;  %v3207_v7 = vld [vmem:[#allocation5 + $0x548] ss:$16 sps:$4 sm:$0xff]  }
 0x11d   :  { %1612 = vmatprep.subr.bf16.mxu1 %v3131_v9  ;;  %v3215_v9 = vld [vmem:[#allocation5 + $0x56c] ss:$16 sps:$4 sm:$0xff]  }
 0x11e   :  { %1443 = vmatpush1.bf16.msra.mxu0 %v3126_v10  ;;  %v3210_v10 = vld [vmem:[#allocation5 + $0x580] ss:$16 sps:$4 sm:$0xff]  }
 0x11f   :  { %1444 = vmatprep.subr.bf16.mxu0 %v3134_v13  ;;  %v3218_v13 = vld [vmem:[#allocation5 + $0x5a4] ss:$16 sps:$4 sm:$0xff]  }
 0x120   :  { %1613 = vmatpush1.bf16.msra.mxu1 %v3129_v12  ;;  %v3213_v12 = vld [vmem:[#allocation5 + $0x568] ss:$16 sps:$4 sm:$0xff]  }
 0x121   :  { %1614 = vmatprep.subr.bf16.mxu1 %v3137_v14  ;;  %v3221_v14 = vld [vmem:[#allocation5 + $0x58c] ss:$16 sps:$4 sm:$0xff]  }
 0x122   :  { %1445 = vmatpush1.bf16.msra.mxu0 %v3132_v15  ;;  %v3216_v15 = vld [vmem:[#allocation5 + $0x5a0] ss:$16 sps:$4 sm:$0xff]  }
 0x123   :  { %1457 = vmatprep.subr.bf16.mxu0 %v3140_v19  ;;  %v3222_v19 = vld [vmem:[#allocation5 + $0x5c0] ss:$16 sps:$4 sm:$0xff]  }
 0x124   :  { %1615 = vmatpush1.bf16.msra.mxu1 %v3135_v18  ;;  %v3227_v18 = vld [vmem:[#allocation5 + $0x5ac] ss:$16 sps:$4 sm:$0xff]  }
 0x125   :  { %1616 = vmatprep.subr.bf16.mxu1 %v3143_v20  ;;  %1447 = vmatmul.mubr.bf16.vlgmr.msra.gmra.mrb[0].mxu0 %v164_v21  ;;  %v3225_v20 = vld [vmem:[#allocation5 + $0x5a8] ss:$16 sps:$4 sm:$0xff]  }
 0x126   :  { %1458 = vmatpush1.bf16.msra.mxu0 %v3138_v22  ;;  %1489 = vmatprep.mubr.bf16.mxu0 %v167_v29  ;;  %v3233_v22 = vld [vmem:[#allocation5 + $0x5cc] ss:$16 sps:$4 sm:$0xff]  }
 0x127   :  { %1459 = vmatprep.subr.bf16.mxu0 %v3146_v24  ;;  %v152_v24 = vld [vmem:[#allocation2 + $0x20] sm:$0xff] }
 0x128   :  { %1617 = vmatpush1.bf16.msra.mxu1 %v3141_v23  ;;  %v3228_v23 = vld [vmem:[#allocation5 + $0x5e0] ss:$16 sps:$4 sm:$0xff]  }
 0x129   :  { %1629 = vmatprep.subr.bf16.mxu1 %v3149_v25  ;;  %v159_v25 = vld [vmem:[#allocation2 + $0x58] sm:$0xff] }
 0x12a   :  { %1460 = vmatpush1.bf16.msra.mxu0 %v3144_v28  ;;  %v3236_v28 = vld [vmem:[#allocation5 + $0x5ec] ss:$16 sps:$4 sm:$0xff]  }
 0x12b   :  { %1619 = vmatmul.mubr.bf16.vlgmr.msra.gmra.mrb[4].mxu1 %v164_v21  ;;  %1461 = vmatprep.subr.bf16.mxu0 %v3152_v31  ;;  %v3230_v21 = vld [vmem:[#allocation5 + $0x5e4] ss:$16 sps:$4 sm:$0xff]   ;;  %v3234_v31 = vld [vmem:[#allocation5 + $0x5e8] ss:$16 sps:$4 sm:$0xff]  }
 0x12c   :  { %1630 = vmatpush1.bf16.msra.mxu1 %v3147_v30  ;;  %1661 = vmatprep.mubr.bf16.mxu1 %v167_v29  ;;  %v166_v29 = vpack.c.bf16 %v159_v25, %v152_v24  ;;  %v3240_v30 = vld [vmem:[#allocation8] ss:$8 sps:$4 sm:$0xff]  }
 0x12d   :  { %1631 = vmatprep.subr.bf16.mxu1 %v3155_v32  ;;  %v3245_v32 = vld [vmem:[#allocation8 + $0x14] ss:$8 sps:$4 sm:$0xff]  }
 0x12e   :  { %1462 = vmatpush1.bf16.msra.mxu0 %v3150_v33  ;;  %v3239_v33 = vld [vmem:[#allocation5 + $0x60c] ss:$16 sps:$4 sm:$0xff]  }
 0x12f   :  { %1463 = vmatprep.subr.bf16.mxu0 %v3158_v35  ;;  %v3237_v35 = vld [vmem:[#allocation5 + $0x608] ss:$16 sps:$4 sm:$0xff]  }
 0x130   :  { %1632 = vmatpush1.bf16.msra.mxu1 %v3153_v34  ;;  %v3243_v34 = vld [vmem:[#allocation8 + $0x10] ss:$8 sps:$4 sm:$0xff]  }
 0x131   :  { %1633 = vmatprep.subr.bf16.mxu1 %v3161_v36  ;;  %v3248_v36 = vld [vmem:[#allocation8 + $0x24] ss:$8 sps:$4 sm:$0xff]  }
 0x132   :  { %1464 = vmatpush1.bf16.msra.mxu0 %v3156_v37  ;;  %v3246_v37 = vld [vmem:[#allocation8 + $0x20] ss:$8 sps:$4 sm:$0xff]  }
 0x133   :  { %1465 = vmatprep.subr.bf16.mxu0 %v3164_v39  ;;  %v3249_v39 = vld [vmem:[#allocation8 + $0x30] ss:$8 sps:$4 sm:$0xff]  }
 0x134   :  { %1634 = vmatpush1.bf16.msra.mxu1 %v3159_v38  ;;  %v3251_v38 = vld [vmem:[#allocation8 + $0x34] ss:$8 sps:$4 sm:$0xff]  }
 0x135   :  { %1635 = vmatprep.subr.bf16.mxu1 %v3167_v40  ;;  %v3254_v40 = vld [vmem:[#allocation8 + $0x44] ss:$8 sps:$4 sm:$0xff]  }
 0x136   :  { %1466 = vmatpush1.bf16.msra.mxu0 %v3162_v41  ;;  %v3252_v41 = vld [vmem:[#allocation8 + $0x40] ss:$8 sps:$4 sm:$0xff]  }
 0x137   :  { %1467 = vmatprep.subr.bf16.mxu0 %v3170_v43  ;;  %v3255_v43 = vld [vmem:[#allocation8 + $0x50] ss:$8 sps:$4 sm:$0xff]  }
 0x138   :  { %1636 = vmatpush1.bf16.msra.mxu1 %v3165_v42  ;;  %v3257_v42 = vld [vmem:[#allocation8 + $0x54] ss:$8 sps:$4 sm:$0xff]  }
 0x139   :  { %1637 = vmatprep.subr.bf16.mxu1 %v3173_v44  ;;  %v3260_v44 = vld [vmem:[#allocation8 + $0x64] ss:$8 sps:$4 sm:$0xff]  }
 0x13a   :  { %1468 = vmatpush1.bf16.msra.mxu0 %v3168_v45  ;;  %v3258_v45 = vld [vmem:[#allocation8 + $0x60] ss:$8 sps:$4 sm:$0xff]  }
 0x13b   :  { %1469 = vmatprep.subr.bf16.mxu0 %v3176_v47 }
 0x13c   :  { %1638 = vmatpush1.bf16.msra.mxu1 %v3171_v46 }
 0x13d   :  { %1639 = vmatprep.subr.bf16.mxu1 %v3179_v48  ;;  %v3261_v48 = vld [vmem:[#allocation8 + $0x70] ss:$8 sps:$4 sm:$0xff]  }
 0x13e   :  { %1470 = vmatpush1.bf16.msra.mxu0 %v3174_v49 }
 0x13f   :  { %1471 = vmatprep.subr.bf16.mxu0 %v3182_v51 }
 0x140   :  { %1640 = vmatpush1.bf16.msra.mxu1 %v3177_v50  ;;  %v3266_v50 = vld [vmem:[#allocation8 + $0x84] ss:$8 sps:$4 sm:$0xff]  }
 0x141   :  { %1641 = vmatprep.subr.bf16.mxu1 %v3185_v52  ;;  %v3269_v52 = vld [vmem:[#allocation8 + $0x94] ss:$8 sps:$4 sm:$0xff]  }
 0x142   :  { %1472 = vmatpush1.bf16.msra.mxu0 %v3180_v53  ;;  %v3267_v53 = vld [vmem:[#allocation8 + $0x90] ss:$8 sps:$4 sm:$0xff]  }
 0x143   :  { %1473 = vmatprep.subr.bf16.mxu0 %v3188_v55  ;;  %v3270_v55 = vld [vmem:[#allocation8 + $0xa0] ss:$8 sps:$4 sm:$0xff]  }
 0x144   :  { %1642 = vmatpush1.bf16.msra.mxu1 %v3183_v54  ;;  %v3272_v54 = vld [vmem:[#allocation8 + $0xa4] ss:$8 sps:$4 sm:$0xff]  }
 0x145   :  { %1643 = vmatprep.subr.bf16.mxu1 %v3191_v56  ;;  %v3275_v56 = vld [vmem:[#allocation8 + $0xb4] ss:$8 sps:$4 sm:$0xff]  }
 0x146   :  { %1474 = vmatpush1.bf16.msra.mxu0 %v3186_v57  ;;  %v3273_v57 = vld [vmem:[#allocation8 + $0xb0] ss:$8 sps:$4 sm:$0xff]  }
 0x147   :  { %1475 = vmatprep.subr.bf16.mxu0 %v3194_v59  ;;  %v3276_v59 = vld [vmem:[#allocation8 + $0xc0] ss:$8 sps:$4 sm:$0xff]  }
 0x148   :  { %1644 = vmatpush1.bf16.msra.mxu1 %v3189_v58  ;;  %v3278_v58 = vld [vmem:[#allocation8 + $0xc4] ss:$8 sps:$4 sm:$0xff]  }
 0x149   :  { %1645 = vmatprep.subr.bf16.mxu1 %v3197_v60  ;;  %v3281_v60 = vld [vmem:[#allocation8 + $0xd4] ss:$8 sps:$4 sm:$0xff]  }
 0x14a   :  { %1476 = vmatpush1.bf16.msra.mxu0 %v3192_v61  ;;  %v3279_v61 = vld [vmem:[#allocation8 + $0xd0] ss:$8 sps:$4 sm:$0xff]  }
 0x14b   :  { %1477 = vmatprep.subr.bf16.mxu0 %v3200_v63  ;;  %v3282_v63 = vld [vmem:[#allocation8 + $0xe0] ss:$8 sps:$4 sm:$0xff]  }
 0x14c   :  { %1646 = vmatpush1.bf16.msra.mxu1 %v3195_v62  ;;  %v3284_v62 = vld [vmem:[#allocation8 + $0xe4] ss:$8 sps:$4 sm:$0xff]  }
 0x14d   :  { %1647 = vmatprep.subr.bf16.mxu1 %v3203_v1  ;;  %v3287_v1 = vld [vmem:[#allocation8 + $0xf4] ss:$8 sps:$4 sm:$0xff]  }
 0x14e   :  { %1478 = vmatpush1.bf16.msra.mxu0 %v3198_v2  ;;  %v3285_v2 = vld [vmem:[#allocation8 + $0xf0] ss:$8 sps:$4 sm:$0xff]  }
 0x14f   :  { %1479 = vmatprep.subr.bf16.mxu0 %v3206_v4  ;;  %v3336_v4 = vld [vmem:[#allocation11 + $0x40] sm:$0xff]  }
 0x150   :  { %1648 = vmatpush1.bf16.msra.mxu1 %v3201_v3  ;;  %v3290_v3 = vld [vmem:[#allocation8 + $0x104] ss:$8 sps:$4 sm:$0xff]  }
 0x151   :  { %1649 = vmatprep.subr.bf16.mxu1 %v3209_v5  ;;  %v3337_v5 = vld [vmem:[#allocation11] sm:$0xff]  }
 0x152   :  { %1480 = vmatpush1.bf16.msra.mxu0 %v3204_v6  ;;  %v3338_v6 = vld [vmem:[#allocation11 + $0x48] sm:$0xff]  }
 0x153   :  { %1481 = vmatprep.subr.bf16.mxu0 %v3212_v8  ;;  %v3340_v8 = vld [vmem:[#allocation11 + $0x50] sm:$0xff]  }
 0x154   :  { %1650 = vmatpush1.bf16.msra.mxu1 %v3207_v7  ;;  %v3339_v7 = vld [vmem:[#allocation11 + $0x8] sm:$0xff]  }
 0x155   :  { %1651 = vmatprep.subr.bf16.mxu1 %v3215_v9  ;;  %v3341_v9 = vld [vmem:[#allocation11 + $0x10] sm:$0xff]  }
 0x156   :  { %1482 = vmatpush1.bf16.msra.mxu0 %v3210_v10  ;;  %v3342_v10 = vld [vmem:[#allocation11 + $0x58] sm:$0xff]  }
 0x157   :  { %1483 = vmatprep.subr.bf16.mxu0 %v3218_v13  ;;  %v3344_v13 = vld [vmem:[#allocation11 + $0x60] sm:$0xff]  }
 0x158   :  { %1652 = vmatpush1.bf16.msra.mxu1 %v3213_v12  ;;  %v3343_v12 = vld [vmem:[#allocation11 + $0x18] sm:$0xff]  }
 0x159   :  { %1653 = vmatprep.subr.bf16.mxu1 %v3221_v14  ;;  %v3345_v14 = vld [vmem:[#allocation11 + $0x20] sm:$0xff]  }
 0x15a   :  { %1484 = vmatpush1.bf16.msra.mxu0 %v3216_v15  ;;  %v3346_v15 = vld [vmem:[#allocation11 + $0x68] sm:$0xff]  }
 0x15b   :  { %1485 = vmatprep.subr.bf16.mxu0 %v3224_v17 }
 0x15c   :  { %1654 = vmatpush1.bf16.msra.mxu1 %v3219_v16  ;;  %v367_v16 = vlaneseq }
 0x15d   :  { %1655 = vmatprep.subr.bf16.mxu1 %v3227_v18 }
 0x15e   :  { %1486 = vmatpush1.bf16.msra.mxu0 %v3222_v19  ;;  %v3793_v17 = vshrl.u32 %v367_v16, 7  ;;  %v365_v19 = vld [vmem:[#allocation7] sm:$0xf] }
 0x15f   :  { %1487 = vmatprep.subr.bf16.mxu0 %v3230_v21  ;;  %v3323_v16 = vld [vmem:[#allocation8 + $0x1b4] ss:$8 sps:$4 sm:$0xff]  }
 0x160   :  { %1656 = vmatpush1.bf16.msra.mxu1 %v3225_v20  ;;  %v369_v18 = vsub.s32 0, %v3793_v17  ;;  %v373_v20 = vsub.s32 1, %v3793_v17 }
 0x161   :  { %1657 = vmatprep.subr.bf16.mxu1 %v3233_v22 }
 0x162   :  { %1488 = vmatpush1.bf16.msra.mxu0 %v3228_v23  ;;  %v370_v21 = vrot.slane %v365_v19, %v369_v18  ;;  %v374_v22 = vrot.slane %v365_v19, %v373_v20 }
 0x163   :  { %2123 = vmatprep.subr.bf16.mxu0 %v3242_v27 }
 0x164   :  { %1658 = vmatpush1.bf16.msra.mxu1 %v3231_v26 }
 0x165   :  { %1659 = vmatprep.subr.bf16.mxu1 %v3236_v28  ;;  %1490 = vmatmul.mubr.bf16.vlgmr.msra.gmra.mrb[0].mxu0 %v166_v29 }
 0x166   :  { %2124 = vmatpush1.bf16.msra.mxu0 %v3240_v30 }
 0x167   :  { %2125 = vmatprep.subr.bf16.mxu0 %v3245_v32 }
 0x168   :  { %1660 = vmatpush1.bf16.msra.mxu1 %v3234_v31 }
 0x169   :  { %1672 = vmatprep.subr.bf16.mxu1 %v3239_v33 }
 0x16a   :  { %2126 = vmatpush1.bf16.msra.mxu0 %v3243_v34 }
 0x16b   :  { %1662 = vmatmul.mubr.bf16.vlgmr.msra.gmra.mrb[4].mxu1 %v166_v29  ;;  %2127 = vmatprep.subr.bf16.mxu0 %v3248_v36 }
 0x16c   :  { %1673 = vmatpush1.bf16.msra.mxu1 %v3237_v35  ;;  %1704 = vmatprep.mubr.bf16.mxu1 %v3609_v0  ;;  %v3263_v0 = vld [vmem:[#allocation8 + $0x74] ss:$8 sps:$4 sm:$0xff]  }
 0x16d   :  { %2834 = vmatprep.subr.bf16.mxu1 %v3336_v4  ;;  %v3303_v4 = vld [vmem:[#allocation8 + $0x150] ss:$8 sps:$4 sm:$0xff]  }
 0x16e   :  { %2128 = vmatpush1.bf16.msra.mxu0 %v3246_v37 }
 0x16f   :  { %2129 = vmatprep.subr.bf16.mxu0 %v3251_v38 }
 0x172   :  { %2130 = vmatpush1.bf16.msra.mxu0 %v3249_v39 }
 0x173   :  { %2131 = vmatprep.subr.bf16.mxu0 %v3254_v40 }
 0x176   :  { %2132 = vmatpush1.bf16.msra.mxu0 %v3252_v41  ;;  %v3288_v41 = vld [vmem:[#allocation8 + $0x100] ss:$8 sps:$4 sm:$0xff]  }
 0x177   :  { %2734 = vmatmul.mubr.msk.bf16.vlgmr.msra.gmra.mrb[4].mxu1 %vm1367_vm0, %v3778_v11  ;;  %2133 = vmatprep.subr.bf16.mxu0 %v3257_v42  ;;  %v3264_v11 = vld [vmem:[#allocation8 + $0x80] ss:$8 sps:$4 sm:$0xff]   ;;  %v377_v42 = vsub.s32 2, %v3793_v17 }
 0x178   :  { %2835 = vmatpush3.bf16.msra.mxu1 %v3337_v5  ;;  %v3308_v5 = vld [vmem:[#allocation8 + $0x164] ss:$8 sps:$4 sm:$0xff]  }
 0x179   :  { %2836 = vmatprep.subr.bf16.mxu1 %v3338_v6  ;;  %v3306_v6 = vld [vmem:[#allocation8 + $0x160] ss:$8 sps:$4 sm:$0xff]  }
 0x17a   :  { %2134 = vmatpush1.bf16.msra.mxu0 %v3255_v43  ;;  %v3293_v43 = vld [vmem:[#allocation8 + $0x114] ss:$8 sps:$4 sm:$0xff]  }
 0x17b   :  { %2135 = vmatprep.subr.bf16.mxu0 %v3260_v44  ;;  %v381_v44 = vsub.s32 3, %v3793_v17  ;;  %v3353_v17 = vld [vmem:[#allocation14 + $0x8] sm:$0xff]  }
 0x17c   :  { %2837 = vmatpush3.bf16.msra.mxu1 %v3339_v7  ;;  %v3311_v7 = vld [vmem:[#allocation8 + $0x174] ss:$8 sps:$4 sm:$0xff]  }
 0x17d   :  { %2838 = vmatprep.subr.bf16.mxu1 %v3340_v8  ;;  %v3309_v8 = vld [vmem:[#allocation8 + $0x170] ss:$8 sps:$4 sm:$0xff]  }
 0x17e   :  { %v3785_v46 = vpop.f32.mrb[0].mxu1  ;;  %2136 = vmatpush1.bf16.msra.mxu0 %v3258_v45  ;;  %v378_v45 = vrot.slane %v365_v19, %v377_v42 }
 0x17f   :  { %v3787_v47 = vpop.f32.mrb[1].mxu1  ;;  %2137 = vmatprep.subr.bf16.mxu0 %v3263_v0  ;;  %v3291_v0 = vld [vmem:[#allocation8 + $0x110] ss:$8 sps:$4 sm:$0xff]  }
 0x180   :  { %v3789_v49 = vpop.f32.mrb[2].mxu1  ;;  %2839 = vmatpush3.bf16.msra.mxu1 %v3341_v9  ;;  %v3314_v9 = vld [vmem:[#allocation8 + $0x184] ss:$8 sps:$4 sm:$0xff]  }
 0x181   :  { %v3791_v51 = vpop.f32.mrb[3].mxu1  ;;  %2840 = vmatprep.subr.bf16.mxu1 %v3342_v10  ;;  %v3312_v10 = vld [vmem:[#allocation8 + $0x180] ss:$8 sps:$4 sm:$0xff]  }
 0x182   :  { %2138 = vmatpush1.bf16.msra.mxu0 %v3261_v48 }
 0x183   :  { %2139 = vmatprep.subr.bf16.mxu0 %v3266_v50 }
 0x184   :  { %2841 = vmatpush3.bf16.msra.mxu1 %v3343_v12  ;;  %v3317_v12 = vld [vmem:[#allocation8 + $0x194] ss:$8 sps:$4 sm:$0xff]  }
 0x185   :  { %2842 = vmatprep.subr.bf16.mxu1 %v3344_v13  ;;  %v3315_v13 = vld [vmem:[#allocation8 + $0x190] ss:$8 sps:$4 sm:$0xff]  }
 0x186   :  { %2140 = vmatpush1.bf16.msra.mxu0 %v3264_v11 }
 0x187   :  { %2141 = vmatprep.subr.bf16.mxu0 %v3269_v52 }
 0x188   :  { %2843 = vmatpush3.bf16.msra.mxu1 %v3345_v14  ;;  %v3320_v14 = vld [vmem:[#allocation8 + $0x1a4] ss:$8 sps:$4 sm:$0xff]  }
 0x189   :  { %2844 = vmatprep.subr.bf16.mxu1 %v3346_v15  ;;  %v3318_v15 = vld [vmem:[#allocation8 + $0x1a0] ss:$8 sps:$4 sm:$0xff]  }
 0x18a   :  { %2142 = vmatpush1.bf16.msra.mxu0 %v3267_v53  ;;  %v3299_v53 = vld [vmem:[#allocation8 + $0x134] ss:$8 sps:$4 sm:$0xff]  }
 0x18b   :  { %2143 = vmatprep.subr.bf16.mxu0 %v3272_v54 }
 0x18e   :  { %2144 = vmatpush1.bf16.msra.mxu0 %v3270_v55 }
 0x18f   :  { %2145 = vmatprep.subr.bf16.mxu0 %v3275_v56 }
 0x192   :  { %2146 = vmatpush1.bf16.msra.mxu0 %v3273_v57 }
 0x193   :  { %2147 = vmatprep.subr.bf16.mxu0 %v3278_v58 }
 0x196   :  { %2148 = vmatpush1.bf16.msra.mxu0 %v3276_v59  ;;  %v3297_v59 = vld [vmem:[#allocation8 + $0x130] ss:$8 sps:$4 sm:$0xff]  }
 0x197   :  { %2149 = vmatprep.subr.bf16.mxu0 %v3281_v60 }
 0x19a   :  { %2150 = vmatpush1.bf16.msra.mxu0 %v3279_v61 }
 0x19b   :  { %2151 = vmatprep.subr.bf16.mxu0 %v3284_v62  ;;  %v3302_v62 = vld [vmem:[#allocation8 + $0x144] ss:$8 sps:$4 sm:$0xff]  }
 0x19e   :  { %2152 = vmatpush1.bf16.msra.mxu0 %v3282_v63 }
 0x19f   :  { %2153 = vmatprep.subr.bf16.mxu0 %v3287_v1 }
 0x1a2   :  { %2154 = vmatpush1.bf16.msra.mxu0 %v3285_v2  ;;  %v3300_v2 = vld [vmem:[#allocation8 + $0x140] ss:$8 sps:$4 sm:$0xff]  }
 0x1a3   :  { %2166 = vmatprep.subr.bf16.mxu0 %v3290_v3  ;;  %v3305_v3 = vld [vmem:[#allocation8 + $0x154] ss:$8 sps:$4 sm:$0xff]  }
 0x238   :  { %v1491_v23 = vpop.f32.mrb[0].mxu0 }
 0x239   :  { %v2885_v24 = vadd.f32 %v1491_v23, %v370_v21  ;;  %v1493_v25 = vpop.f32.mrb[1].mxu0  ;;  %v3329_v23 = vld [vmem:[#allocation8 + $0x1d4] ss:$8 sps:$4 sm:$0xff]  }
 0x23a   :  { %v2887_v26 = vadd.f32 %v1493_v25, %v374_v22  ;;  %v1495_v27 = vpop.f32.mrb[2].mxu0  ;;  %v3332_v25 = vld [vmem:[#allocation8 + $0x1e4] ss:$8 sps:$4 sm:$0xff]  }
 0x23b   :  { %v2886_v28 = vadd.f32 %v2885_v24, %v3785_v46  ;;  %v2889_v29 = vadd.f32 %v1495_v27, %v370_v21  ;;  %v1497_v30 = vpop.f32.mrb[3].mxu0  ;;  %v382_v46 = vrot.slane %v365_v19, %v381_v44  ;;  %v3321_v19 = vld [vmem:[#allocation8 + $0x1b0] ss:$8 sps:$4 sm:$0xff]   ;;  %v3326_v21 = vld [vmem:[#allocation8 + $0x1c4] ss:$8 sps:$4 sm:$0xff]  }
 0x23c   :  { %v2888_v31 = vadd.f32 %v2887_v26, %v3787_v47  ;;  %v2891_v32 = vadd.f32 %v1497_v30, %v374_v22  ;;  %v3296_v47 = vld [vmem:[#allocation8 + $0x124] ss:$8 sps:$4 sm:$0xff]   ;;  %v3324_v22 = vld [vmem:[#allocation8 + $0x1c0] ss:$8 sps:$4 sm:$0xff]   ;;  %v3327_v24 = vld [vmem:[#allocation8 + $0x1d0] ss:$8 sps:$4 sm:$0xff]  }
 0x23d   :  { %v2890_v33 = vadd.f32 %v2889_v29, %v3789_v49  ;;  %v1715_v35 = vmax.f32 %v2886_v28, 0.0  ;;  %v3330_v26 = vld [vmem:[#allocation8 + $0x1e0] ss:$8 sps:$4 sm:$0xff]   ;;  %v3335_v27 = vld [vmem:[#allocation8 + $0x1f4] ss:$8 sps:$4 sm:$0xff]  }
 0x23e   :  { %v2892_v34 = vadd.f32 %v2891_v32, %v3791_v51  ;;  %v1716_v37 = vmax.f32 %v2888_v31, 0.0  ;;  %v3294_v51 = vld [vmem:[#allocation8 + $0x120] ss:$8 sps:$4 sm:$0xff]   ;;  %v3333_v28 = vld [vmem:[#allocation8 + $0x1f0] ss:$8 sps:$4 sm:$0xff]  }
 0x23f   :  { %v1719_v36 = vmax.f32 %v2890_v33, 0.0  ;;  %v3347_v29 = vld [vmem:[#allocation11 + $0x28] sm:$0xff]   ;;  %v3348_v30 = vld [vmem:[#allocation11 + $0x70] sm:$0xff]   ;;  %v3350_v32 = vld [vmem:[#allocation11 + $0x78] sm:$0xff]  }
 0x240   :  { %v1720_v38 = vmax.f32 %v2892_v34, 0.0  ;;  %2845 = vmatpush3.bf16.msra.mxu1 %v3347_v29  ;;  %v3349_v31 = vld [vmem:[#allocation11 + $0x30] sm:$0xff]   ;;  %v3351_v33 = vld [vmem:[#allocation11 + $0x38] sm:$0xff]   ;;  %v3610_v34 = vmov 0.0  }
 0x241   :  { %v1723_v39 = vpack.c.bf16 %v1719_v36, %v1715_v35  ;;  %2846 = vmatprep.subr.bf16.mxu1 %v3348_v30  ;;  %v1791_v35 = vld [vmem:[#allocation10] sm:$0x3] }
 0x242   :  { %v1724_v40 = vpack.c.bf16 %v1720_v38, %v1716_v37  ;;  %v1796_v36 = vrot.slane %v1791_v35, %v369_v18  ;;  %v1800_v37 = vrot.slane %v1791_v35, %v373_v20  ;;  %v3354_v18 = vld [vmem:[#allocation14 + $0x10] sm:$0xff]   ;;  %v3355_v20 = vld [vmem:[#allocation14 + $0x18] sm:$0xff]  }
 0x244   :  { %2155 = vmatprep.mubr.bf16.mxu0 %v1724_v40  ;;  %2847 = vmatpush3.bf16.msra.mxu1 %v3349_v31 }
 0x245   :  { %2156 = vmatmul.mubr.bf16.vlgmr.msra.gmra.mrb[4].mxu0 %v1723_v39  ;;  %2848 = vmatprep.subr.bf16.mxu1 %v3350_v32 }
 0x246   :  { %2167 = vmatpush1.bf16.msra.mxu0 %v3288_v41 }
 0x247   :  { %2168 = vmatprep.subr.bf16.mxu0 %v3293_v43 }
 0x248   :  { %2849 = vmatpush3.bf16.msra.mxu1 %v3351_v33 }
 0x249   :  { %2865 = vmatprep.subr.bf16.mxu1 %v3610_v34 }
 0x24a   :  { %v1706_v48 = vpop.f32.mrb[4].mxu1  ;;  %2169 = vmatpush1.bf16.msra.mxu0 %v3291_v0 }
 0x24b   :  { %v2893_v49 = vadd.f32 %v1706_v48, %v378_v45  ;;  %v1708_v50 = vpop.f32.mrb[5].mxu1  ;;  %2170 = vmatprep.subr.bf16.mxu0 %v3296_v47 }
 0x24c   :  { %v2894_v11 = vadd.f32 %v1708_v50, %v382_v46  ;;  %v1710_v52 = vpop.f32.mrb[6].mxu1 }
 0x24d   :  { %v2895_v54 = vadd.f32 %v1710_v52, %v378_v45  ;;  %v1712_v55 = vpop.f32.mrb[7].mxu1  ;;  %v1717_v57 = vmax.f32 %v2893_v49, 0.0  ;;  %v3357_v52 = vld [vmem:[#allocation14 + $0x28] sm:$0xff]  }
 0x24e   :  { %v2896_v56 = vadd.f32 %v1712_v55, %v382_v46  ;;  %2171 = vmatpush1.bf16.msra.mxu0 %v3294_v51  ;;  %v1718_v60 = vmax.f32 %v2894_v11, 0.0  ;;  %v3352_v51 = vld [vmem:[#allocation14] sm:$0xff]  }
 0x24f   :  { %v1721_v58 = vmax.f32 %v2895_v54, 0.0  ;;  %2172 = vmatprep.subr.bf16.mxu0 %v3299_v53  ;;  %v3356_v11 = vld [vmem:[#allocation14 + $0x20] sm:$0xff]   ;;  %v3358_v53 = vld [vmem:[#allocation14 + $0x30] sm:$0xff]   ;;  %v3359_v54 = vld [vmem:[#allocation14 + $0x38] sm:$0xff]  }
 0x250   :  { %v1722_v61 = vmax.f32 %v2896_v56, 0.0  ;;  %v2799_v56 = vld [vmem:[#allocation13] ss:$0 sm:$0xff] }
 0x251   :  { %v1725_v63 = vpack.c.bf16 %v1721_v58, %v1717_v57 }
 0x252   :  { %v1726_v1 = vpack.c.bf16 %v1722_v61, %v1718_v60  ;;  %2173 = vmatpush1.bf16.msra.mxu0 %v3297_v59 }
 0x253   :  { %2174 = vmatprep.subr.bf16.mxu0 %v3302_v62 }
 0x254   :  { %2198 = vmatprep.mubr.bf16.mxu0 %v1726_v1 }
 0x256   :  { %2175 = vmatpush1.bf16.msra.mxu0 %v3300_v2 }
 0x257   :  { %2176 = vmatprep.subr.bf16.mxu0 %v3305_v3 }
 0x25a   :  { %2177 = vmatpush1.bf16.msra.mxu0 %v3303_v4  ;;  %v2816_v4 = vld [vmem:[#allocation16] ss:$0 sm:$0xff] }
 0x25b   :  { %2178 = vmatprep.subr.bf16.mxu0 %v3308_v5 }
 0x25e   :  { %2179 = vmatpush1.bf16.msra.mxu0 %v3306_v6 }
 0x25f   :  { %2180 = vmatprep.subr.bf16.mxu0 %v3311_v7 }
 0x262   :  { %2181 = vmatpush1.bf16.msra.mxu0 %v3309_v8 }
 0x263   :  { %2182 = vmatprep.subr.bf16.mxu0 %v3314_v9 }
 0x266   :  { %2183 = vmatpush1.bf16.msra.mxu0 %v3312_v10 }
 0x267   :  { %2184 = vmatprep.subr.bf16.mxu0 %v3317_v12 }
 0x26a   :  { %2185 = vmatpush1.bf16.msra.mxu0 %v3315_v13 }
 0x26b   :  { %2186 = vmatprep.subr.bf16.mxu0 %v3320_v14 }
 0x26e   :  { %2187 = vmatpush1.bf16.msra.mxu0 %v3318_v15 }
 0x26f   :  { %2188 = vmatprep.subr.bf16.mxu0 %v3323_v16 }
 0x272   :  { %2189 = vmatpush1.bf16.msra.mxu0 %v3321_v19 }
 0x273   :  { %2190 = vmatprep.subr.bf16.mxu0 %v3326_v21 }
 0x276   :  { %2191 = vmatpush1.bf16.msra.mxu0 %v3324_v22 }
 0x277   :  { %2192 = vmatprep.subr.bf16.mxu0 %v3329_v23 }
 0x27a   :  { %2193 = vmatpush1.bf16.msra.mxu0 %v3327_v24 }
 0x27b   :  { %2194 = vmatprep.subr.bf16.mxu0 %v3332_v25 }
 0x27e   :  { %2195 = vmatpush1.bf16.msra.mxu0 %v3330_v26 }
 0x27f   :  { %2196 = vmatprep.subr.bf16.mxu0 %v3335_v27 }
 0x282   :  { %2197 = vmatpush1.bf16.msra.mxu0 %v3333_v28 }
 0x285   :  { %2199 = vmatmul.mubr.bf16.vlgmr.msra.gmra.mrb[4].mxu0 %v1725_v63 }
 0x358   :  { %v2200_v38 = vpop.f32.mrb[4].mxu0 }
 0x359   :  { %v2897_v39 = vadd.f32 %v2200_v38, %v1796_v36  ;;  %v2202_v40 = vpop.f32.mrb[5].mxu0 }
 0x35a   :  { %v2898_v41 = vadd.f32 %v2202_v40, %v1800_v37  ;;  %v2204_v42 = vpop.f32.mrb[6].mxu0 }
 0x35b   :  { %v2899_v43 = vadd.f32 %v2204_v42, %v1796_v36  ;;  %v2206_v44 = vpop.f32.mrb[7].mxu0  ;;  %v2209_v0 = vmax.f32 %v2897_v39, 0.0 }
 0x35c   :  { %v2900_v45 = vadd.f32 %v2206_v44, %v1800_v37  ;;  %v2210_v47 = vmax.f32 %v2898_v41, 0.0 }
 0x35d   :  { %v2211_v46 = vmax.f32 %v2899_v43, 0.0 }
 0x35e   :  { %v2212_v48 = vmax.f32 %v2900_v45, 0.0 }
 0x35f   :  { %v2213_v49 = vpack.c.bf16 %v2211_v46, %v2209_v0 }
 0x360   :  { %v2214_v50 = vpack.c.bf16 %v2212_v48, %v2210_v47 }
 0x362   :  { %2382 = vmatprep.mubr.bf16.mxu1 %v2214_v50 }
 0x363   :  { %2383 = vmatmul.mubr.bf16.vlgmr.msra.gmra.mrb[8].mxu1 %v2213_v49 }
 0x364   :  { %2866 = vmatpush3.bf16.msra.mxu1 %v3352_v51  ;;  %2881 = vmatprep.mubr.msk.bf16.mxu1 %vm3611_vm1, %v3610_v34 }
 0x365   :  { %2867 = vmatprep.subr.bf16.mxu1 %v3610_v34 }
 0x368   :  { %2868 = vmatpush3.bf16.msra.mxu1 %v3353_v17 }
 0x369   :  { %2869 = vmatprep.subr.bf16.mxu1 %v3610_v34 }
 0x36c   :  { %2870 = vmatpush3.bf16.msra.mxu1 %v3354_v18 }
 0x36d   :  { %2871 = vmatprep.subr.bf16.mxu1 %v3610_v34 }
 0x370   :  { %2872 = vmatpush3.bf16.msra.mxu1 %v3355_v20 }
 0x371   :  { %2873 = vmatprep.subr.bf16.mxu1 %v3610_v34 }
 0x374   :  { %2874 = vmatpush3.bf16.msra.mxu1 %v3356_v11 }
 0x375   :  { %2875 = vmatprep.subr.bf16.mxu1 %v3610_v34 }
 0x378   :  { %2876 = vmatpush3.bf16.msra.mxu1 %v3357_v52 }
 0x379   :  { %2877 = vmatprep.subr.bf16.mxu1 %v3610_v34 }
 0x37c   :  { %2878 = vmatpush3.bf16.msra.mxu1 %v3358_v53 }
 0x37d   :  { %2879 = vmatprep.subr.bf16.mxu1 %v3610_v34 }
 0x380   :  { %2880 = vmatpush3.bf16.msra.mxu1 %v3359_v54 }
 0x436   :  { %v2850_v55 = vpop.f32.mrb[8].mxu1 }
 0x437   :  { %v2851_v57 = vpop.f32.mrb[9].mxu1 }
 0x438   :  { %v2852_v58 = vadd.f32 %v2851_v57, %v2850_v55  ;;  %v2853_v59 = vpop.f32.mrb[10].mxu1 }
 0x439   :  { %v2854_v60 = vpop.f32.mrb[11].mxu1 }
 0x43a   :  { %v2385_v61 = vadd.f32 %v2852_v58, %v2799_v56  ;;  %v2855_v62 = vadd.f32 %v2854_v60, %v2853_v59 }
 0x43c   :  { %v2388_v63 = vadd.f32 %v2855_v62, %v2799_v56  ;;  %v2391_v1 = vmax.f32 %v2385_v61, 0.0 }
 0x43e   :  { %v2392_v2 = vmax.f32 %v2388_v63, 0.0 }
 0x440   :  { %v2393_v3 = vpack.c.bf16 %v2392_v2, %v2391_v1 }
 0x442   :  { %2882 = vmatmul.mubr.bf16.vlgmr.msra.gmra.mrb[12].mxu1 %v2393_v3 }
 0x515   :  { %v2499_v5 = vpop.f32.mrb[12].mxu1 }
 0x516   :  { %v2883_v6 = vpop.f32.mrb[13].mxu1  ;;  %v2500_v8 = vadd.f32 %v2816_v4, %v2499_v5 }
 0x517   :  { %v2502_v7 = vpop.f32.mrb[14].mxu1 }
 0x518   :  { %v2503_v9 = vadd.f32 %v2816_v4, %v2502_v7  ;;  %v2884_v10 = vpop.f32.mrb[15].mxu1 }
 0x51a   :  { %v2832_v12 = vpack.c.bf16 %v2503_v9, %v2500_v8 }
 0x51c   :  { %2833 = vst [vmem:[#allocation17] sm:$0xff] %v2832_v12  }
 0x51d   :  { %3569 = shalt.err (!%p3566_p6)
}
 0x51e   :  { %s3570_s10 = scalar_lea.hbm %s3835_s9, 128 }
 0x51f   :  { %p3571_p7 = scmp.ne.s32.totalorder %s3835_s9, %s3570_s10  ;;  %p3574_p8 = scmp.lt.u32.totalorder %s3570_s10, %s3835_s9 }
 0x521   :  { %p3576_p9 = pnand %p3574_p8, %p3571_p7 }
 0x523   :  { %3579 = shalt.err (!%p3576_p9)
}
 0x524   :  { %2527 = dma.vmem_to_hbm [thread:$0]  %s2522_s29, 128, %s3835_s9, [#allocation4], %s3599_s3, %s3599_s3, %s3600_s24  }
 0x525   :  { %3590 = dma.done.wait [#allocation4], 128  }
 0x526   :  { %3591 = vsyncadd [#allocation4], 4294967168 }
 0x527   :  { %2531 = vsyncpa [#allocation3], 1 }
 0x528   :  { %2532 = vsyncpa [#allocation6], 1 }
 0x529   :  { %2533 = vsyncpa [#allocation9], 1 }
 0x52a   :  { %2534 = vsyncpa [#allocation12], 1 }
 0x52b   :  { %2535 = vsyncpa [#allocation15], 1 }
 0x52c   :  { %2536 = vsyncpa [#allocation4], 1 }

</bundles_post_ra>
